<compile_context>
chip_gen: v7x
topology: tpu7x:2x2x1
jax: 0.10.0
libtpu: 0.0.40
codegen_flags: <defaults>
</compile_context>

<pallas_src>
import functools

import jax
import jax.numpy as jnp
from jax.experimental import pallas as pl
from jax.experimental.pallas import tpu as pltpu


def _round_up(n, m):
    return ((n + m - 1) // m) * m


# ----------------------------------------------------------------------------- layout
def _layout(input_dim, latent_dim):
    """Static, 128-lane-aligned column offsets for the fused weight/bias slabs."""
    LPAD = max(128, _round_up(latent_dim, 128))   # padded latent width
    IPAD = max(128, _round_up(input_dim, 128))    # padded rec-output width
    off = {"LPAD": LPAD, "IPAD": IPAD}

    # w_x   (K = input_dim): [ l1.enc0 (512) | l2.proj (LPAD) | l3.proj (LPAD) ]
    off["x_p2"], off["x_p3"], off["XW"] = 512, 512 + LPAD, 512 + 2 * LPAD

    # w_512 (K = 512): [ l1.enc1 (256) | l2.enc1 (256) | l3.enc1 (256) | l1.dec2 (IPAD) ]
    off["e2_1"], off["e2_2"], off["e2_3"], off["d3"] = 0, 256, 512, 768
    off["K512W"] = 768 + IPAD

    # w_256 (K = 256): [ l1.head mu|lv (2*LPAD) | l2.head mu (LPAD) | l3.head mu|lv (2*LPAD) | l1.dec1 (512) ]
    off["h1"], off["h2"], off["h3"], off["d2"] = 0, 2 * LPAD, 3 * LPAD, 5 * LPAD
    off["K256W"] = 5 * LPAD + 512

    # w_L   (K = LPAD): [ l1.dec0 (256) | l2.enc0 (512) | l3.enc0 (512) ]
    off["d1"], off["e1_2"], off["e1_3"] = 0, 256, 768
    off["KLW"] = 1280

    # single fused f32 bias vector; every segment width is a multiple of 128 lanes
    widths = [("b_x", off["XW"]), ("b_e2_1", 256), ("b_e2_2", 256), ("b_e2_3", 256),
              ("b_d3", IPAD), ("b_h1", 2 * LPAD), ("b_h2", LPAD), ("b_h3", 2 * LPAD),
              ("b_d2", 512), ("b_d1", 256), ("b_e1_2", 512), ("b_e1_3", 512)]
    pos = 0
    for name, w in widths:
        off[name] = pos
        pos += w
    off["BW"] = pos
    return off


# ----------------------------------------------------------------------------- kernel
def temporal_agg_kernel(off, mm_dtype,
                        x_ref, eps_ref, wx_ref, w512_ref, w256_ref, wL_ref, b_ref,
                        rec_ref, head3_ref):
    LPAD = off["LPAD"]
    relu = jax.nn.relu
    x = x_ref[...]            # f32
    eps = eps_ref[...]        # f32, zero in padded lanes

    def dense(h, w_ref, w_off, n, b_off):
        # bf16 (or f32) MXU inputs, f32 accumulation, f32 bias add.  All weight/bias
        # slices are static and 128-lane aligned (free views of resident VMEM slabs).
        return (jnp.dot(h.astype(mm_dtype), w_ref[:, w_off:w_off + n],
                        preferred_element_type=jnp.float32)
                + b_ref[:, b_off:b_off + n])

    # ---- fused x-projections: one MXU push for l1.enc0 / l2.proj / l3.proj ----------
    xz = dense(x, wx_ref, 0, off["XW"], off["b_x"])          # (tb, 512 + 2*LPAD)
    h1 = relu(xz[:, :512])
    p2 = xz[:, off["x_p2"]:off["x_p2"] + LPAD]
    p3 = xz[:, off["x_p3"]:off["x_p3"] + LPAD]

    # ---- layer1 (PrecursorSpeakerLayer): full VAE ------------------------------------
    h = relu(dense(h1, w512_ref, off["e2_1"], 256, off["b_e2_1"]))
    ml1 = dense(h, w256_ref, off["h1"], 2 * LPAD, off["b_h1"])      # [mu | logvar], padded lanes = 0
    speaker_mu, speaker_logvar = ml1[:, :LPAD], ml1[:, LPAD:]
    z = speaker_mu + eps * jnp.exp(0.5 * speaker_logvar)            # reparameterize; padded lanes stay 0
    h = relu(dense(z, wL_ref, off["d1"], 256, off["b_d1"]))
    h = relu(dense(h, w256_ref, off["d2"], 512, off["b_d2"]))
    rec_ref[...] = jax.nn.sigmoid(
        dense(h, w512_ref, off["d3"], off["IPAD"], off["b_d3"])).astype(rec_ref.dtype)

    # ---- layer2 (DisentangledContentLayer): only content_mu reaches the outputs ------
    h = relu(dense(p2 - speaker_mu, wL_ref, off["e1_2"], 512, off["b_e1_2"]))
    h = relu(dense(h, w512_ref, off["e2_2"], 256, off["b_e2_2"]))
    content_mu = dense(h, w256_ref, off["h2"], LPAD, off["b_h2"])

    # ---- layer3 (FinalSpeakerLayer): fused [mu | logvar] head -> lane-dense output ---
    h = relu(dense(p3 - content_mu, wL_ref, off["e1_3"], 512, off["b_e1_3"]))
    h = relu(dense(h, w512_ref, off["e2_3"], 256, off["b_e2_3"]))
    head3_ref[...] = dense(h, w256_ref, off["h3"], 2 * LPAD, off["b_h3"]).astype(head3_ref.dtype)


# --------------------------------------------------------------------- params / packing
def make_params(input_dim, latent_dim, key):
    """Raw per-layer params (f32). Weights stored (in, out) = nn.Linear.weight.T; biases (1, out)."""
    L = latent_dim
    shapes = [
        # layer1 VAE encoder
        (input_dim, 512), (1, 512), (512, 256), (1, 256), (256, 2 * L), (1, 2 * L),
        # layer1 VAE decoder
        (L, 256), (1, 256), (256, 512), (1, 512), (512, input_dim), (1, input_dim),
        # layer2 projection + encoder
        (input_dim, L), (1, L),
        (L, 512), (1, 512), (512, 256), (1, 256), (256, 2 * L), (1, 2 * L),
        # layer3 projection + encoder
        (input_dim, L), (1, L),
        (L, 512), (1, 512), (512, 256), (1, 256), (256, 2 * L), (1, 2 * L),
    ]
    keys = jax.random.split(key, len(shapes))
    params = []
    for k, s in zip(keys, shapes):
        fan_in = s[0] if s[0] > 1 else s[1]
        params.append(jax.random.normal(k, s, jnp.float32) * (1.0 / jnp.sqrt(fan_in)))
    return params


def pack_params(raw, input_dim, latent_dim, matmul_dtype=jnp.bfloat16):
    """Build 4 fused weight slabs (grouped by contraction dim) + 1 fused f32 bias vector.

    * mu/logvar heads fused into one 128-padded weight per layer.
    * every latent-wide dim padded to 128 lanes with ZERO cols/rows + zero bias, so padded
      lanes stay exactly 0 (exp(0)=1 noise is multiplied by eps=0 and killed by zero rows).
    * note: the bf16 option rounds every intermediate activation to bf16 before each
      matmul (f32 accumulation) -- an intentional accuracy/perf trade vs. the f32 module.
    """
    L = latent_dim
    off = _layout(input_dim, latent_dim)
    LPAD, IPAD = off["LPAD"], off["IPAD"]

    (w1e1, b1e1, w1e2, b1e2, w1e3, b1e3,
     w1d1, b1d1, w1d2, b1d2, w1d3, b1d3,
     w2p, b2p, w2e1, b2e1, w2e2, b2e2, w2e3, b2e3,
     w3p, b3p, w3e1, b3e1, w3e2, b3e2, w3e3, b3e3) = raw

    def pad_cols(a, width):
        return jnp.pad(a, ((0, 0), (0, width - a.shape[1])))

    def pad_rows(a, height):
        return jnp.pad(a, ((0, height - a.shape[0]), (0, 0)))

    def fuse_head(w, b):
        # (256, 2L)/(1, 2L) -> (256, 2*LPAD)/(1, 2*LPAD) laid out as [mu_pad | logvar_pad]
        return (jnp.concatenate([pad_cols(w[:, :L], LPAD), pad_cols(w[:, L:], LPAD)], axis=1),
                jnp.concatenate([pad_cols(b[:, :L], LPAD), pad_cols(b[:, L:], LPAD)], axis=1))

    w1h, b1h = fuse_head(w1e3, b1e3)
    w3h, b3h = fuse_head(w3e3, b3e3)
    w2h, b2h = pad_cols(w2e3[:, :L], LPAD), pad_cols(b2e3[:, :L], LPAD)   # layer2 logvar is dead code

    wx = jnp.concatenate([w1e1, pad_cols(w2p, LPAD), pad_cols(w3p, LPAD)], axis=1)
    bx = jnp.concatenate([b1e1, pad_cols(b2p, LPAD), pad_cols(b3p, LPAD)], axis=1)

    w512 = jnp.concatenate([w1e2, w2e2, w3e2, pad_cols(w1d3, IPAD)], axis=1)
    w256 = jnp.concatenate([w1h, w2h, w3h, w1d2], axis=1)
    wL = jnp.concatenate([pad_rows(w1d1, LPAD), pad_rows(w2e1, LPAD), pad_rows(w3e1, LPAD)], axis=1)

    bias = jnp.concatenate(
        [bx, b1e2, b2e2, b3e2, pad_cols(b1d3, IPAD),
         b1h, b2h, b3h, b1d2, b1d1, b2e1, b3e1], axis=1).astype(jnp.float32)

    packed = [wx.astype(matmul_dtype), w512.astype(matmul_dtype),
              w256.astype(matmul_dtype), wL.astype(matmul_dtype), bias]
    assert packed[0].shape == (input_dim, off["XW"])
    assert packed[1].shape == (512, off["K512W"])
    assert packed[2].shape == (256, off["K256W"])
    assert packed[3].shape == (LPAD, off["KLW"])
    assert packed[4].shape == (1, off["BW"])
    return packed, off


# ----------------------------------------------------------------------------- wrapper
def temporal_aggregation(x, eps, packed, off, input_dim, latent_dim, tile_b=None):
    """Returns (precursor_output, final_speaker_mu, final_speaker_logvar)."""
    B = x.shape[0]
    L = latent_dim
    LPAD, IPAD = off["LPAD"], off["IPAD"]

    # layer1 reparameterize noise, zero-padded to a full 128-lane vreg.
    eps_p = jnp.pad(eps.astype(jnp.float32), ((0, 0), (0, LPAD - eps.shape[1])))

    # Batch tiling: single tile for B <= 256 (weights DMA'd exactly once, no pipeline
    # overhead); 256-row tiles otherwise (fills MXU M on v6e/v7x; B >= 512 engages both
    # v7x TensorCores via the "parallel" axis).  On v5e, sweeping tile_b up to 512 simply
    # halves the grid-step overhead (128 MiB VMEM easily holds it).
    if tile_b is None:
        tile_b = B if B <= 256 else 256
    tile_b = min(tile_b, B)
    if tile_b < B:
        tile_b = _round_up(tile_b, 8)          # sub-array blocks need sublane alignment

    # Pad the batch instead of asserting divisibility; padded rows are sliced off below.
    Bp = _round_up(B, tile_b)
    xp = x.astype(jnp.float32)
    if Bp != B:
        xp = jnp.pad(xp, ((0, Bp - B), (0, 0)))
        eps_p = jnp.pad(eps_p, ((0, Bp - B), (0, 0)))
    num_tiles = Bp // tile_b
    multi = num_tiles > 1

    def batch_spec(feat):
        return pl.BlockSpec((tile_b, feat), lambda i: (i, 0))

    def weight_spec(shape):
        # Constant index_map: same whole-weight block every grid step.  On the multi-tile
        # path single-buffer it (the block never changes, double-buffering only wastes
        # VMEM -- matters most on v7x's 64 MiB).
        idx = lambda i: (0,) * len(shape)
        if multi:
            try:
                return pl.BlockSpec(shape, idx, pipeline_mode=pl.Buffered(1))
            except TypeError:   # older jax without pipeline_mode: fall back to default
                pass
        return pl.BlockSpec(shape, idx)

    in_specs = [batch_spec(input_dim), batch_spec(LPAD)] + [weight_spec(p.shape) for p in packed]

    # Lane-dense output slabs (unmasked vst); unpadded/sliced in the wrapper.
    out_shape = (
        jax.ShapeDtypeStruct((Bp, IPAD), jnp.float32),        # precursor_output (lane-padded)
        jax.ShapeDtypeStruct((Bp, 2 * LPAD), jnp.float32),    # [final mu | final logvar]
    )
    out_specs = (batch_spec(IPAD), batch_spec(2 * LPAD))

    # VMEM budget from the actual footprint; clamp to v7x's 64 MiB physical per-TC VMEM.
    w_bytes = sum(int(p.size) * p.dtype.itemsize for p in packed)
    io_bytes = 4 * tile_b * (input_dim + LPAD + IPAD + 2 * LPAD)
    inter_bytes = 4 * tile_b * (off["XW"] + 4 * 512 + 4 * 256 + 4 * LPAD + IPAD)
    est = (1 if multi else 2) * w_bytes + 2 * io_bytes + 2 * inter_bytes + (4 << 20)
    vmem_limit = int(min(max(est, 16 << 20), 64 << 20))

    grid_spec = pltpu.PrefetchScalarGridSpec(
        num_scalar_prefetch=0,
        grid=(num_tiles,),
        in_specs=in_specs,
        out_specs=out_specs,
    )

    rec_slab, head_slab = pl.pallas_call(
        functools.partial(temporal_agg_kernel, off, packed[0].dtype),
        out_shape=out_shape,
        grid_spec=grid_spec,
        compiler_params=pltpu.CompilerParams(
            # One tile: keep it on one core (a megacore split would only duplicate the
            # weight DMA).  Multi-tile: batch tiles are independent -> parallel.
            dimension_semantics=("parallel",) if multi else ("arbitrary",),
            vmem_limit_bytes=vmem_limit,
        ),
    )(xp, eps_p, *packed)

    precursor = rec_slab[:B, :input_dim]
    final_mu = head_slab[:B, :L]
    final_logvar = head_slab[:B, LPAD:LPAD + L]
    return precursor, final_mu, final_logvar


# --------------------------------------------------------------------------- reference
def reference(x, eps, raw, latent_dim, matmul_dtype=jnp.float32):
    """Pure-JAX reference matching the PyTorch forward; optional bf16 matmul inputs."""
    L = latent_dim
    (w1e1, b1e1, w1e2, b1e2, w1e3, b1e3,
     w1d1, b1d1, w1d2, b1d2, w1d3, b1d3,
     w2p, b2p, w2e1, b2e1, w2e2, b2e2, w2e3, b2e3,
     w3p, b3p, w3e1, b3e1, w3e2, b3e2, w3e3, b3e3) = raw

    def dense(h, w, b):
        return jnp.dot(h.astype(matmul_dtype), w.astype(matmul_dtype),
                       preferred_element_type=jnp.float32) + b

    h = jax.nn.relu(dense(x, w1e1, b1e1))
    h = jax.nn.relu(dense(h, w1e2, b1e2))
    ml = dense(h, w1e3, b1e3)
    mu1, lv1 = ml[:, :L], ml[:, L:]
    z = mu1 + eps * jnp.exp(0.5 * lv1)
    h = jax.nn.relu(dense(z, w1d1, b1d1))
    h = jax.nn.relu(dense(h, w1d2, b1d2))
    precursor = jax.nn.sigmoid(dense(h, w1d3, b1d3))

    c_in = dense(x, w2p, b2p) - mu1
    h = jax.nn.relu(dense(c_in, w2e1, b2e1))
    h = jax.nn.relu(dense(h, w2e2, b2e2))
    mu2 = dense(h, w2e3, b2e3)[:, :L]

    s_in = dense(x, w3p, b3p) - mu2
    h = jax.nn.relu(dense(s_in, w3e1, b3e1))
    h = jax.nn.relu(dense(h, w3e2, b3e2))
    ml3 = dense(h, w3e3, b3e3)
    return precursor, ml3[:, :L], ml3[:, L:]


if __name__ == "__main__":
    B, INPUT_DIM, LATENT_DIM = 16, 32, 16

    key = jax.random.PRNGKey(0)
    kx, keps, kparams = jax.random.split(key, 3)
    x = jax.random.normal(kx, (B, INPUT_DIM), jnp.float32)
    # eps plays the role of torch.randn_like(std) in layer1's reparameterize (the
    # layer2/layer3 reparam noise never reaches the returned tensors).
    eps = jax.random.normal(keps, (B, LATENT_DIM), jnp.float32)
    raw = make_params(INPUT_DIM, LATENT_DIM, kparams)

    # 1) f32-matmul path: the module's f32 semantics.
    packed_f32, off = pack_params(raw, INPUT_DIM, LATENT_DIM, matmul_dtype=jnp.float32)
    rec, mu, lv = temporal_aggregation(x, eps, packed_f32, off, INPUT_DIM, LATENT_DIM)
    jax.block_until_ready((rec, mu, lv))
    r_rec, r_mu, r_lv = reference(x, eps, raw, LATENT_DIM, jnp.float32)
    assert jnp.allclose(rec, r_rec, rtol=1e-3, atol=1e-3)
    assert jnp.allclose(mu, r_mu, rtol=1e-3, atol=1e-3)
    assert jnp.allclose(lv, r_lv, rtol=1e-3, atol=1e-3)

    # 2) bf16-MXU / f32-accumulate path (halved weight DMA), checked against a reference
    #    that applies the identical bf16 rounding.
    packed_bf16, off16 = pack_params(raw, INPUT_DIM, LATENT_DIM, matmul_dtype=jnp.bfloat16)
    rec16, mu16, lv16 = temporal_aggregation(x, eps, packed_bf16, off16, INPUT_DIM, LATENT_DIM)
    jax.block_until_ready((rec16, mu16, lv16))
    r_rec16, r_mu16, r_lv16 = reference(x, eps, raw, LATENT_DIM, jnp.bfloat16)
    assert jnp.allclose(rec16, r_rec16, rtol=5e-3, atol=5e-3)
    assert jnp.allclose(mu16, r_mu16, rtol=5e-3, atol=5e-3)
    assert jnp.allclose(lv16, r_lv16, rtol=5e-3, atol=5e-3)

    # 3) multi-tile path: B=384 pads to 512 -> two 256-row tiles, "parallel" grid axis,
    #    single-buffered resident weights (exercises batch padding + megacore path).
    B2 = 384
    kx2, keps2 = jax.random.split(jax.random.PRNGKey(1))
    x2 = jax.random.normal(kx2, (B2, INPUT_DIM), jnp.float32)
    eps2 = jax.random.normal(keps2, (B2, LATENT_DIM), jnp.float32)
    rec2, mu2, lv2 = temporal_aggregation(x2, eps2, packed_bf16, off16, INPUT_DIM, LATENT_DIM)
    jax.block_until_ready((rec2, mu2, lv2))
    r2_rec, r2_mu, r2_lv = reference(x2, eps2, raw, LATENT_DIM, jnp.bfloat16)
    assert rec2.shape == (B2, INPUT_DIM) and mu2.shape == (B2, LATENT_DIM)
    assert jnp.allclose(rec2, r2_rec, rtol=5e-3, atol=5e-3)
    assert jnp.allclose(mu2, r2_mu, rtol=5e-3, atol=5e-3)
    assert jnp.allclose(lv2, r2_lv, rtol=5e-3, atol=5e-3)

    print("KERNEL_OK")
</pallas_src>

<mosaic_0001>
module attributes {stable_mosaic.version = 11 : i64} {
  func.func @temporal_agg_kernel(%arg0: i32, %arg1: memref<16x32xf32, #tpu.memory_space<vmem>>, %arg2: memref<16x128xf32, #tpu.memory_space<vmem>>, %arg3: memref<32x768xf32, #tpu.memory_space<vmem>>, %arg4: memref<512x896xf32, #tpu.memory_space<vmem>>, %arg5: memref<256x1152xf32, #tpu.memory_space<vmem>>, %arg6: memref<128x1280xf32, #tpu.memory_space<vmem>>, %arg7: memref<1x4096xf32, #tpu.memory_space<vmem>>, %arg8: memref<16x128xf32, #tpu.memory_space<vmem>>, %arg9: memref<16x256xf32, #tpu.memory_space<vmem>>) attributes {dimension_semantics = [#tpu.dimension_semantics<arbitrary>], iteration_bounds = array<i64: 1>, scalar_prefetch = 0 : i64, scratch_operands = 0 : i64, tpu.core_type = #tpu.core_type<tc>, window_params = [{transform_indices = @transform_0, window_bounds = array<i64: 16, 32>}, {transform_indices = @transform_1, window_bounds = array<i64: 16, 128>}, {pipeline_mode = #tpu.pipeline_mode<synchronous>, transform_indices = @transform_2, window_bounds = array<i64: 32, 768>}, {pipeline_mode = #tpu.pipeline_mode<synchronous>, transform_indices = @transform_3, window_bounds = array<i64: 512, 896>}, {pipeline_mode = #tpu.pipeline_mode<synchronous>, transform_indices = @transform_4, window_bounds = array<i64: 256, 1152>}, {pipeline_mode = #tpu.pipeline_mode<synchronous>, transform_indices = @transform_5, window_bounds = array<i64: 128, 1280>}, {pipeline_mode = #tpu.pipeline_mode<synchronous>, transform_indices = @transform_6, window_bounds = array<i64: 1, 4096>}, {transform_indices = @transform_7, window_bounds = array<i64: 16, 128>}, {transform_indices = @transform_8, window_bounds = array<i64: 16, 256>}]} {
    %c0 = arith.constant 0 : index
    %c0_0 = arith.constant 0 : index
    %0 = vector.load %arg1[%c0, %c0_0] : memref<16x32xf32, #tpu.memory_space<vmem>>, vector<16x32xf32>
    %c0_1 = arith.constant 0 : index
    %c0_2 = arith.constant 0 : index
    %1 = vector.load %arg2[%c0_1, %c0_2] : memref<16x128xf32, #tpu.memory_space<vmem>>, vector<16x128xf32>
    %c0_3 = arith.constant 0 : index
    %c0_4 = arith.constant 0 : index
    %2 = vector.load %arg3[%c0_3, %c0_4] : memref<32x768xf32, #tpu.memory_space<vmem>>, vector<32x768xf32>
    %cst = arith.constant dense<0.000000e+00> : vector<16x768xf32>
    %3 = tpu.matmul %0, %2, %cst {dimension_numbers = #tpu.dot_dimension_numbers<[1], [0], [0], [1], [0, 0, 1, 1], [], []>} : vector<16x32xf32>, vector<32x768xf32>, vector<16x768xf32> -> vector<16x768xf32>
    %c0_5 = arith.constant 0 : index
    %c0_6 = arith.constant 0 : index
    %4 = vector.load %arg7[%c0_5, %c0_6] : memref<1x4096xf32, #tpu.memory_space<vmem>>, vector<1x768xf32>
    %5 = vector.broadcast %4 : vector<1x768xf32> to vector<16x768xf32>
    %6 = arith.addf %3, %5 : vector<16x768xf32>
    %7 = vector.extract_strided_slice %6 {offsets = [0, 0], sizes = [16, 512], strides = [1, 1]} : vector<16x768xf32> to vector<16x512xf32>
    %cst_7 = arith.constant 0.000000e+00 : f32
    %8 = vector.broadcast %cst_7 : f32 to vector<16x512xf32>
    %9 = arith.maximumf %7, %8 : vector<16x512xf32>
    %10 = vector.extract_strided_slice %6 {offsets = [0, 512], sizes = [16, 128], strides = [1, 1]} : vector<16x768xf32> to vector<16x128xf32>
    %11 = vector.extract_strided_slice %6 {offsets = [0, 640], sizes = [16, 128], strides = [1, 1]} : vector<16x768xf32> to vector<16x128xf32>
    %c0_8 = arith.constant 0 : index
    %c0_9 = arith.constant 0 : index
    %12 = vector.load %arg4[%c0_8, %c0_9] : memref<512x896xf32, #tpu.memory_space<vmem>>, vector<512x256xf32>
    %cst_10 = arith.constant dense<0.000000e+00> : vector<16x256xf32>
    %13 = tpu.matmul %9, %12, %cst_10 {dimension_numbers = #tpu.dot_dimension_numbers<[1], [0], [0], [1], [0, 0, 1, 1], [], []>} : vector<16x512xf32>, vector<512x256xf32>, vector<16x256xf32> -> vector<16x256xf32>
    %c0_11 = arith.constant 0 : index
    %c768 = arith.constant 768 : index
    %14 = vector.load %arg7[%c0_11, %c768] : memref<1x4096xf32, #tpu.memory_space<vmem>>, vector<1x256xf32>
    %15 = vector.broadcast %14 : vector<1x256xf32> to vector<16x256xf32>
    %16 = arith.addf %13, %15 : vector<16x256xf32>
    %cst_12 = arith.constant 0.000000e+00 : f32
    %17 = vector.broadcast %cst_12 : f32 to vector<16x256xf32>
    %18 = arith.maximumf %16, %17 : vector<16x256xf32>
    %c0_13 = arith.constant 0 : index
    %c0_14 = arith.constant 0 : index
    %19 = vector.load %arg5[%c0_13, %c0_14] : memref<256x1152xf32, #tpu.memory_space<vmem>>, vector<256x256xf32>
    %cst_15 = arith.constant dense<0.000000e+00> : vector<16x256xf32>
    %20 = tpu.matmul %18, %19, %cst_15 {dimension_numbers = #tpu.dot_dimension_numbers<[1], [0], [0], [1], [0, 0, 1, 1], [], []>} : vector<16x256xf32>, vector<256x256xf32>, vector<16x256xf32> -> vector<16x256xf32>
    %c0_16 = arith.constant 0 : index
    %c1664 = arith.constant 1664 : index
    %21 = vector.load %arg7[%c0_16, %c1664] : memref<1x4096xf32, #tpu.memory_space<vmem>>, vector<1x256xf32>
    %22 = vector.broadcast %21 : vector<1x256xf32> to vector<16x256xf32>
    %23 = arith.addf %20, %22 : vector<16x256xf32>
    %24 = vector.extract_strided_slice %23 {offsets = [0, 0], sizes = [16, 128], strides = [1, 1]} : vector<16x256xf32> to vector<16x128xf32>
    %25 = vector.extract_strided_slice %23 {offsets = [0, 128], sizes = [16, 128], strides = [1, 1]} : vector<16x256xf32> to vector<16x128xf32>
    %cst_17 = arith.constant 5.000000e-01 : f32
    %26 = vector.broadcast %cst_17 : f32 to vector<16x128xf32>
    %27 = arith.mulf %26, %25 : vector<16x128xf32>
    %28 = math.exp %27 : vector<16x128xf32>
    %29 = arith.mulf %1, %28 : vector<16x128xf32>
    %30 = arith.addf %24, %29 : vector<16x128xf32>
    %c0_18 = arith.constant 0 : index
    %c0_19 = arith.constant 0 : index
    %31 = vector.load %arg6[%c0_18, %c0_19] : memref<128x1280xf32, #tpu.memory_space<vmem>>, vector<128x256xf32>
    %cst_20 = arith.constant dense<0.000000e+00> : vector<16x256xf32>
    %32 = tpu.matmul %30, %31, %cst_20 {dimension_numbers = #tpu.dot_dimension_numbers<[1], [0], [0], [1], [0, 0, 1, 1], [], []>} : vector<16x128xf32>, vector<128x256xf32>, vector<16x256xf32> -> vector<16x256xf32>
    %c0_21 = arith.constant 0 : index
    %c2816 = arith.constant 2816 : index
    %33 = vector.load %arg7[%c0_21, %c2816] : memref<1x4096xf32, #tpu.memory_space<vmem>>, vector<1x256xf32>
    %34 = vector.broadcast %33 : vector<1x256xf32> to vector<16x256xf32>
    %35 = arith.addf %32, %34 : vector<16x256xf32>
    %cst_22 = arith.constant 0.000000e+00 : f32
    %36 = vector.broadcast %cst_22 : f32 to vector<16x256xf32>
    %37 = arith.maximumf %35, %36 : vector<16x256xf32>
    %c0_23 = arith.constant 0 : index
    %c640 = arith.constant 640 : index
    %38 = vector.load %arg5[%c0_23, %c640] : memref<256x1152xf32, #tpu.memory_space<vmem>>, vector<256x512xf32>
    %cst_24 = arith.constant dense<0.000000e+00> : vector<16x512xf32>
    %39 = tpu.matmul %37, %38, %cst_24 {dimension_numbers = #tpu.dot_dimension_numbers<[1], [0], [0], [1], [0, 0, 1, 1], [], []>} : vector<16x256xf32>, vector<256x512xf32>, vector<16x512xf32> -> vector<16x512xf32>
    %c0_25 = arith.constant 0 : index
    %c2304 = arith.constant 2304 : index
    %40 = vector.load %arg7[%c0_25, %c2304] : memref<1x4096xf32, #tpu.memory_space<vmem>>, vector<1x512xf32>
    %41 = vector.broadcast %40 : vector<1x512xf32> to vector<16x512xf32>
    %42 = arith.addf %39, %41 : vector<16x512xf32>
    %cst_26 = arith.constant 0.000000e+00 : f32
    %43 = vector.broadcast %cst_26 : f32 to vector<16x512xf32>
    %44 = arith.maximumf %42, %43 : vector<16x512xf32>
    %c0_27 = arith.constant 0 : index
    %c768_28 = arith.constant 768 : index
    %45 = vector.load %arg4[%c0_27, %c768_28] : memref<512x896xf32, #tpu.memory_space<vmem>>, vector<512x128xf32>
    %cst_29 = arith.constant dense<0.000000e+00> : vector<16x128xf32>
    %46 = tpu.matmul %44, %45, %cst_29 {dimension_numbers = #tpu.dot_dimension_numbers<[1], [0], [0], [1], [0, 0, 1, 1], [], []>} : vector<16x512xf32>, vector<512x128xf32>, vector<16x128xf32> -> vector<16x128xf32>
    %c0_30 = arith.constant 0 : index
    %c1536 = arith.constant 1536 : index
    %47 = vector.load %arg7[%c0_30, %c1536] : memref<1x4096xf32, #tpu.memory_space<vmem>>, vector<1x128xf32>
    %48 = vector.broadcast %47 : vector<1x128xf32> to vector<16x128xf32>
    %49 = arith.addf %46, %48 : vector<16x128xf32>
    %50 = arith.negf %49 : vector<16x128xf32>
    %51 = math.exp %50 : vector<16x128xf32>
    %cst_31 = arith.constant 1.000000e+00 : f32
    %52 = vector.broadcast %cst_31 : f32 to vector<16x128xf32>
    %53 = arith.addf %52, %51 : vector<16x128xf32>
    %54 = arith.divf %52, %53 : vector<16x128xf32>
    %c0_32 = arith.constant 0 : index
    %c0_33 = arith.constant 0 : index
    %55 = vector.load %arg8[%c0_32, %c0_33] : memref<16x128xf32, #tpu.memory_space<vmem>>, vector<16x128xf32>
    tpu.vector_store %arg8[%c0_32, %c0_33], %54 {strides = array<i32>} : memref<16x128xf32, #tpu.memory_space<vmem>>, vector<16x128xf32>,
    %56 = arith.subf %10, %24 : vector<16x128xf32>
    %c0_34 = arith.constant 0 : index
    %c256 = arith.constant 256 : index
    %57 = vector.load %arg6[%c0_34, %c256] : memref<128x1280xf32, #tpu.memory_space<vmem>>, vector<128x512xf32>
    %cst_35 = arith.constant dense<0.000000e+00> : vector<16x512xf32>
    %58 = tpu.matmul %56, %57, %cst_35 {dimension_numbers = #tpu.dot_dimension_numbers<[1], [0], [0], [1], [0, 0, 1, 1], [], []>} : vector<16x128xf32>, vector<128x512xf32>, vector<16x512xf32> -> vector<16x512xf32>
    %c0_36 = arith.constant 0 : index
    %c3072 = arith.constant 3072 : index
    %59 = vector.load %arg7[%c0_36, %c3072] : memref<1x4096xf32, #tpu.memory_space<vmem>>, vector<1x512xf32>
    %60 = vector.broadcast %59 : vector<1x512xf32> to vector<16x512xf32>
    %61 = arith.addf %58, %60 : vector<16x512xf32>
    %cst_37 = arith.constant 0.000000e+00 : f32
    %62 = vector.broadcast %cst_37 : f32 to vector<16x512xf32>
    %63 = arith.maximumf %61, %62 : vector<16x512xf32>
    %c0_38 = arith.constant 0 : index
    %c256_39 = arith.constant 256 : index
    %64 = vector.load %arg4[%c0_38, %c256_39] : memref<512x896xf32, #tpu.memory_space<vmem>>, vector<512x256xf32>
    %cst_40 = arith.constant dense<0.000000e+00> : vector<16x256xf32>
    %65 = tpu.matmul %63, %64, %cst_40 {dimension_numbers = #tpu.dot_dimension_numbers<[1], [0], [0], [1], [0, 0, 1, 1], [], []>} : vector<16x512xf32>, vector<512x256xf32>, vector<16x256xf32> -> vector<16x256xf32>
    %c0_41 = arith.constant 0 : index
    %c1024 = arith.constant 1024 : index
    %66 = vector.load %arg7[%c0_41, %c1024] : memref<1x4096xf32, #tpu.memory_space<vmem>>, vector<1x256xf32>
    %67 = vector.broadcast %66 : vector<1x256xf32> to vector<16x256xf32>
    %68 = arith.addf %65, %67 : vector<16x256xf32>
    %cst_42 = arith.constant 0.000000e+00 : f32
    %69 = vector.broadcast %cst_42 : f32 to vector<16x256xf32>
    %70 = arith.maximumf %68, %69 : vector<16x256xf32>
    %c0_43 = arith.constant 0 : index
    %c256_44 = arith.constant 256 : index
    %71 = vector.load %arg5[%c0_43, %c256_44] : memref<256x1152xf32, #tpu.memory_space<vmem>>, vector<256x128xf32>
    %cst_45 = arith.constant dense<0.000000e+00> : vector<16x128xf32>
    %72 = tpu.matmul %70, %71, %cst_45 {dimension_numbers = #tpu.dot_dimension_numbers<[1], [0], [0], [1], [0, 0, 1, 1], [], []>} : vector<16x256xf32>, vector<256x128xf32>, vector<16x128xf32> -> vector<16x128xf32>
    %c0_46 = arith.constant 0 : index
    %c1920 = arith.constant 1920 : index
    %73 = vector.load %arg7[%c0_46, %c1920] : memref<1x4096xf32, #tpu.memory_space<vmem>>, vector<1x128xf32>
    %74 = vector.broadcast %73 : vector<1x128xf32> to vector<16x128xf32>
    %75 = arith.addf %72, %74 : vector<16x128xf32>
    %76 = arith.subf %11, %75 : vector<16x128xf32>
    %c0_47 = arith.constant 0 : index
    %c768_48 = arith.constant 768 : index
    %77 = vector.load %arg6[%c0_47, %c768_48] : memref<128x1280xf32, #tpu.memory_space<vmem>>, vector<128x512xf32>
    %cst_49 = arith.constant dense<0.000000e+00> : vector<16x512xf32>
    %78 = tpu.matmul %76, %77, %cst_49 {dimension_numbers = #tpu.dot_dimension_numbers<[1], [0], [0], [1], [0, 0, 1, 1], [], []>} : vector<16x128xf32>, vector<128x512xf32>, vector<16x512xf32> -> vector<16x512xf32>
    %c0_50 = arith.constant 0 : index
    %c3584 = arith.constant 3584 : index
    %79 = vector.load %arg7[%c0_50, %c3584] : memref<1x4096xf32, #tpu.memory_space<vmem>>, vector<1x512xf32>
    %80 = vector.broadcast %79 : vector<1x512xf32> to vector<16x512xf32>
    %81 = arith.addf %78, %80 : vector<16x512xf32>
    %cst_51 = arith.constant 0.000000e+00 : f32
    %82 = vector.broadcast %cst_51 : f32 to vector<16x512xf32>
    %83 = arith.maximumf %81, %82 : vector<16x512xf32>
    %c0_52 = arith.constant 0 : index
    %c512 = arith.constant 512 : index
    %84 = vector.load %arg4[%c0_52, %c512] : memref<512x896xf32, #tpu.memory_space<vmem>>, vector<512x256xf32>
    %cst_53 = arith.constant dense<0.000000e+00> : vector<16x256xf32>
    %85 = tpu.matmul %83, %84, %cst_53 {dimension_numbers = #tpu.dot_dimension_numbers<[1], [0], [0], [1], [0, 0, 1, 1], [], []>} : vector<16x512xf32>, vector<512x256xf32>, vector<16x256xf32> -> vector<16x256xf32>
    %c0_54 = arith.constant 0 : index
    %c1280 = arith.constant 1280 : index
    %86 = vector.load %arg7[%c0_54, %c1280] : memref<1x4096xf32, #tpu.memory_space<vmem>>, vector<1x256xf32>
    %87 = vector.broadcast %86 : vector<1x256xf32> to vector<16x256xf32>
    %88 = arith.addf %85, %87 : vector<16x256xf32>
    %cst_55 = arith.constant 0.000000e+00 : f32
    %89 = vector.broadcast %cst_55 : f32 to vector<16x256xf32>
    %90 = arith.maximumf %88, %89 : vector<16x256xf32>
    %c0_56 = arith.constant 0 : index
    %c384 = arith.constant 384 : index
    %91 = vector.load %arg5[%c0_56, %c384] : memref<256x1152xf32, #tpu.memory_space<vmem>>, vector<256x256xf32>
    %cst_57 = arith.constant dense<0.000000e+00> : vector<16x256xf32>
    %92 = tpu.matmul %90, %91, %cst_57 {dimension_numbers = #tpu.dot_dimension_numbers<[1], [0], [0], [1], [0, 0, 1, 1], [], []>} : vector<16x256xf32>, vector<256x256xf32>, vector<16x256xf32> -> vector<16x256xf32>
    %c0_58 = arith.constant 0 : index
    %c2048 = arith.constant 2048 : index
    %93 = vector.load %arg7[%c0_58, %c2048] : memref<1x4096xf32, #tpu.memory_space<vmem>>, vector<1x256xf32>
    %94 = vector.broadcast %93 : vector<1x256xf32> to vector<16x256xf32>
    %95 = arith.addf %92, %94 : vector<16x256xf32>
    %c0_59 = arith.constant 0 : index
    %c0_60 = arith.constant 0 : index
    %96 = vector.load %arg9[%c0_59, %c0_60] : memref<16x256xf32, #tpu.memory_space<vmem>>, vector<16x256xf32>
    tpu.vector_store %arg9[%c0_59, %c0_60], %95 {strides = array<i32>} : memref<16x256xf32, #tpu.memory_space<vmem>>, vector<16x256xf32>,
    return
  }
  func.func @transform_0(%arg0: i32) -> (i32, i32) {
    %c0_i32 = arith.constant 0 : i32
    %c0_i32_0 = arith.constant 0 : i32
    return %arg0, %c0_i32 : i32, i32
  }
  func.func @transform_1(%arg0: i32) -> (i32, i32) {
    %c0_i32 = arith.constant 0 : i32
    %c0_i32_0 = arith.constant 0 : i32
    return %arg0, %c0_i32 : i32, i32
  }
  func.func @transform_2(%arg0: i32) -> (i32, i32) {
    %c0_i32 = arith.constant 0 : i32
    %c0_i32_0 = arith.constant 0 : i32
    %c0_i32_1 = arith.constant 0 : i32
    return %c0_i32, %c0_i32_0 : i32, i32
  }
  func.func @transform_3(%arg0: i32) -> (i32, i32) {
    %c0_i32 = arith.constant 0 : i32
    %c0_i32_0 = arith.constant 0 : i32
    %c0_i32_1 = arith.constant 0 : i32
    return %c0_i32, %c0_i32_0 : i32, i32
  }
  func.func @transform_4(%arg0: i32) -> (i32, i32) {
    %c0_i32 = arith.constant 0 : i32
    %c0_i32_0 = arith.constant 0 : i32
    %c0_i32_1 = arith.constant 0 : i32
    return %c0_i32, %c0_i32_0 : i32, i32
  }
  func.func @transform_5(%arg0: i32) -> (i32, i32) {
    %c0_i32 = arith.constant 0 : i32
    %c0_i32_0 = arith.constant 0 : i32
    %c0_i32_1 = arith.constant 0 : i32
    return %c0_i32, %c0_i32_0 : i32, i32
  }
  func.func @transform_6(%arg0: i32) -> (i32, i32) {
    %c0_i32 = arith.constant 0 : i32
    %c0_i32_0 = arith.constant 0 : i32
    %c0_i32_1 = arith.constant 0 : i32
    return %c0_i32, %c0_i32_0 : i32, i32
  }
  func.func @transform_7(%arg0: i32) -> (i32, i32) {
    %c0_i32 = arith.constant 0 : i32
    %c0_i32_0 = arith.constant 0 : i32
    return %arg0, %c0_i32 : i32, i32
  }
  func.func @transform_8(%arg0: i32) -> (i32, i32) {
    %c0_i32 = arith.constant 0 : i32
    %c0_i32_0 = arith.constant 0 : i32
    return %arg0, %c0_i32 : i32, i32
  }
}

</mosaic_0001>

<bundles_post_ra>
// kernel: tpu_custom_call.1
= control target key start
LH: loop header
LB: loop body
LE: loop exit
PB: predicated region body
PF: predicated region fallthrough
CT: control target
= control target key end

     0   :  { %14 = vsyncpa [#allocation3], 0  ;;  %s4650_s0 = inlined_call_operand.hbm [shape: f32[16,32], index: 0, kind: input, shape index: {}]   ;;  %s4651_s1 = inlined_call_operand.hbm [shape: f32[16,128], index: 1, kind: input, shape index: {}]   ;;  %s4652_s2 = inlined_call_operand.hbm [shape: f32[32,768], index: 2, kind: input, shape index: {}]   ;;  %s4653_s3 = inlined_call_operand.hbm [shape: f32[512,896], index: 3, kind: input, shape index: {}]   ;;  %s4654_s4 = inlined_call_operand.hbm [shape: f32[256,1152], index: 4, kind: input, shape index: {}]   ;;  %s4655_s5 = inlined_call_operand.hbm [shape: f32[128,1280], index: 5, kind: input, shape index: {}]   ;;  %s4656_s6 = inlined_call_operand.hbm [shape: f32[1,4096], index: 6, kind: input, shape index: {}]   ;;  %s4657_s7 = inlined_call_operand.hbm [shape: f32[16,128], index: 7, kind: output, shape index: {0}]   ;;  %s4658_s8 = inlined_call_operand.hbm [shape: f32[16,256], index: 8, kind: output, shape index: {1}]  }
   0x1   :  { %15 = vsyncpa [#allocation6], 0 }
   0x2   :  { %16 = vsyncpa [#allocation9], 0 }
   0x3   :  { %17 = vsyncpa [#allocation12], 0 }
   0x4   :  { %18 = vsyncpa [#allocation4], 0 }
   0x5   :  { %19 = vsyncpa [#allocation16], 0  ;;  %s4278_s27 = smov [#allocation5]   ;;  %s4279_s29 = smov [#allocation8]  }
   0x6   :  { %s37_s28 = sshll.u32 %s4278_s27, 4  ;;  %s61_s30 = sshll.u32 %s4279_s29, 4  ;;  %s38_s28 = int_to_ptr.vmem [resolvable:$true] %s37_s28  ;;  %s4345_s30 = int_to_ptr.vmem [resolvable:$true] %s61_s30 }
   0x7   :  { %s4068_s11 = scalar_lea.hbm %s4651_s1, 256 }
   0x8   :  { %p4069_p0 = scmp.ne.s32.totalorder %s4651_s1, %s4068_s11  ;;  %p4072_p1 = scmp.lt.u32.totalorder %s4068_s11, %s4651_s1 }
   0xa   :  { %p4074_p2 = pnand %p4072_p1, %p4069_p0 }
   0xc   :  { %4077 = shalt.err (!%p4074_p2)
}
   0xd   :  { %s4078_s16 = scalar_lea.vmem %s38_s28, 256  ;;  %p4083_p4 = scmp.lt.s32.totalorder %s38_s28, %s38_s28 }
   0xe   :  { %p4079_p3 = scmp.ne.s32.totalorder %s38_s28, %s4078_s16  ;;  %p4084_p5 = scmp.lt.s32.totalorder %s4078_s16, %s4078_s16 }
  0x10   :  { %p4085_p6 = por %p4084_p5, %p4083_p4 }
  0x12   :  { %p4086_p7 = pnand %p4085_p6, %p4079_p3 }
  0x14   :  { %4089 = shalt.err (!%p4086_p7)
}
  0x15   :  { %s4280_s17 = smov 128   ;;  %s4281_s18 = smov 8  }
  0x16   :  { %43 = dma.hbm_to_vmem [thread:$0]  %s4651_s1, 256, %s38_s28, [#allocation6], %s4280_s17, %s4280_s17, %s4281_s18  }
  0x17   :  { %s4090_s23 = scalar_lea.hbm %s4653_s3, 57344 }
  0x18   :  { %p4091_p8 = scmp.ne.s32.totalorder %s4653_s3, %s4090_s23  ;;  %p4094_p9 = scmp.lt.u32.totalorder %s4090_s23, %s4653_s3 }
  0x1a   :  { %p4096_p10 = pnand %p4094_p9, %p4091_p8 }
  0x1c   :  { %4099 = shalt.err (!%p4096_p10)
}
  0x1d   :  { %s4100_s29 = scalar_lea.vmem %s4345_s30, 57344  ;;  %p4105_p12 = scmp.lt.s32.totalorder %s4345_s30, %s4345_s30 }
  0x1e   :  { %p4101_p11 = scmp.ne.s32.totalorder %s4345_s30, %s4100_s29  ;;  %p4106_p13 = scmp.lt.s32.totalorder %s4100_s29, %s4100_s29 }
  0x20   :  { %p4107_p0 = por %p4106_p13, %p4105_p12 }
  0x22   :  { %p4108_p1 = pnand %p4107_p0, %p4101_p11 }
  0x24   :  { %4111 = shalt.err (!%p4108_p1)
}
  0x25   :  { %s4282_s1 = smov 896   ;;  %s4283_s28 = smov 56  }
  0x26   :  { %67 = dma.hbm_to_vmem [thread:$0]  %s4653_s3, 57344, %s4345_s30, [#allocation9], %s4282_s1, %s4282_s1, %s4283_s28  }
  0x27   :  { %s4284_s11 = smov [#allocation11]   ;;  %s4112_s15 = scalar_lea.hbm %s4655_s5, 20480 }
  0x28   :  { %s85_s12 = sshll.u32 %s4284_s11, 4  ;;  %p4113_p2 = scmp.ne.s32.totalorder %s4655_s5, %s4112_s15  ;;  %s86_s12 = int_to_ptr.vmem [resolvable:$true] %s85_s12 }
  0x29   :  { %p4116_p3 = scmp.lt.u32.totalorder %s4112_s15, %s4655_s5 }
  0x2b   :  { %p4118_p4 = pnand %p4116_p3, %p4113_p2 }
  0x2d   :  { %4121 = shalt.err (!%p4118_p4)
}
  0x2e   :  { %s4122_s22 = scalar_lea.vmem %s86_s12, 20480  ;;  %p4127_p6 = scmp.lt.s32.totalorder %s86_s12, %s86_s12 }
  0x2f   :  { %p4123_p5 = scmp.ne.s32.totalorder %s86_s12, %s4122_s22  ;;  %p4128_p7 = scmp.lt.s32.totalorder %s4122_s22, %s4122_s22 }
  0x31   :  { %p4129_p8 = por %p4128_p7, %p4127_p6 }
  0x33   :  { %p4130_p9 = pnand %p4129_p8, %p4123_p5 }
  0x35   :  { %4133 = shalt.err (!%p4130_p9)
}
  0x36   :  { %s4285_s3 = smov 1280   ;;  %s4286_s30 = smov 80  }
  0x37   :  { %91 = dma.hbm_to_vmem [thread:$0]  %s4655_s5, 20480, %s86_s12, [#allocation12], %s4285_s3, %s4285_s3, %s4286_s30  }
  0x38   :  { %s4287_s25 = smov [#allocation2]   ;;  %s4288_s27 = smov [#allocation7]  }
  0x39   :  { %s25_s26 = sshll.u32 %s4287_s25, 4  ;;  %s49_s29 = sshll.u32 %s4288_s27, 4  ;;  %s26_s26 = int_to_ptr.vmem [resolvable:$true] %s25_s26  ;;  %s50_s29 = int_to_ptr.vmem [resolvable:$true] %s49_s29 }
  0x3a   :  { %s4134_s9 = scalar_lea.hbm %s4650_s0, 256 }
  0x3b   :  { %p4135_p10 = scmp.ne.s32.totalorder %s4650_s0, %s4134_s9  ;;  %p4138_p11 = scmp.lt.u32.totalorder %s4134_s9, %s4650_s0 }
  0x3d   :  { %p4140_p12 = pnand %p4138_p11, %p4135_p10 }
  0x3f   :  { %4143 = shalt.err (!%p4140_p12)
}
  0x40   :  { %s4144_s5 = scalar_lea.vmem %s26_s26, 256  ;;  %p4149_p0 = scmp.lt.s32.totalorder %s26_s26, %s26_s26 }
  0x41   :  { %p4145_p13 = scmp.ne.s32.totalorder %s26_s26, %s4144_s5  ;;  %p4150_p1 = scmp.lt.s32.totalorder %s4144_s5, %s4144_s5 }
  0x43   :  { %p4151_p2 = por %p4150_p1, %p4149_p0 }
  0x45   :  { %p4152_p3 = pnand %p4151_p2, %p4145_p13 }
  0x47   :  { %4155 = shalt.err (!%p4152_p3)
}
  0x48   :  { %31 = dma.hbm_to_vmem [thread:$0]  %s4650_s0, 256, %s26_s26, [#allocation3], %s4280_s17, %s4280_s17, %s4281_s18  }
  0x49   :  { %s4156_s20 = scalar_lea.hbm %s4652_s2, 3072 }
  0x4a   :  { %p4157_p4 = scmp.ne.s32.totalorder %s4652_s2, %s4156_s20  ;;  %p4160_p5 = scmp.lt.u32.totalorder %s4156_s20, %s4652_s2 }
  0x4c   :  { %p4162_p6 = pnand %p4160_p5, %p4157_p4 }
  0x4e   :  { %4165 = shalt.err (!%p4162_p6)
}
  0x4f   :  { %s4166_s23 = scalar_lea.vmem %s50_s29, 3072  ;;  %p4171_p8 = scmp.lt.s32.totalorder %s50_s29, %s50_s29 }
  0x50   :  { %p4167_p7 = scmp.ne.s32.totalorder %s50_s29, %s4166_s23  ;;  %p4172_p9 = scmp.lt.s32.totalorder %s4166_s23, %s4166_s23 }
  0x52   :  { %p4173_p10 = por %p4172_p9, %p4171_p8 }
  0x54   :  { %p4174_p11 = pnand %p4173_p10, %p4167_p7 }
  0x56   :  { %4177 = shalt.err (!%p4174_p11)
}
  0x57   :  { %s4289_s0 = smov 768   ;;  %s4290_s24 = smov 48  }
  0x58   :  { %55 = dma.hbm_to_vmem [thread:$0]  %s4652_s2, 3072, %s50_s29, [#allocation6], %s4289_s0, %s4289_s0, %s4290_s24  }
  0x59   :  { %s4291_s27 = smov [#allocation10]   ;;  %s4178_s10 = scalar_lea.hbm %s4654_s4, 36864 }
  0x5a   :  { %s73_s1 = sshll.u32 %s4291_s27, 4  ;;  %p4179_p12 = scmp.ne.s32.totalorder %s4654_s4, %s4178_s10  ;;  %s74_s1 = int_to_ptr.vmem [resolvable:$true] %s73_s1 }
  0x5b   :  { %p4182_p13 = scmp.lt.u32.totalorder %s4178_s10, %s4654_s4 }
  0x5d   :  { %p4184_p0 = pnand %p4182_p13, %p4179_p12 }
  0x5f   :  { %4187 = shalt.err (!%p4184_p0)
}
  0x60   :  { %s4188_s12 = scalar_lea.vmem %s74_s1, 36864  ;;  %p4193_p2 = scmp.lt.s32.totalorder %s74_s1, %s74_s1 }
  0x61   :  { %p4189_p1 = scmp.ne.s32.totalorder %s74_s1, %s4188_s12  ;;  %p4194_p3 = scmp.lt.s32.totalorder %s4188_s12, %s4188_s12 }
  0x63   :  { %p4195_p4 = por %p4194_p3, %p4193_p2 }
  0x65   :  { %p4196_p5 = pnand %p4195_p4, %p4189_p1 }
  0x67   :  { %4199 = shalt.err (!%p4196_p5)
}
  0x68   :  { %s4292_s2 = smov 1152   ;;  %s4293_s29 = smov 72  }
  0x69   :  { %79 = dma.hbm_to_vmem [thread:$0]  %s4654_s4, 36864, %s74_s1, [#allocation9], %s4292_s2, %s4292_s2, %s4293_s29  }
  0x6a   :  { %s4294_s19 = smov [#allocation13]   ;;  %s4200_s3 = scalar_lea.hbm %s4656_s6, 512 }
  0x6b   :  { %s98_s20 = sshll.u32 %s4294_s19, 4  ;;  %p4201_p6 = scmp.ne.s32.totalorder %s4656_s6, %s4200_s3  ;;  %s99_s20 = int_to_ptr.vmem [resolvable:$true] %s98_s20 }
  0x6c   :  { %p4204_p7 = scmp.lt.u32.totalorder %s4200_s3, %s4656_s6 }
  0x6e   :  { %p4206_p8 = pnand %p4204_p7, %p4201_p6 }
  0x70   :  { %4209 = shalt.err (!%p4206_p8)
}
  0x71   :  { %s4210_s25 = scalar_lea.vmem %s99_s20, 512  ;;  %p4215_p10 = scmp.lt.s32.totalorder %s99_s20, %s99_s20 }
  0x72   :  { %p4211_p9 = scmp.ne.s32.totalorder %s99_s20, %s4210_s25  ;;  %p4216_p11 = scmp.lt.s32.totalorder %s4210_s25, %s4210_s25 }
  0x74   :  { %p4217_p12 = por %p4216_p11, %p4215_p10 }
  0x76   :  { %p4218_p13 = pnand %p4217_p12, %p4211_p9 }
  0x78   :  { %4221 = shalt.err (!%p4218_p13)
}
  0x79   :  { %101 = dma.hbm_to_vmem [thread:$0]  %s4656_s6, 512, %s99_s20, [#allocation12]  }
  0x7a   :  { %4266 = dma.done.wait [#allocation3], 256  }
  0x7b   :  { %4267 = vsyncadd [#allocation3], 4294967040 }
  0x7c   :  { %4268 = dma.done.wait [#allocation6], 3328  }
  0x7d   :  { %4269 = vsyncadd [#allocation6], 4294963968 }
  0x7e   :  { %4270 = dma.done.wait [#allocation9], 94208  }
  0x7f   :  { %4271 = vsyncadd [#allocation9], 4294873088 }
  0x80   :  { %4272 = dma.done.wait [#allocation12], 20992  }
  0x81   :  { %4273 = vsyncadd [#allocation12], 4294946304  ;;  %v4295_v0 = vmov 0.0   ;;  %v128_v1 = vld [vmem:[#allocation7 + $0x8] sm:$0xff]  ;;  %v134_v2 = vld [vmem:[#allocation7 + $0x38] sm:$0xff]  ;;  %vm183_vm0 = vcmask 261120  }
  0x82   :  { %254 = vmatprep.mubr.f32.mxu0 %v4295_v0  ;;  %331 = vmatprep.mubr.f32.mxu1 %v4295_v0  ;;  %v127_v3 = vld [vmem:[#allocation7] sm:$0xff]  ;;  %v3089_v4 = vpack.c.bf16 %v134_v2, %v128_v1  ;;  %v133_v5 = vld [vmem:[#allocation7 + $0x30] sm:$0xff]  ;;  %v140_v6 = vld [vmem:[#allocation7 + $0x68] sm:$0xff]  ;;  %s4296_s6 = smov [#allocation14]  }
  0x83   :  { %v146_v7 = vld [vmem:[#allocation7 + $0x98] sm:$0xff]  ;;  %v3091_v8 = vpack.c.bf16 %v133_v5, %v127_v3  ;;  %v139_v10 = vld [vmem:[#allocation7 + $0x60] sm:$0xff]  ;;  %v145_v11 = vld [vmem:[#allocation7 + $0x90] sm:$0xff]  ;;  %s2934_s27 = sshll.u32 %s4296_s6, 4  ;;  %s2935_s27 = int_to_ptr.vmem [resolvable:$true] %s2934_s27 }
  0x84   :  { %v3093_v9 = vpack.c.bf16 %v146_v7, %v140_v6  ;;  %3090 = vmatprep.subr.bf16.mxu0 %v3089_v4  ;;  %v130_v12 = vld [vmem:[#allocation7 + $0x18] sm:$0xff]  ;;  %v136_v13 = vld [vmem:[#allocation7 + $0x48] sm:$0xff]  ;;  %v129_v14 = vld [vmem:[#allocation7 + $0x10] sm:$0xff]  ;;  %v3095_v15 = vpack.c.bf16 %v145_v11, %v139_v10  ;;  %s4222_s1 = scalar_lea.vmem %s2935_s27, 256  ;;  %p4227_p1 = scmp.lt.s32.totalorder %s2935_s27, %s2935_s27 }
  0x85   :  { %3092 = vmatpush1.bf16.msra.mxu0 %v3091_v8  ;;  %v3097_v16 = vpack.c.bf16 %v136_v13, %v130_v12  ;;  %v135_v17 = vld [vmem:[#allocation7 + $0x40] sm:$0xff]  ;;  %v142_v18 = vld [vmem:[#allocation7 + $0x78] sm:$0xff]  ;;  %v148_v20 = vld [vmem:[#allocation7 + $0xa8] sm:$0xff]  ;;  %p4223_p0 = scmp.ne.s32.totalorder %s2935_s27, %s4222_s1  ;;  %p4228_p2 = scmp.lt.s32.totalorder %s4222_s1, %s4222_s1 }
  0x86   :  { %3094 = vmatprep.subr.bf16.mxu0 %v3093_v9  ;;  %v3099_v19 = vpack.c.bf16 %v135_v17, %v129_v14  ;;  %v141_v21 = vld [vmem:[#allocation7 + $0x70] sm:$0xff]  ;;  %v147_v22 = vld [vmem:[#allocation7 + $0xa0] sm:$0xff]  ;;  %v3101_v23 = vpack.c.bf16 %v148_v20, %v142_v18  ;;  %v430_v24 = vld [vmem:[#allocation8 + $0x8] sm:$0xff] }
  0x87   :  { %3098 = vmatprep.subr.bf16.mxu1 %v3097_v16  ;;  %v432_v25 = vld [vmem:[#allocation8 + $0x40] sm:$0xff]  ;;  %v3103_v26 = vpack.c.bf16 %v147_v22, %v141_v21  ;;  %v431_v30 = vld [vmem:[#allocation8 + $0x38] sm:$0xff]  ;;  %v436_v32 = vld [vmem:[#allocation8 + $0xb0] sm:$0xff]  ;;  %p4229_p3 = por %p4228_p2, %p4227_p1 }
  0x88   :  { %3100 = vmatpush1.bf16.msra.mxu1 %v3099_v19  ;;  %v4444_v27 = vld [vmem:[#allocation2] sm:$0xff]  ;;  %v3113_v28 = vpack.c.bf16 %v432_v25, %v430_v24  ;;  %v434_v31 = vld [vmem:[#allocation8 + $0x78] sm:$0xff]  ;;  %v4449_v33 = vld [vmem:[#allocation2 + $0x8] sm:$0xff] }
  0x89   :  { %3096 = vmatpush1.bf16.msra.mxu0 %v3095_v15  ;;  %3102 = vmatprep.subr.bf16.mxu1 %v3101_v23  ;;  %v429_v29 = vld [vmem:[#allocation8] sm:$0xff]  ;;  %v3117_v35 = vpack.c.bf16 %v436_v32, %v434_v31  ;;  %v433_v36 = vld [vmem:[#allocation8 + $0x70] sm:$0xff]  ;;  %v435_v37 = vld [vmem:[#allocation8 + $0xa8] sm:$0xff]  ;;  %p4230_p4 = pnand %p4229_p3, %p4223_p0 }
  0x8a   :  { %v3115_v34 = vpack.c.bf16 %v431_v30, %v429_v29  ;;  %v438_v38 = vld [vmem:[#allocation8 + $0xe8] sm:$0xff]  ;;  %v440_v39 = vld [vmem:[#allocation8 + $0x120] sm:$0xff]  ;;  %v3119_v40 = vpack.c.bf16 %v435_v37, %v433_v36  ;;  %v439_v43 = vld [vmem:[#allocation8 + $0x118] sm:$0xff] }
  0x8b   :  { %v3121_v41 = vpack.c.bf16 %v440_v39, %v438_v38  ;;  %v437_v42 = vld [vmem:[#allocation8 + $0xe0] sm:$0xff]  ;;  %v442_v44 = vld [vmem:[#allocation8 + $0x158] sm:$0xff]  ;;  %v444_v45 = vld [vmem:[#allocation8 + $0x190] sm:$0xff] }
  0x8c   :  { %2965 = vmatmul.mubr.msk.f32.vlgmr.msra.gmra.mrb[0].mxu0 %vm183_vm0, %v4444_v27  ;;  %3104 = vmatpush1.bf16.msra.mxu1 %v3103_v26  ;;  %v3123_v46 = vpack.c.bf16 %v439_v43, %v437_v42  ;;  %v3125_v47 = vpack.c.bf16 %v444_v45, %v442_v44  ;;  %v441_v48 = vld [vmem:[#allocation8 + $0x150] sm:$0xff]  ;;  %v443_v49 = vld [vmem:[#allocation8 + $0x188] sm:$0xff]  ;;  %v448_v51 = vld [vmem:[#allocation8 + $0x200] sm:$0xff] }
  0x8d   :  { %260 = vmatprep.mubr.f32.mxu0 %v4295_v0  ;;  %3114 = vmatprep.subr.bf16.mxu1 %v3113_v28  ;;  %v446_v50 = vld [vmem:[#allocation8 + $0x1c8] sm:$0xff]  ;;  %v3127_v52 = vpack.c.bf16 %v443_v49, %v441_v48  ;;  %v445_v54 = vld [vmem:[#allocation8 + $0x1c0] sm:$0xff]  ;;  %v447_v55 = vld [vmem:[#allocation8 + $0x1f8] sm:$0xff] }
  0x8e   :  { %v3129_v53 = vpack.c.bf16 %v448_v51, %v446_v50  ;;  %v450_v56 = vld [vmem:[#allocation8 + $0x238] sm:$0xff]  ;;  %v452_v57 = vld [vmem:[#allocation8 + $0x270] sm:$0xff]  ;;  %v3131_v58 = vpack.c.bf16 %v447_v55, %v445_v54  ;;  %v451_v61 = vld [vmem:[#allocation8 + $0x268] sm:$0xff] }
  0x8f   :  { %2967 = vmatmul.mubr.msk.f32.vlgmr.msra.gmra.mrb[0].mxu1 %vm183_vm0, %v4444_v27  ;;  %v3133_v59 = vpack.c.bf16 %v452_v57, %v450_v56  ;;  %v449_v60 = vld [vmem:[#allocation8 + $0x230] sm:$0xff]  ;;  %v454_v62 = vld [vmem:[#allocation8 + $0x2a8] sm:$0xff]  ;;  %v456_v63 = vld [vmem:[#allocation8 + $0x2e0] sm:$0xff] }
  0x90   :  { %2966 = vmatmul.mubr.msk.f32.gmra.mrb[2].mxu0 %vm183_vm0, %v4449_v33  ;;  %337 = vmatprep.mubr.f32.mxu1 %v4295_v0  ;;  %v3135_v1 = vpack.c.bf16 %v451_v61, %v449_v60  ;;  %v3137_v2 = vpack.c.bf16 %v456_v63, %v454_v62  ;;  %v453_v3 = vld [vmem:[#allocation8 + $0x2a0] sm:$0xff]  ;;  %v455_v4 = vld [vmem:[#allocation8 + $0x2d8] sm:$0xff]  ;;  %v460_v6 = vld [vmem:[#allocation8 + $0x350] sm:$0xff] }
  0x91   :  { %3116 = vmatpush1.bf16.msra.mxu1 %v3115_v34  ;;  %408 = vmatprep.mubr.f32.mxu0 %v4295_v0  ;;  %v458_v5 = vld [vmem:[#allocation8 + $0x318] sm:$0xff]  ;;  %v3139_v7 = vpack.c.bf16 %v455_v4, %v453_v3  ;;  %v457_v9 = vld [vmem:[#allocation8 + $0x310] sm:$0xff]  ;;  %v459_v10 = vld [vmem:[#allocation8 + $0x348] sm:$0xff] }
  0x92   :  { %3118 = vmatprep.subr.bf16.mxu1 %v3117_v35  ;;  %v3141_v8 = vpack.c.bf16 %v460_v6, %v458_v5  ;;  %v462_v11 = vld [vmem:[#allocation8 + $0x388] sm:$0xff]  ;;  %v464_v12 = vld [vmem:[#allocation8 + $0x3c0] sm:$0xff]  ;;  %v3143_v13 = vpack.c.bf16 %v459_v10, %v457_v9  ;;  %v463_v16 = vld [vmem:[#allocation8 + $0x3b8] sm:$0xff] }
  0x93   :  { %2968 = vmatmul.mubr.msk.f32.gmra.mrb[2].mxu1 %vm183_vm0, %v4449_v33  ;;  %v3145_v14 = vpack.c.bf16 %v464_v12, %v462_v11  ;;  %v461_v15 = vld [vmem:[#allocation8 + $0x380] sm:$0xff]  ;;  %v466_v17 = vld [vmem:[#allocation8 + $0x3f8] sm:$0xff]  ;;  %v468_v18 = vld [vmem:[#allocation8 + $0x430] sm:$0xff] }
  0x94   :  { %v3147_v19 = vpack.c.bf16 %v463_v16, %v461_v15  ;;  %v3149_v20 = vpack.c.bf16 %v468_v18, %v466_v17  ;;  %v465_v21 = vld [vmem:[#allocation8 + $0x3f0] sm:$0xff]  ;;  %v467_v22 = vld [vmem:[#allocation8 + $0x428] sm:$0xff]  ;;  %v472_v24 = vld [vmem:[#allocation8 + $0x4a0] sm:$0xff] }
  0x95   :  { %3120 = vmatpush1.bf16.msra.mxu1 %v3119_v40  ;;  %v470_v23 = vld [vmem:[#allocation8 + $0x468] sm:$0xff]  ;;  %v3151_v25 = vpack.c.bf16 %v467_v22, %v465_v21  ;;  %v469_v28 = vld [vmem:[#allocation8 + $0x460] sm:$0xff]  ;;  %v471_v29 = vld [vmem:[#allocation8 + $0x498] sm:$0xff] }
  0x96   :  { %3122 = vmatprep.subr.bf16.mxu1 %v3121_v41  ;;  %v3153_v26 = vpack.c.bf16 %v472_v24, %v470_v23  ;;  %v474_v30 = vld [vmem:[#allocation8 + $0x4d8] sm:$0xff]  ;;  %v476_v31 = vld [vmem:[#allocation8 + $0x510] sm:$0xff]  ;;  %v3155_v32 = vpack.c.bf16 %v471_v29, %v469_v28  ;;  %v475_v36 = vld [vmem:[#allocation8 + $0x508] sm:$0xff] }
  0x97   :  { %v3157_v34 = vpack.c.bf16 %v476_v31, %v474_v30  ;;  %v473_v35 = vld [vmem:[#allocation8 + $0x4d0] sm:$0xff]  ;;  %v478_v37 = vld [vmem:[#allocation8 + $0x548] sm:$0xff]  ;;  %v480_v38 = vld [vmem:[#allocation8 + $0x580] sm:$0xff] }
  0x98   :  { %v3159_v39 = vpack.c.bf16 %v475_v36, %v473_v35  ;;  %v3161_v40 = vpack.c.bf16 %v480_v38, %v478_v37  ;;  %v477_v41 = vld [vmem:[#allocation8 + $0x540] sm:$0xff]  ;;  %v479_v42 = vld [vmem:[#allocation8 + $0x578] sm:$0xff]  ;;  %v484_v44 = vld [vmem:[#allocation8 + $0x5f0] sm:$0xff] }
  0x99   :  { %3124 = vmatpush1.bf16.msra.mxu1 %v3123_v46  ;;  %v482_v43 = vld [vmem:[#allocation8 + $0x5b8] sm:$0xff]  ;;  %v3163_v45 = vpack.c.bf16 %v479_v42, %v477_v41  ;;  %v483_v48 = vld [vmem:[#allocation8 + $0x5e8] sm:$0xff]  ;;  %v488_v50 = vld [vmem:[#allocation8 + $0x660] sm:$0xff] }
  0x9a   :  { %3126 = vmatprep.subr.bf16.mxu1 %v3125_v47  ;;  %v3165_v46 = vpack.c.bf16 %v484_v44, %v482_v43  ;;  %v481_v47 = vld [vmem:[#allocation8 + $0x5b0] sm:$0xff]  ;;  %v486_v49 = vld [vmem:[#allocation8 + $0x628] sm:$0xff]  ;;  %v487_v54 = vld [vmem:[#allocation8 + $0x658] sm:$0xff] }
  0x9b   :  { %v3167_v51 = vpack.c.bf16 %v483_v48, %v481_v47  ;;  %v490_v56 = vld [vmem:[#allocation8 + $0x698] sm:$0xff]  ;;  %v492_v57 = vld [vmem:[#allocation8 + $0x6d0] sm:$0xff]  ;;  %v491_v60 = vld [vmem:[#allocation8 + $0x6c8] sm:$0xff] }
  0x9c   :  { %v494_v62 = vld [vmem:[#allocation8 + $0x708] sm:$0xff]  ;;  %v496_v63 = vld [vmem:[#allocation8 + $0x740] sm:$0xff]  ;;  %v138_v3 = vld [vmem:[#allocation7 + $0x58] sm:$0xff] }
  0x9d   :  { %3128 = vmatpush1.bf16.msra.mxu1 %v3127_v52  ;;  %v3169_v52 = vpack.c.bf16 %v488_v50, %v486_v49  ;;  %v131_v4 = vld [vmem:[#allocation7 + $0x20] sm:$0xff]  ;;  %v137_v6 = vld [vmem:[#allocation7 + $0x50] sm:$0xff]  ;;  %v729_v18 = vld [vmem:[#allocation10 + $0x48] sm:$0xff] }
  0x9e   :  { %3130 = vmatprep.subr.bf16.mxu1 %v3129_v53  ;;  %v485_v53 = vld [vmem:[#allocation8 + $0x620] sm:$0xff]  ;;  %v3107_v9 = vpack.c.bf16 %v137_v6, %v131_v4  ;;  %v149_v12 = vld [vmem:[#allocation7 + $0xb0] sm:$0xff]  ;;  %v733_v24 = vld [vmem:[#allocation10 + $0xd8] sm:$0xff]  ;;  %v153_v4 = vlaneseq }
  0x9f   :  { %v3171_v55 = vpack.c.bf16 %v487_v54, %v485_v53  ;;  %v143_v11 = vld [vmem:[#allocation7 + $0x80] sm:$0xff]  ;;  %v731_v23 = vld [vmem:[#allocation10 + $0x90] sm:$0xff]  ;;  %v737_v31 = vld [vmem:[#allocation10 + $0x168] sm:$0xff] }
  0xa0   :  { %v3111_v15 = vpack.c.bf16 %v149_v12, %v143_v11  ;;  %v727_v17 = vld [vmem:[#allocation10] sm:$0xff]  ;;  %v3247_v28 = vpack.c.bf16 %v733_v24, %v731_v23  ;;  %v739_v37 = vld [vmem:[#allocation10 + $0x1b0] sm:$0xff]  ;;  %v741_v38 = vld [vmem:[#allocation10 + $0x1f8] sm:$0xff]  ;;  %v4464_v11 = vshrl.u32 %v153_v4, 7 }
  0xa1   :  { %3132 = vmatpush1.bf16.msra.mxu1 %v3131_v58  ;;  %v3173_v58 = vpack.c.bf16 %v492_v57, %v490_v56  ;;  %v3243_v21 = vpack.c.bf16 %v729_v18, %v727_v17  ;;  %v735_v30 = vld [vmem:[#allocation10 + $0x120] sm:$0xff]  ;;  %v745_v43 = vld [vmem:[#allocation10 + $0x288] sm:$0xff]  ;;  %v748_v44 = vld [vmem:[#allocation10 + $0x2d8] sm:$0xff] }
  0xa2   :  { %3134 = vmatprep.subr.bf16.mxu1 %v3133_v59  ;;  %v489_v59 = vld [vmem:[#allocation8 + $0x690] sm:$0xff]  ;;  %v3251_v35 = vpack.c.bf16 %v737_v31, %v735_v30  ;;  %v743_v42 = vld [vmem:[#allocation10 + $0x240] sm:$0xff]  ;;  %v749_v48 = vld [vmem:[#allocation10 + $0x318] sm:$0xff]  ;;  %v4467_v18 = vsub.s32 0, %v4464_v11 }
  0xa3   :  { %v3175_v61 = vpack.c.bf16 %v491_v60, %v489_v59  ;;  %v747_v47 = vld [vmem:[#allocation10 + $0x2d0] sm:$0xff]  ;;  %v752_v49 = vld [vmem:[#allocation10 + $0x368] sm:$0xff]  ;;  %v751_v53 = vld [vmem:[#allocation10 + $0x360] sm:$0xff] }
  0xa4   :  { %v754_v50 = vld [vmem:[#allocation10 + $0x3b0] sm:$0xff]  ;;  %v753_v54 = vld [vmem:[#allocation10 + $0x3a8] sm:$0xff]  ;;  %v758_v56 = vld [vmem:[#allocation10 + $0x440] sm:$0xff] }
  0xa5   :  { %3136 = vmatpush1.bf16.msra.mxu1 %v3135_v1  ;;  %v3177_v1 = vpack.c.bf16 %v496_v63, %v494_v62  ;;  %v3267_v57 = vpack.c.bf16 %v753_v54, %v751_v53  ;;  %v755_v59 = vld [vmem:[#allocation10 + $0x3f0] sm:$0xff]  ;;  %v757_v60 = vld [vmem:[#allocation10 + $0x438] sm:$0xff]  ;;  %v766_v6 = vld [vmem:[#allocation10 + $0x560] sm:$0xff] }
  0xa6   :  { %3138 = vmatprep.subr.bf16.mxu1 %v3137_v2  ;;  %v132_v2 = vld [vmem:[#allocation7 + $0x28] sm:$0xff]  ;;  %v762_v62 = vld [vmem:[#allocation10 + $0x4d0] sm:$0xff]  ;;  %v3271_v63 = vpack.c.bf16 %v757_v60, %v755_v59 }
  0xa7   :  { %v3105_v5 = vpack.c.bf16 %v138_v3, %v132_v2  ;;  %v759_v2 = vld [vmem:[#allocation10 + $0x480] sm:$0xff]  ;;  %v761_v3 = vld [vmem:[#allocation10 + $0x4c8] sm:$0xff]  ;;  %v778_v31 = vld [vmem:[#allocation10 + $0x710] sm:$0xff] }
  0xa8   :  { %v768_v12 = vld [vmem:[#allocation10 + $0x5a8] sm:$0xff]  ;;  %v779_v54 = vld [vmem:[#allocation10 + $0x750] sm:$0xff] }
  0xa9   :  { %3140 = vmatpush1.bf16.msra.mxu1 %v3139_v7  ;;  %v144_v7 = vld [vmem:[#allocation7 + $0x88] sm:$0xff]  ;;  %3106 = vmatprep.subr.bf16.mxu0 %v3105_v5  ;;  %v764_v5 = vld [vmem:[#allocation10 + $0x518] sm:$0xff]  ;;  %v786_v4 = vld [vmem:[#allocation10 + $0x830] sm:$0xff] }
  0xaa   :  { %3142 = vmatprep.subr.bf16.mxu1 %v3141_v8  ;;  %v150_v8 = vld [vmem:[#allocation7 + $0xb8] sm:$0xff]  ;;  %3108 = vmatpush1.bf16.msra.mxu0 %v3107_v9  ;;  %v763_v9 = vld [vmem:[#allocation10 + $0x510] sm:$0xff]  ;;  %v769_v17 = vld [vmem:[#allocation10 + $0x5e8] sm:$0xff] }
  0xab   :  { %v3109_v10 = vpack.c.bf16 %v150_v8, %v144_v7  ;;  %v3275_v7 = vpack.c.bf16 %v761_v3, %v759_v2  ;;  %v3277_v8 = vpack.c.bf16 %v766_v6, %v764_v5  ;;  %v776_v30 = vld [vmem:[#allocation10 + $0x6c8] sm:$0xff] }
  0xac   :  { %v499_v59 = vld [vmem:[#allocation8 + $0x7a8] sm:$0xff] }
  0xad   :  { %3144 = vmatpush1.bf16.msra.mxu1 %v3143_v13  ;;  %v728_v13 = vld [vmem:[#allocation10 + $0x8] sm:$0xff]  ;;  %3110 = vmatprep.subr.bf16.mxu0 %v3109_v10  ;;  %v765_v10 = vld [vmem:[#allocation10 + $0x558] sm:$0xff] }
  0xae   :  { %3146 = vmatprep.subr.bf16.mxu1 %v3145_v14  ;;  %v730_v14 = vld [vmem:[#allocation10 + $0x50] sm:$0xff]  ;;  %3112 = vmatpush1.bf16.msra.mxu0 %v3111_v15  ;;  %v502_v60 = vld [vmem:[#allocation8 + $0x7e8] sm:$0xff] }
  0xaf   :  { %v3241_v16 = vpack.c.bf16 %v730_v14, %v728_v13  ;;  %v770_v13 = vld [vmem:[#allocation10 + $0x5f0] sm:$0xff]  ;;  %v3279_v14 = vpack.c.bf16 %v765_v10, %v763_v9  ;;  %v784_v3 = vld [vmem:[#allocation10 + $0x7e8] sm:$0xff] }
  0xb0   :  { %v3281_v15 = vpack.c.bf16 %v770_v13, %v768_v12 }
  0xb1   :  { %3148 = vmatpush1.bf16.msra.mxu1 %v3147_v19  ;;  %v732_v19 = vld [vmem:[#allocation10 + $0x98] sm:$0xff]  ;;  %3242 = vmatprep.subr.bf16.mxu0 %v3241_v16  ;;  %v767_v16 = vld [vmem:[#allocation10 + $0x5a0] sm:$0xff] }
  0xb2   :  { %3150 = vmatprep.subr.bf16.mxu1 %v3149_v20  ;;  %v734_v20 = vld [vmem:[#allocation10 + $0xe0] sm:$0xff]  ;;  %2969 = vmatmul.mubr.msk.f32.vlgmr.msra.gmra.mrb[4].mxu0 %vm183_vm0, %v4444_v27  ;;  %v744_v27 = vld [vmem:[#allocation10 + $0x248] sm:$0xff]  ;;  %v3283_v23 = vpack.c.bf16 %v769_v17, %v767_v16  ;;  %v3297_v16 = vpack.c.bf16 %v786_v4, %v784_v3  ;;  %v506_v17 = vld [vmem:[#allocation8 + $0x858] sm:$0xff] }
  0xb3   :  { %v3245_v22 = vpack.c.bf16 %v734_v20, %v732_v19  ;;  %3244 = vmatpush1.bf16.msra.mxu0 %v3243_v21  ;;  %414 = vmatprep.mubr.f32.mxu0 %v4295_v0  ;;  %v772_v19 = vld [vmem:[#allocation10 + $0x638] sm:$0xff]  ;;  %v774_v20 = vld [vmem:[#allocation10 + $0x680] sm:$0xff] }
  0xb4   :  { %v4469_v21 = vld [vmem:[#allocation13] sm:$0x3f]  ;;  %v3285_v24 = vpack.c.bf16 %v774_v20, %v772_v19  ;;  %v508_v19 = vld [vmem:[#allocation8 + $0x890] sm:$0xff] }
  0xb5   :  { %3152 = vmatpush1.bf16.msra.mxu1 %v3151_v25  ;;  %v736_v25 = vld [vmem:[#allocation10 + $0x128] sm:$0xff]  ;;  %3246 = vmatprep.subr.bf16.mxu0 %v3245_v22  ;;  %v4472_v22 = vsub.s32 1, %v4464_v11  ;;  %v536_v3 = vld [vmem:[#allocation8 + $0xba0] sm:$0xff] }
  0xb6   :  { %3154 = vmatprep.subr.bf16.mxu1 %v3153_v26  ;;  %v738_v26 = vld [vmem:[#allocation10 + $0x170] sm:$0xff]  ;;  %2970 = vmatmul.mubr.msk.f32.gmra.mrb[6].mxu0 %vm183_vm0, %v4449_v33 }
  0xb7   :  { %v3249_v29 = vpack.c.bf16 %v738_v26, %v736_v25  ;;  %3248 = vmatpush1.bf16.msra.mxu0 %v3247_v28  ;;  %v771_v25 = vld [vmem:[#allocation10 + $0x630] sm:$0xff]  ;;  %v773_v26 = vld [vmem:[#allocation10 + $0x678] sm:$0xff]  ;;  %v156_v28 = vrot.slane %v4469_v21, %v4467_v18 }
  0xb9   :  { %3156 = vmatpush1.bf16.msra.mxu1 %v3155_v32  ;;  %v740_v32 = vld [vmem:[#allocation10 + $0x1b8] sm:$0xff]  ;;  %3250 = vmatprep.subr.bf16.mxu0 %v3249_v29  ;;  %v4477_v29 = vsub.s32 3, %v4464_v11 }
  0xba   :  { %3158 = vmatprep.subr.bf16.mxu1 %v3157_v34  ;;  %v742_v34 = vld [vmem:[#allocation10 + $0x200] sm:$0xff] }
  0xbb   :  { %v3253_v36 = vpack.c.bf16 %v742_v34, %v740_v32  ;;  %3252 = vmatpush1.bf16.msra.mxu0 %v3251_v35  ;;  %v160_v32 = vrot.slane %v4469_v21, %v4472_v22  ;;  %v3287_v34 = vpack.c.bf16 %v773_v26, %v771_v25  ;;  %v507_v25 = vld [vmem:[#allocation8 + $0x888] sm:$0xff] }
  0xbc   :  { %v510_v26 = vld [vmem:[#allocation8 + $0x8c8] sm:$0xff] }
  0xbd   :  { %3160 = vmatpush1.bf16.msra.mxu1 %v3159_v39  ;;  %v746_v39 = vld [vmem:[#allocation10 + $0x290] sm:$0xff]  ;;  %3254 = vmatprep.subr.bf16.mxu0 %v3253_v36  ;;  %v493_v36 = vld [vmem:[#allocation8 + $0x700] sm:$0xff] }
  0xbe   :  { %3162 = vmatprep.subr.bf16.mxu1 %v3161_v40  ;;  %v3255_v40 = vpack.c.bf16 %v741_v38, %v739_v37  ;;  %v3257_v41 = vpack.c.bf16 %v746_v39, %v744_v27  ;;  %v3289_v37 = vpack.c.bf16 %v778_v31, %v776_v30  ;;  %v775_v38 = vld [vmem:[#allocation10 + $0x6c0] sm:$0xff]  ;;  %v777_v27 = vld [vmem:[#allocation10 + $0x708] sm:$0xff] }
  0xc0   :  { %3256 = vmatpush1.bf16.msra.mxu0 %v3255_v40 }
  0xc1   :  { %3164 = vmatpush1.bf16.msra.mxu1 %v3163_v45  ;;  %v750_v45 = vld [vmem:[#allocation10 + $0x320] sm:$0xff]  ;;  %3258 = vmatprep.subr.bf16.mxu0 %v3257_v41  ;;  %v495_v41 = vld [vmem:[#allocation8 + $0x738] sm:$0xff] }
  0xc2   :  { %3166 = vmatprep.subr.bf16.mxu1 %v3165_v46  ;;  %v3259_v46 = vpack.c.bf16 %v745_v43, %v743_v42  ;;  %v3261_v33 = vpack.c.bf16 %v750_v45, %v748_v44  ;;  %v4483_v42 = vrot.slane %v4469_v21, %v4477_v29  ;;  %v780_v43 = vld [vmem:[#allocation10 + $0x758] sm:$0xff]  ;;  %v782_v44 = vld [vmem:[#allocation10 + $0x7a0] sm:$0xff] }
  0xc3   :  { %v3293_v53 = vpack.c.bf16 %v782_v44, %v780_v43 }
  0xc4   :  { %3260 = vmatpush1.bf16.msra.mxu0 %v3259_v46  ;;  %v498_v46 = vld [vmem:[#allocation8 + $0x778] sm:$0xff] }
  0xc5   :  { %3168 = vmatpush1.bf16.msra.mxu1 %v3167_v51  ;;  %v3263_v51 = vpack.c.bf16 %v749_v48, %v747_v47  ;;  %3262 = vmatprep.subr.bf16.mxu0 %v3261_v33  ;;  %v500_v33 = vld [vmem:[#allocation8 + $0x7b0] sm:$0xff]  ;;  %v3291_v48 = vpack.c.bf16 %v777_v27, %v775_v38 }
  0xc6   :  { %3170 = vmatprep.subr.bf16.mxu1 %v3169_v52  ;;  %v3265_v52 = vpack.c.bf16 %v754_v50, %v752_v49  ;;  %v3179_v50 = vpack.c.bf16 %v495_v41, %v493_v36  ;;  %v516_v36 = vld [vmem:[#allocation8 + $0x970] sm:$0xff]  ;;  %v520_v41 = vld [vmem:[#allocation8 + $0x9e0] sm:$0xff] }
  0xc7   :  { %v513_v27 = vld [vmem:[#allocation8 + $0x930] sm:$0xff] }
  0xc8   :  { %3264 = vmatpush1.bf16.msra.mxu0 %v3263_v51 }
  0xc9   :  { %3172 = vmatpush1.bf16.msra.mxu1 %v3171_v55  ;;  %v756_v55 = vld [vmem:[#allocation10 + $0x3f8] sm:$0xff]  ;;  %3266 = vmatprep.subr.bf16.mxu0 %v3265_v52 }
  0xca   :  { %3174 = vmatprep.subr.bf16.mxu1 %v3173_v58  ;;  %v3269_v58 = vpack.c.bf16 %v758_v56, %v756_v55  ;;  %v781_v55 = vld [vmem:[#allocation10 + $0x798] sm:$0xff] }
  0xcc   :  { %3268 = vmatpush1.bf16.msra.mxu0 %v3267_v57  ;;  %v3181_v57 = vpack.c.bf16 %v500_v33, %v498_v46  ;;  %v519_v46 = vld [vmem:[#allocation8 + $0x9d8] sm:$0xff] }
  0xcd   :  { %3176 = vmatpush1.bf16.msra.mxu1 %v3175_v61  ;;  %v760_v61 = vld [vmem:[#allocation10 + $0x488] sm:$0xff]  ;;  %3270 = vmatprep.subr.bf16.mxu0 %v3269_v58  ;;  %v497_v58 = vld [vmem:[#allocation8 + $0x770] sm:$0xff]  ;;  %v522_v33 = vld [vmem:[#allocation8 + $0xa18] sm:$0xff] }
  0xce   :  { %3178 = vmatprep.subr.bf16.mxu1 %v3177_v1  ;;  %v3273_v1 = vpack.c.bf16 %v762_v62, %v760_v61 }
  0xd0   :  { %3272 = vmatpush1.bf16.msra.mxu0 %v3271_v63 }
  0xd1   :  { %3274 = vmatprep.subr.bf16.mxu0 %v3273_v1  ;;  %v504_v1 = vld [vmem:[#allocation8 + $0x820] sm:$0xff] }
  0xd2   :  { %v3185_v13 = vpack.c.bf16 %v504_v1, %v502_v60  ;;  %v532_v60 = vld [vmem:[#allocation8 + $0xb30] sm:$0xff]  ;;  %v531_v1 = vld [vmem:[#allocation8 + $0xb28] sm:$0xff] }
  0xd4   :  { %3276 = vmatpush1.bf16.msra.mxu0 %v3275_v7  ;;  %v3295_v7 = vpack.c.bf16 %v781_v55, %v779_v54  ;;  %v528_v54 = vld [vmem:[#allocation8 + $0xac0] sm:$0xff] }
  0xd5   :  { %3278 = vmatprep.subr.bf16.mxu0 %v3277_v8  ;;  %v3183_v8 = vpack.c.bf16 %v499_v59, %v497_v58  ;;  %v527_v58 = vld [vmem:[#allocation8 + $0xab8] sm:$0xff] }
  0xd6   :  { %v530_v59 = vld [vmem:[#allocation8 + $0xaf8] sm:$0xff] }
  0xd8   :  { %3280 = vmatpush1.bf16.msra.mxu0 %v3279_v14  ;;  %v501_v14 = vld [vmem:[#allocation8 + $0x7e0] sm:$0xff] }
  0xd9   :  { %3282 = vmatprep.subr.bf16.mxu0 %v3281_v15  ;;  %v503_v15 = vld [vmem:[#allocation8 + $0x818] sm:$0xff] }
  0xda   :  { %v3187_v20 = vpack.c.bf16 %v503_v15, %v501_v14  ;;  %v537_v15 = vld [vmem:[#allocation8 + $0xbd0] sm:$0xff] }
  0xdc   :  { %3284 = vmatpush1.bf16.msra.mxu0 %v3283_v23  ;;  %v3189_v23 = vpack.c.bf16 %v508_v19, %v506_v17  ;;  %v542_v17 = vld [vmem:[#allocation8 + $0xc48] sm:$0xff]  ;;  %v544_v19 = vld [vmem:[#allocation8 + $0xc80] sm:$0xff] }
  0xdd   :  { %3286 = vmatprep.subr.bf16.mxu0 %v3285_v24  ;;  %v505_v24 = vld [vmem:[#allocation8 + $0x850] sm:$0xff] }
  0xde   :  { %v3191_v30 = vpack.c.bf16 %v507_v25, %v505_v24  ;;  %v541_v24 = vld [vmem:[#allocation8 + $0xc40] sm:$0xff]  ;;  %v543_v25 = vld [vmem:[#allocation8 + $0xc78] sm:$0xff] }
  0xe0   :  { %3288 = vmatpush1.bf16.msra.mxu0 %v3287_v34  ;;  %v511_v34 = vld [vmem:[#allocation8 + $0x8f8] sm:$0xff] }
  0xe1   :  { %3290 = vmatprep.subr.bf16.mxu0 %v3289_v37 }
  0xe4   :  { %3292 = vmatpush1.bf16.msra.mxu0 %v3291_v48  ;;  %v524_v48 = vld [vmem:[#allocation8 + $0xa50] sm:$0xff] }
  0xe5   :  { %3294 = vmatprep.subr.bf16.mxu0 %v3293_v53  ;;  %v526_v53 = vld [vmem:[#allocation8 + $0xa88] sm:$0xff] }
  0xe8   :  { %3296 = vmatpush1.bf16.msra.mxu0 %v3295_v7  ;;  %v533_v7 = vld [vmem:[#allocation8 + $0xb60] sm:$0xff] }
  0xe9   :  { %3298 = vmatprep.subr.bf16.mxu0 %v3297_v16  ;;  %v539_v16 = vld [vmem:[#allocation8 + $0xc08] sm:$0xff] }
 0x15f   :  { %v256_v35 = vpop.f32.mrb[0].mxu0 }
 0x160   :  { %v257_v39 = vadd.f32 %v256_v35, %v156_v28  ;;  %v258_v40 = vpop.f32.mrb[1].mxu0  ;;  %v514_v35 = vld [vmem:[#allocation8 + $0x938] sm:$0xff] }
 0x161   :  { %v259_v45 = vadd.f32 %v258_v40, %v160_v32  ;;  %v3197_v38 = vpack.c.bf16 %v516_v36, %v514_v35  ;;  %v518_v40 = vld [vmem:[#allocation8 + $0x9a8] sm:$0xff]  ;;  %v552_v36 = vld [vmem:[#allocation8 + $0xd60] sm:$0xff] }
 0x162   :  { %v4485_v47 = vpop.f32.mrb[0].mxu1  ;;  %v421_v56 = vmax.f32 %v257_v39, 0.0  ;;  %v515_v39 = vld [vmem:[#allocation8 + $0x968] sm:$0xff]  ;;  %v3201_v44 = vpack.c.bf16 %v520_v41, %v518_v40  ;;  %v551_v40 = vld [vmem:[#allocation8 + $0xd58] sm:$0xff] }
 0x163   :  { %v422_v49 = vmax.f32 %v259_v45, 0.0  ;;  %v262_v51 = vpop.f32.mrb[2].mxu0  ;;  %v335_v52 = vpop.f32.mrb[1].mxu1  ;;  %v3199_v43 = vpack.c.bf16 %v515_v39, %v513_v27  ;;  %v517_v45 = vld [vmem:[#allocation8 + $0x9a0] sm:$0xff]  ;;  %v550_v35 = vld [vmem:[#allocation8 + $0xd28] sm:$0xff]  ;;  %v554_v41 = vld [vmem:[#allocation8 + $0xd98] sm:$0xff] }
 0x164   :  { %v263_v61 = vadd.f32 %v262_v51, %v156_v28  ;;  %v264_v62 = vpop.f32.mrb[3].mxu0  ;;  %v336_v63 = vadd.f32 %v335_v52, %v4483_v42  ;;  %v512_v28 = vld [vmem:[#allocation8 + $0x900] sm:$0xff]  ;;  %v521_v51 = vld [vmem:[#allocation8 + $0xa10] sm:$0xff]  ;;  %v523_v52 = vld [vmem:[#allocation8 + $0xa48] sm:$0xff]  ;;  %v3233_v27 = vpack.c.bf16 %v552_v36, %v550_v35 }
 0x165   :  { %633 = vmatprep.mubr.f32.mxu1 %v422_v49  ;;  %v265_v2 = vadd.f32 %v264_v62, %v160_v32  ;;  %v3193_v31 = vpack.c.bf16 %v512_v28, %v510_v26  ;;  %v509_v32 = vld [vmem:[#allocation8 + $0x8c0] sm:$0xff]  ;;  %v3203_v49 = vpack.c.bf16 %v519_v46, %v517_v45  ;;  %v3207_v55 = vpack.c.bf16 %v523_v52, %v521_v51  ;;  %v546_v26 = vld [vmem:[#allocation8 + $0xcb8] sm:$0xff]  ;;  %v548_v28 = vld [vmem:[#allocation8 + $0xcf0] sm:$0xff] }
 0x166   :  { %634 = vmatmul.mubr.f32.vlgmr.msra.gmra.mrb[4].mxu1 %v421_v56  ;;  %v425_v5 = vmax.f32 %v263_v61, 0.0  ;;  %v4488_v6 = vpop.f32.mrb[2].mxu1  ;;  %v424_v10 = vmax.f32 %v336_v63, 0.0  ;;  %v3195_v37 = vpack.c.bf16 %v511_v34, %v509_v32  ;;  %v3209_v56 = vpack.c.bf16 %v528_v54, %v526_v53  ;;  %v529_v63 = vld [vmem:[#allocation8 + $0xaf0] sm:$0xff]  ;;  %v547_v34 = vld [vmem:[#allocation8 + $0xce8] sm:$0xff]  ;;  %v549_v39 = vld [vmem:[#allocation8 + $0xd20] sm:$0xff] }
 0x167   :  { %3180 = vmatpush1.bf16.msra.mxu1 %v3179_v50  ;;  %v426_v9 = vmax.f32 %v265_v2, 0.0  ;;  %v4490_v12 = vpop.f32.mrb[3].mxu1  ;;  %v3205_v50 = vpack.c.bf16 %v524_v48, %v522_v33  ;;  %v3213_v62 = vpack.c.bf16 %v532_v60, %v530_v59  ;;  %v534_v2 = vld [vmem:[#allocation8 + $0xb68] sm:$0xff]  ;;  %v3215_v4 = vpack.c.bf16 %v531_v1, %v529_v63  ;;  %v545_v32 = vld [vmem:[#allocation8 + $0xcb0] sm:$0xff]  ;;  %v788_v59 = vld [vmem:[#allocation10 + $0x878] sm:$0xff] }
 0x168   :  { %3182 = vmatprep.subr.bf16.mxu1 %v3181_v57  ;;  %v525_v57 = vld [vmem:[#allocation8 + $0xa80] sm:$0xff]  ;;  %v553_v33 = vld [vmem:[#allocation8 + $0xd90] sm:$0xff]  ;;  %v555_v48 = vld [vmem:[#allocation8 + $0xdc8] sm:$0xff] }
 0x169   :  { %639 = vmatprep.mubr.f32.mxu1 %v426_v9  ;;  %v3211_v61 = vpack.c.bf16 %v527_v58, %v525_v57  ;;  %v538_v9 = vld [vmem:[#allocation8 + $0xbd8] sm:$0xff]  ;;  %v785_v57 = vld [vmem:[#allocation10 + $0x828] sm:$0xff]  ;;  %v790_v60 = vld [vmem:[#allocation10 + $0x8c0] sm:$0xff] }
 0x16a   :  { %640 = vmatmul.mubr.f32.gmra.mrb[6].mxu1 %v425_v5  ;;  %v3217_v5 = vpack.c.bf16 %v536_v3, %v534_v2  ;;  %v899_v35 = vld [vmem:[#allocation11 + $0x148] sm:$0xff]  ;;  %v901_v36 = vld [vmem:[#allocation11 + $0x198] sm:$0xff] }
 0x16b   :  { %3184 = vmatpush1.bf16.msra.mxu1 %v3183_v8  ;;  %710 = vmatprep.mubr.f32.mxu1 %v424_v10  ;;  %v535_v8 = vld [vmem:[#allocation8 + $0xb98] sm:$0xff]  ;;  %v540_v10 = vld [vmem:[#allocation8 + $0xc10] sm:$0xff] }
 0x16c   :  { %3186 = vmatprep.subr.bf16.mxu1 %v3185_v13  ;;  %v3219_v13 = vpack.c.bf16 %v535_v8, %v533_v7  ;;  %v3221_v14 = vpack.c.bf16 %v540_v10, %v538_v9 }
 0x16f   :  { %3188 = vmatpush1.bf16.msra.mxu1 %v3187_v20  ;;  %v3223_v20 = vpack.c.bf16 %v539_v16, %v537_v15  ;;  %v892_v15 = vld [vmem:[#allocation11 + $0x50] sm:$0xff] }
 0x170   :  { %3190 = vmatprep.subr.bf16.mxu1 %v3189_v23  ;;  %v3225_v23 = vpack.c.bf16 %v544_v19, %v542_v17  ;;  %v895_v17 = vld [vmem:[#allocation11 + $0xa8] sm:$0xff]  ;;  %v897_v19 = vld [vmem:[#allocation11 + $0xf8] sm:$0xff] }
 0x173   :  { %3192 = vmatpush1.bf16.msra.mxu1 %v3191_v30  ;;  %v3227_v30 = vpack.c.bf16 %v543_v25, %v541_v24 }
 0x174   :  { %3194 = vmatprep.subr.bf16.mxu1 %v3193_v31  ;;  %v3229_v31 = vpack.c.bf16 %v548_v28, %v546_v26 }
 0x177   :  { %3196 = vmatpush1.bf16.msra.mxu1 %v3195_v37  ;;  %v3231_v37 = vpack.c.bf16 %v547_v34, %v545_v32  ;;  %v896_v32 = vld [vmem:[#allocation11 + $0xf0] sm:$0xff] }
 0x178   :  { %3198 = vmatprep.subr.bf16.mxu1 %v3197_v38  ;;  %v4493_v38 = vsub.s32 2, %v4464_v11 }
 0x17a   :  { %v164_v45 = vrot.slane %v4469_v21, %v4493_v38 }
 0x17b   :  { %3200 = vmatpush1.bf16.msra.mxu1 %v3199_v43  ;;  %v556_v43 = vld [vmem:[#allocation8 + $0xdd0] sm:$0xff] }
 0x17c   :  { %3202 = vmatprep.subr.bf16.mxu1 %v3201_v44  ;;  %v3235_v44 = vpack.c.bf16 %v551_v40, %v549_v39  ;;  %v3237_v46 = vpack.c.bf16 %v556_v43, %v554_v41  ;;  %v334_v51 = vadd.f32 %v4485_v47, %v164_v45  ;;  %v340_v52 = vadd.f32 %v4488_v6, %v164_v45  ;;  %v891_v6 = vld [vmem:[#allocation11 + $0x8] sm:$0xff]  ;;  %v898_v41 = vld [vmem:[#allocation11 + $0x140] sm:$0xff]  ;;  %v900_v43 = vld [vmem:[#allocation11 + $0x190] sm:$0xff] }
 0x17d   :  { %v3313_v40 = vpack.c.bf16 %v901_v36, %v899_v35  ;;  %v903_v45 = vld [vmem:[#allocation11 + $0x1e8] sm:$0xff]  ;;  %v1034_v36 = vld [vmem:[#allocation10 + $0x160] sm:$0xff] }
 0x17e   :  { %v423_v54 = vmax.f32 %v334_v51, 0.0  ;;  %v907_v51 = vld [vmem:[#allocation11 + $0x288] sm:$0xff] }
 0x17f   :  { %3204 = vmatpush1.bf16.msra.mxu1 %v3203_v49  ;;  %v3239_v49 = vpack.c.bf16 %v555_v48, %v553_v33  ;;  %v902_v48 = vld [vmem:[#allocation11 + $0x1e0] sm:$0xff] }
 0x180   :  { %3206 = vmatprep.subr.bf16.mxu1 %v3205_v50  ;;  %v342_v50 = vadd.f32 %v4490_v12, %v4483_v42  ;;  %v787_v42 = vld [vmem:[#allocation10 + $0x870] sm:$0xff]  ;;  %v789_v12 = vld [vmem:[#allocation10 + $0x8b8] sm:$0xff] }
 0x181   :  { %v3303_v47 = vpack.c.bf16 %v789_v12, %v787_v42  ;;  %v915_v12 = vld [vmem:[#allocation11 + $0x3c8] sm:$0xff] }
 0x182   :  { %v428_v53 = vmax.f32 %v342_v50, 0.0 }
 0x183   :  { %3208 = vmatpush1.bf16.msra.mxu1 %v3207_v55  ;;  %v427_v55 = vmax.f32 %v340_v52, 0.0  ;;  %v909_v52 = vld [vmem:[#allocation11 + $0x2d8] sm:$0xff] }
 0x184   :  { %3210 = vmatprep.subr.bf16.mxu1 %v3209_v56  ;;  %v783_v56 = vld [vmem:[#allocation10 + $0x7e0] sm:$0xff] }
 0x185   :  { %v3299_v58 = vpack.c.bf16 %v785_v57, %v783_v56  ;;  %v4501_v1 = vpop.f32.mrb[4].mxu0  ;;  %v911_v57 = vld [vmem:[#allocation11 + $0x328] sm:$0xff] }
 0x186   :  { %v4503_v2 = vpop.f32.mrb[5].mxu0 }
 0x187   :  { %3212 = vmatpush1.bf16.msra.mxu1 %v3211_v61  ;;  %3300 = vmatpush1.bf16.msra.mxu0 %v3299_v58  ;;  %v3301_v61 = vpack.c.bf16 %v790_v60, %v788_v59  ;;  %v913_v58 = vld [vmem:[#allocation11 + $0x378] sm:$0xff]  ;;  %v910_v60 = vld [vmem:[#allocation11 + $0x320] sm:$0xff] }
 0x188   :  { %3214 = vmatprep.subr.bf16.mxu1 %v3213_v62  ;;  %v893_v62 = vld [vmem:[#allocation11 + $0x58] sm:$0xff]  ;;  %v3325_v59 = vpack.c.bf16 %v913_v58, %v911_v57  ;;  %v1057_v58 = vld [vmem:[#allocation10 + $0x308] sm:$0xff] }
 0x189   :  { %3302 = vmatprep.subr.bf16.mxu0 %v3301_v61  ;;  %v3305_v63 = vpack.c.bf16 %v893_v62, %v891_v6  ;;  %v4505_v3 = vpop.f32.mrb[6].mxu0  ;;  %v912_v61 = vld [vmem:[#allocation11 + $0x370] sm:$0xff]  ;;  %v914_v62 = vld [vmem:[#allocation11 + $0x3c0] sm:$0xff] }
 0x18a   :  { %v3327_v42 = vpack.c.bf16 %v912_v61, %v910_v60  ;;  %v1066_v60 = vld [vmem:[#allocation10 + $0x3a0] sm:$0xff]  ;;  %v1070_v61 = vld [vmem:[#allocation10 + $0x3e8] sm:$0xff] }
 0x18b   :  { %3216 = vmatpush1.bf16.msra.mxu1 %v3215_v4  ;;  %3304 = vmatpush1.bf16.msra.mxu0 %v3303_v47  ;;  %v4507_v4 = vpop.f32.mrb[7].mxu0  ;;  %v917_v47 = vld [vmem:[#allocation11 + $0x418] sm:$0xff] }
 0x18c   :  { %3218 = vmatprep.subr.bf16.mxu1 %v3217_v5  ;;  %3306 = vmatprep.subr.bf16.mxu0 %v3305_v63  ;;  %v557_v5 = vld [vmem:[#allocation13 + $0x6] sm:$0x3]  ;;  %v3329_v6 = vpack.c.bf16 %v917_v47, %v915_v12  ;;  %v916_v63 = vld [vmem:[#allocation11 + $0x410] sm:$0xff]  ;;  %v3425_v12 = vpack.c.bf16 %v1070_v61, %v1066_v60  ;;  %v1065_v47 = vld [vmem:[#allocation10 + $0x398] sm:$0xff] }
 0x18d   :  { %v562_v7 = vrot.slane %v557_v5, %v4467_v18  ;;  %v566_v8 = vrot.slane %v557_v5, %v4472_v22  ;;  %v3331_v5 = vpack.c.bf16 %v916_v63, %v914_v62  ;;  %v1074_v62 = vld [vmem:[#allocation10 + $0x430] sm:$0xff]  ;;  %v1078_v63 = vld [vmem:[#allocation10 + $0x478] sm:$0xff]  ;;  %v1133_v60 = vld [vmem:[#allocation10 + $0x860] sm:$0xff] }
 0x18f   :  { %3220 = vmatpush1.bf16.msra.mxu1 %v3219_v13 }
 0x190   :  { %3222 = vmatprep.subr.bf16.mxu1 %v3221_v14  ;;  %v890_v14 = vld [vmem:[#allocation11] sm:$0xff] }
 0x191   :  { %v3307_v24 = vpack.c.bf16 %v892_v15, %v890_v14  ;;  %v1018_v15 = vld [vmem:[#allocation10 + $0x40] sm:$0xff] }
 0x193   :  { %3224 = vmatpush1.bf16.msra.mxu1 %v3223_v20 }
 0x194   :  { %3226 = vmatprep.subr.bf16.mxu1 %v3225_v23 }
 0x197   :  { %3228 = vmatpush1.bf16.msra.mxu1 %v3227_v30  ;;  %v3309_v30 = vpack.c.bf16 %v897_v19, %v895_v17  ;;  %v1016_v17 = vld [vmem:[#allocation10 + $0x30] sm:$0xff] }
 0x198   :  { %3230 = vmatprep.subr.bf16.mxu1 %v3229_v31  ;;  %v894_v31 = vld [vmem:[#allocation11 + $0xa0] sm:$0xff] }
 0x19b   :  { %3232 = vmatpush1.bf16.msra.mxu1 %v3231_v37 }
 0x19c   :  { %3234 = vmatprep.subr.bf16.mxu1 %v3233_v27  ;;  %v3311_v27 = vpack.c.bf16 %v896_v32, %v894_v31  ;;  %v1025_v32 = vld [vmem:[#allocation10 + $0xc8] sm:$0xff] }
 0x19f   :  { %3236 = vmatpush1.bf16.msra.mxu1 %v3235_v44  ;;  %v3315_v44 = vpack.c.bf16 %v900_v43, %v898_v41  ;;  %v1042_v43 = vld [vmem:[#allocation10 + $0x1f0] sm:$0xff] }
 0x1a0   :  { %3238 = vmatprep.subr.bf16.mxu1 %v3237_v46  ;;  %v905_v46 = vld [vmem:[#allocation11 + $0x238] sm:$0xff] }
 0x1a1   :  { %v3317_v33 = vpack.c.bf16 %v905_v46, %v903_v45  ;;  %v1041_v46 = vld [vmem:[#allocation10 + $0x1e8] sm:$0xff] }
 0x1a3   :  { %3240 = vmatpush1.bf16.msra.mxu1 %v3239_v49  ;;  %v904_v49 = vld [vmem:[#allocation11 + $0x230] sm:$0xff] }
 0x1a4   :  { %v3319_v50 = vpack.c.bf16 %v904_v49, %v902_v48  ;;  %v1050_v48 = vld [vmem:[#allocation10 + $0x280] sm:$0xff]  ;;  %v1054_v49 = vld [vmem:[#allocation10 + $0x2c8] sm:$0xff] }
 0x1a6   :  { %711 = vmatmul.mubr.f32.vlgmr.msra.gmra.mrb[4].mxu1 %v423_v54  ;;  %v906_v54 = vld [vmem:[#allocation11 + $0x280] sm:$0xff] }
 0x1a7   :  { %716 = vmatprep.mubr.f32.mxu1 %v428_v53  ;;  %v3321_v53 = vpack.c.bf16 %v909_v52, %v907_v51  ;;  %v3417_v51 = vpack.c.bf16 %v1054_v49, %v1050_v48  ;;  %v1049_v52 = vld [vmem:[#allocation10 + $0x278] sm:$0xff]  ;;  %v1117_v48 = vld [vmem:[#allocation10 + $0x740] sm:$0xff]  ;;  %v1122_v49 = vld [vmem:[#allocation10 + $0x790] sm:$0xff] }
 0x1aa   :  { %717 = vmatmul.mubr.f32.gmra.mrb[6].mxu1 %v427_v55  ;;  %v908_v55 = vld [vmem:[#allocation11 + $0x2d0] sm:$0xff] }
 0x1ab   :  { %v3323_v56 = vpack.c.bf16 %v908_v55, %v906_v54  ;;  %v1058_v54 = vld [vmem:[#allocation10 + $0x310] sm:$0xff]  ;;  %v1062_v55 = vld [vmem:[#allocation10 + $0x358] sm:$0xff] }
 0x1ac   :  { %v3421_v57 = vpack.c.bf16 %v1062_v55, %v1058_v54  ;;  %v1125_v54 = vld [vmem:[#allocation10 + $0x7d0] sm:$0xff]  ;;  %v1130_v55 = vld [vmem:[#allocation10 + $0x820] sm:$0xff] }
 0x279   :  { %v712_v9 = vpop.f32.mrb[4].mxu1 }
 0x27a   :  { %v4009_v10 = vadd.f32 %v712_v9, %v562_v7  ;;  %v714_v13 = vpop.f32.mrb[5].mxu1 }
 0x27b   :  { %v4010_v16 = vadd.f32 %v714_v13, %v566_v8  ;;  %v920_v13 = vld [vmem:[#allocation11 + $0x4b0] sm:$0xff] }
 0x27c   :  { %v723_v25 = vmax.f32 %v4009_v10, 0.0  ;;  %v918_v10 = vld [vmem:[#allocation11 + $0x460] sm:$0xff] }
 0x27d   :  { %v724_v20 = vmax.f32 %v4010_v16, 0.0  ;;  %v718_v23 = vpop.f32.mrb[6].mxu1  ;;  %v3335_v14 = vpack.c.bf16 %v920_v13, %v918_v10  ;;  %v1022_v16 = vld [vmem:[#allocation10 + $0x88] sm:$0xff]  ;;  %v1082_v10 = vld [vmem:[#allocation10 + $0x4c0] sm:$0xff] }
 0x27e   :  { %v4011_v26 = vadd.f32 %v718_v23, %v562_v7  ;;  %v720_v28 = vpop.f32.mrb[7].mxu1  ;;  %v919_v7 = vld [vmem:[#allocation11 + $0x468] sm:$0xff]  ;;  %v3401_v19 = vpack.c.bf16 %v1022_v16, %v1018_v15  ;;  %v1017_v23 = vld [vmem:[#allocation10 + $0x38] sm:$0xff] }
 0x27f   :  { %v4012_v34 = vadd.f32 %v720_v28, %v566_v8  ;;  %867 = vmatprep.mubr.f32.mxu0 %v724_v20  ;;  %v921_v8 = vld [vmem:[#allocation11 + $0x4b8] sm:$0xff]  ;;  %v1026_v28 = vld [vmem:[#allocation10 + $0xd0] sm:$0xff]  ;;  %v1086_v13 = vld [vmem:[#allocation10 + $0x508] sm:$0xff] }
 0x280   :  { %868 = vmatmul.mubr.f32.vlgmr.msra.gmra.mrb[8].mxu0 %v723_v25  ;;  %v725_v39 = vmax.f32 %v4011_v26, 0.0  ;;  %v3333_v9 = vpack.c.bf16 %v921_v8, %v919_v7  ;;  %v1020_v20 = vld [vmem:[#allocation10 + $0x78] sm:$0xff]  ;;  %3402 = vmatprep.subr.bf16.mxu1 %v3401_v19  ;;  %v3429_v7 = vpack.c.bf16 %v1078_v63, %v1074_v62  ;;  %v1073_v8 = vld [vmem:[#allocation10 + $0x428] sm:$0xff]  ;;  %v3433_v15 = vpack.c.bf16 %v1086_v13, %v1082_v10  ;;  %v1090_v19 = vld [vmem:[#allocation10 + $0x550] sm:$0xff] }
 0x281   :  { %v726_v37 = vmax.f32 %v4012_v34, 0.0  ;;  %3308 = vmatpush1.bf16.msra.mxu0 %v3307_v24  ;;  %v1021_v24 = vld [vmem:[#allocation10 + $0x80] sm:$0xff]  ;;  %v3337_v25 = vpack.c.bf16 %v1020_v20, %v1016_v17  ;;  %v1029_v34 = vld [vmem:[#allocation10 + $0x110] sm:$0xff]  ;;  %v1081_v16 = vld [vmem:[#allocation10 + $0x4b8] sm:$0xff] }
 0x282   :  { %3310 = vmatprep.subr.bf16.mxu0 %v3309_v30  ;;  %v3403_v26 = vpack.c.bf16 %v1021_v24, %v1017_v23  ;;  %v1030_v30 = vld [vmem:[#allocation10 + $0x118] sm:$0xff]  ;;  %v3407_v35 = vpack.c.bf16 %v1029_v34, %v1025_v32  ;;  %v1085_v17 = vld [vmem:[#allocation10 + $0x500] sm:$0xff] }
 0x283   :  { %873 = vmatprep.mubr.f32.mxu0 %v726_v37  ;;  %v3405_v31 = vpack.c.bf16 %v1030_v30, %v1026_v28  ;;  %v1038_v37 = vld [vmem:[#allocation10 + $0x1a8] sm:$0xff]  ;;  %v1094_v20 = vld [vmem:[#allocation10 + $0x598] sm:$0xff]  ;;  %v3435_v23 = vpack.c.bf16 %v1085_v17, %v1081_v16  ;;  %v1098_v28 = vld [vmem:[#allocation10 + $0x5e0] sm:$0xff] }
 0x284   :  { %874 = vmatmul.mubr.f32.gmra.mrb[10].mxu0 %v725_v39  ;;  %3404 = vmatpush1.bf16.msra.mxu1 %v3403_v26  ;;  %v1033_v39 = vld [vmem:[#allocation10 + $0x158] sm:$0xff]  ;;  %v3437_v24 = vpack.c.bf16 %v1094_v20, %v1090_v19  ;;  %v1093_v26 = vld [vmem:[#allocation10 + $0x590] sm:$0xff]  ;;  %v1102_v30 = vld [vmem:[#allocation10 + $0x628] sm:$0xff] }
 0x285   :  { %3312 = vmatpush1.bf16.msra.mxu0 %v3311_v27  ;;  %998 = vmatprep.mubr.f32.mxu0 %v4295_v0  ;;  %v3409_v27 = vpack.c.bf16 %v1038_v37, %v1034_v36  ;;  %v3441_v32 = vpack.c.bf16 %v1102_v30, %v1098_v28  ;;  %v1097_v34 = vld [vmem:[#allocation10 + $0x5d8] sm:$0xff]  ;;  %v1106_v36 = vld [vmem:[#allocation10 + $0x670] sm:$0xff]  ;;  %v1024_v30 = vld [vmem:[#allocation10 + $0xc0] sm:$0xff] }
 0x286   :  { %3314 = vmatprep.subr.bf16.mxu0 %v3313_v40  ;;  %3406 = vmatprep.subr.bf16.mxu1 %v3405_v31  ;;  %v1037_v40 = vld [vmem:[#allocation10 + $0x1a0] sm:$0xff]  ;;  %v1110_v37 = vld [vmem:[#allocation10 + $0x6b8] sm:$0xff] }
 0x287   :  { %v3411_v41 = vpack.c.bf16 %v1037_v40, %v1033_v39  ;;  %v3445_v39 = vpack.c.bf16 %v1110_v37, %v1106_v36  ;;  %v1105_v40 = vld [vmem:[#allocation10 + $0x668] sm:$0xff]  ;;  %v1023_v37 = vld [vmem:[#allocation10 + $0xb8] sm:$0xff] }
 0x288   :  { %3408 = vmatpush1.bf16.msra.mxu1 %v3407_v35  ;;  %v1101_v35 = vld [vmem:[#allocation10 + $0x620] sm:$0xff] }
 0x289   :  { %3316 = vmatpush1.bf16.msra.mxu0 %v3315_v44  ;;  %v1046_v44 = vld [vmem:[#allocation10 + $0x238] sm:$0xff]  ;;  %3410 = vmatprep.subr.bf16.mxu1 %v3409_v27  ;;  %v3443_v27 = vpack.c.bf16 %v1101_v35, %v1097_v34 }
 0x28a   :  { %3318 = vmatprep.subr.bf16.mxu0 %v3317_v33  ;;  %v3413_v45 = vpack.c.bf16 %v1046_v44, %v1042_v43  ;;  %v1045_v33 = vld [vmem:[#allocation10 + $0x230] sm:$0xff]  ;;  %v1114_v43 = vld [vmem:[#allocation10 + $0x700] sm:$0xff]  ;;  %v1118_v44 = vld [vmem:[#allocation10 + $0x748] sm:$0xff] }
 0x28b   :  { %v126_v34 = vld [vmem:[#allocation5 + $0x8] sm:$0xff] }
 0x28c   :  { %3412 = vmatpush1.bf16.msra.mxu1 %v3411_v41  ;;  %v1109_v41 = vld [vmem:[#allocation10 + $0x6b0] sm:$0xff] }
 0x28d   :  { %3320 = vmatpush1.bf16.msra.mxu0 %v3319_v50  ;;  %v3415_v50 = vpack.c.bf16 %v1045_v33, %v1041_v46  ;;  %3414 = vmatprep.subr.bf16.mxu1 %v3413_v45  ;;  %v3447_v45 = vpack.c.bf16 %v1109_v41, %v1105_v40  ;;  %v3449_v46 = vpack.c.bf16 %v1118_v44, %v1114_v43  ;;  %v1113_v33 = vld [vmem:[#allocation10 + $0x6f8] sm:$0xff]  ;;  %v1032_v40 = vld [vmem:[#allocation10 + $0x150] sm:$0xff] }
 0x28e   :  { %3322 = vmatprep.subr.bf16.mxu0 %v3321_v53  ;;  %v1053_v53 = vld [vmem:[#allocation10 + $0x2c0] sm:$0xff]  ;;  %v1036_v41 = vld [vmem:[#allocation10 + $0x198] sm:$0xff] }
 0x290   :  { %3416 = vmatpush1.bf16.msra.mxu1 %v3415_v50  ;;  %v1126_v50 = vld [vmem:[#allocation10 + $0x7d8] sm:$0xff] }
 0x291   :  { %3324 = vmatpush1.bf16.msra.mxu0 %v3323_v56  ;;  %v3419_v56 = vpack.c.bf16 %v1053_v53, %v1049_v52  ;;  %3418 = vmatprep.subr.bf16.mxu1 %v3417_v51  ;;  %v3451_v51 = vpack.c.bf16 %v1117_v48, %v1113_v33  ;;  %v3453_v52 = vpack.c.bf16 %v1126_v50, %v1122_v49  ;;  %v1121_v53 = vld [vmem:[#allocation10 + $0x788] sm:$0xff]  ;;  %v1035_v48 = vld [vmem:[#allocation10 + $0x190] sm:$0xff]  ;;  %v1040_v49 = vld [vmem:[#allocation10 + $0x1e0] sm:$0xff] }
 0x292   :  { %3326 = vmatprep.subr.bf16.mxu0 %v3325_v59  ;;  %v1061_v59 = vld [vmem:[#allocation10 + $0x350] sm:$0xff]  ;;  %v1031_v33 = vld [vmem:[#allocation10 + $0x148] sm:$0xff] }
 0x293   :  { %v1044_v50 = vld [vmem:[#allocation10 + $0x228] sm:$0xff] }
 0x294   :  { %3420 = vmatpush1.bf16.msra.mxu1 %v3419_v56  ;;  %v1134_v56 = vld [vmem:[#allocation10 + $0x868] sm:$0xff] }
 0x295   :  { %3328 = vmatpush1.bf16.msra.mxu0 %v3327_v42  ;;  %v3423_v42 = vpack.c.bf16 %v1061_v59, %v1057_v58  ;;  %3422 = vmatprep.subr.bf16.mxu1 %v3421_v57  ;;  %v3455_v57 = vpack.c.bf16 %v1125_v54, %v1121_v53  ;;  %v3457_v58 = vpack.c.bf16 %v1134_v56, %v1130_v55  ;;  %v1129_v59 = vld [vmem:[#allocation10 + $0x818] sm:$0xff]  ;;  %v1043_v54 = vld [vmem:[#allocation10 + $0x220] sm:$0xff]  ;;  %v1048_v55 = vld [vmem:[#allocation10 + $0x270] sm:$0xff] }
 0x296   :  { %3330 = vmatprep.subr.bf16.mxu0 %v3329_v6  ;;  %v1069_v6 = vld [vmem:[#allocation10 + $0x3e0] sm:$0xff]  ;;  %v3459_v61 = vpack.c.bf16 %v1133_v60, %v1129_v59  ;;  %v1039_v53 = vld [vmem:[#allocation10 + $0x1d8] sm:$0xff]  ;;  %v1047_v59 = vld [vmem:[#allocation10 + $0x268] sm:$0xff] }
 0x297   :  { %v1052_v56 = vld [vmem:[#allocation10 + $0x2b8] sm:$0xff]  ;;  %v1051_v60 = vld [vmem:[#allocation10 + $0x2b0] sm:$0xff] }
 0x298   :  { %3424 = vmatpush1.bf16.msra.mxu1 %v3423_v42  ;;  %v171_v42 = vsub.s32 4, %v4464_v11 }
 0x299   :  { %3332 = vmatpush1.bf16.msra.mxu0 %v3331_v5  ;;  %v3427_v5 = vpack.c.bf16 %v1069_v6, %v1065_v47  ;;  %3426 = vmatprep.subr.bf16.mxu1 %v3425_v12  ;;  %v791_v12 = vld [vmem:[#allocation13 + $0xd] sm:$0x3] }
 0x29a   :  { %3334 = vmatprep.subr.bf16.mxu0 %v3333_v9  ;;  %v1077_v9 = vld [vmem:[#allocation10 + $0x470] sm:$0xff]  ;;  %v172_v47 = vrot.slane %v4469_v21, %v171_v42  ;;  %v796_v6 = vrot.slane %v791_v12, %v4467_v18  ;;  %v800_v62 = vrot.slane %v791_v12, %v4472_v22  ;;  %v1060_v42 = vld [vmem:[#allocation10 + $0x348] sm:$0xff]  ;;  %v3355_v12 = vpack.c.bf16 %v1051_v60, %v1047_v59  ;;  %v1119_v59 = vld [vmem:[#allocation10 + $0x778] sm:$0xff] }
 0x29b   :  { %v1123_v60 = vld [vmem:[#allocation10 + $0x7c0] sm:$0xff] }
 0x29c   :  { %3428 = vmatpush1.bf16.msra.mxu1 %v3427_v5  ;;  %v411_v5 = vadd.f32 %v4501_v1, %v172_v47  ;;  %v125_v1 = vld [vmem:[#allocation5] sm:$0xff] }
 0x29d   :  { %3336 = vmatpush1.bf16.msra.mxu0 %v3335_v14  ;;  %v3431_v14 = vpack.c.bf16 %v1077_v9, %v1073_v8  ;;  %3430 = vmatprep.subr.bf16.mxu1 %v3429_v7 }
 0x29e   :  { %3338 = vmatprep.subr.bf16.mxu0 %v3337_v25  ;;  %v1089_v25 = vld [vmem:[#allocation10 + $0x548] sm:$0xff] }
 0x29f   :  { %v3439_v31 = vpack.c.bf16 %v1093_v26, %v1089_v25  ;;  %v1015_v25 = vld [vmem:[#allocation10 + $0x28] sm:$0xff]  ;;  %v1019_v26 = vld [vmem:[#allocation10 + $0x70] sm:$0xff] }
 0x2a0   :  { %3432 = vmatpush1.bf16.msra.mxu1 %v3431_v14  ;;  %v3339_v35 = vpack.c.bf16 %v1019_v26, %v1015_v25  ;;  %v1079_v26 = vld [vmem:[#allocation10 + $0x4a8] sm:$0xff] }
 0x2a1   :  { %3434 = vmatprep.subr.bf16.mxu1 %v3433_v15  ;;  %v417_v15 = vadd.f32 %v4505_v3, %v172_v47 }
 0x2a4   :  { %3436 = vmatpush1.bf16.msra.mxu1 %v3435_v23 }
 0x2a5   :  { %3438 = vmatprep.subr.bf16.mxu1 %v3437_v24 }
 0x2a8   :  { %3440 = vmatpush1.bf16.msra.mxu1 %v3439_v31  ;;  %v1028_v31 = vld [vmem:[#allocation10 + $0x108] sm:$0xff] }
 0x2a9   :  { %3442 = vmatprep.subr.bf16.mxu1 %v3441_v32  ;;  %v3341_v36 = vpack.c.bf16 %v1028_v31, %v1024_v30  ;;  %v1088_v30 = vld [vmem:[#allocation10 + $0x540] sm:$0xff]  ;;  %v1092_v31 = vld [vmem:[#allocation10 + $0x588] sm:$0xff] }
 0x2ac   :  { %3444 = vmatpush1.bf16.msra.mxu1 %v3443_v27  ;;  %v1027_v27 = vld [vmem:[#allocation10 + $0x100] sm:$0xff] }
 0x2ad   :  { %3446 = vmatprep.subr.bf16.mxu1 %v3445_v39  ;;  %v3343_v44 = vpack.c.bf16 %v1027_v27, %v1023_v37  ;;  %v1100_v37 = vld [vmem:[#allocation10 + $0x618] sm:$0xff] }
 0x2b0   :  { %3448 = vmatpush1.bf16.msra.mxu1 %v3447_v45 }
 0x2b1   :  { %3450 = vmatprep.subr.bf16.mxu1 %v3449_v46  ;;  %v3345_v46 = vpack.c.bf16 %v1036_v41, %v1032_v40  ;;  %v1095_v40 = vld [vmem:[#allocation10 + $0x5c8] sm:$0xff]  ;;  %v1099_v41 = vld [vmem:[#allocation10 + $0x610] sm:$0xff] }
 0x2b4   :  { %3452 = vmatpush1.bf16.msra.mxu1 %v3451_v51  ;;  %v3347_v51 = vpack.c.bf16 %v1035_v48, %v1031_v33  ;;  %v1103_v33 = vld [vmem:[#allocation10 + $0x658] sm:$0xff]  ;;  %v1107_v48 = vld [vmem:[#allocation10 + $0x6a0] sm:$0xff] }
 0x2b5   :  { %3454 = vmatprep.subr.bf16.mxu1 %v3453_v52  ;;  %v3349_v52 = vpack.c.bf16 %v1044_v50, %v1040_v49  ;;  %v1112_v49 = vld [vmem:[#allocation10 + $0x6f0] sm:$0xff]  ;;  %v1116_v50 = vld [vmem:[#allocation10 + $0x738] sm:$0xff] }
 0x2b8   :  { %3456 = vmatpush1.bf16.msra.mxu1 %v3455_v57  ;;  %v3351_v57 = vpack.c.bf16 %v1043_v54, %v1039_v53  ;;  %v1111_v53 = vld [vmem:[#allocation10 + $0x6e8] sm:$0xff]  ;;  %v1115_v54 = vld [vmem:[#allocation10 + $0x730] sm:$0xff] }
 0x2b9   :  { %3458 = vmatprep.subr.bf16.mxu1 %v3457_v58  ;;  %v3353_v58 = vpack.c.bf16 %v1052_v56, %v1048_v55  ;;  %v1120_v55 = vld [vmem:[#allocation10 + $0x780] sm:$0xff]  ;;  %v1124_v56 = vld [vmem:[#allocation10 + $0x7c8] sm:$0xff] }
 0x2bc   :  { %3460 = vmatpush1.bf16.msra.mxu1 %v3459_v61  ;;  %v1056_v61 = vld [vmem:[#allocation10 + $0x300] sm:$0xff] }
 0x2bd   :  { %v3357_v47 = vpack.c.bf16 %v1060_v42, %v1056_v61  ;;  %v1128_v61 = vld [vmem:[#allocation10 + $0x810] sm:$0xff]  ;;  %v1132_v42 = vld [vmem:[#allocation10 + $0x858] sm:$0xff] }
 0x353   :  { %v869_v63 = vpop.f32.mrb[8].mxu0 }
 0x354   :  { %v870_v7 = vadd.f32 %v869_v63, %v796_v6  ;;  %v871_v8 = vpop.f32.mrb[9].mxu0  ;;  %v1064_v63 = vld [vmem:[#allocation10 + $0x390] sm:$0xff] }
 0x355   :  { %v872_v9 = vadd.f32 %v871_v8, %v800_v62 }
 0x356   :  { %v4517_v10 = vsub.f32 %v411_v5, %v870_v7  ;;  %v1068_v5 = vld [vmem:[#allocation10 + $0x3d8] sm:$0xff] }
 0x357   :  { %v880_v13 = vmul.f32 0.5, %v872_v9  ;;  %v875_v14 = vpop.f32.mrb[10].mxu0  ;;  %v3361_v8 = vpack.c.bf16 %v1068_v5, %v1064_v63  ;;  %v1063_v9 = vld [vmem:[#allocation10 + $0x388] sm:$0xff]  ;;  %v1138_v5 = vld [vmem:[#allocation10 + $0x8b0] sm:$0xff] }
 0x358   :  { %v876_v16 = vadd.f32 %v875_v14, %v796_v6  ;;  %v877_v17 = vpop.f32.mrb[11].mxu0  ;;  %v1055_v6 = vld [vmem:[#allocation10 + $0x2f8] sm:$0xff]  ;;  %v1072_v14 = vld [vmem:[#allocation10 + $0x420] sm:$0xff] }
 0x359   :  { %v882_v19 = vmul.f32 1.442695, %v880_v13  ;;  %v878_v21 = vadd.f32 %v877_v17, %v800_v62  ;;  %v1059_v62 = vld [vmem:[#allocation10 + $0x340] sm:$0xff]  ;;  %v1067_v13 = vld [vmem:[#allocation10 + $0x3d0] sm:$0xff] }
 0x35a   :  { %v4520_v20 = vsub.f32 %v417_v15, %v876_v16  ;;  %v1076_v15 = vld [vmem:[#allocation10 + $0x468] sm:$0xff] }
 0x35b   :  { %4055 = vpow2.f32 %v882_v19  ;;  %v881_v23 = vmul.f32 0.5, %v878_v21  ;;  %v3365_v17 = vpack.c.bf16 %v1076_v15, %v1072_v14  ;;  %v1071_v19 = vld [vmem:[#allocation10 + $0x418] sm:$0xff]  ;;  %v1075_v21 = vld [vmem:[#allocation10 + $0x460] sm:$0xff]  ;;  %v1137_v14 = vld [vmem:[#allocation10 + $0x8a8] sm:$0xff] }
 0x35d   :  { %v884_v24 = vmul.f32 1.442695, %v881_v23  ;;  %v1080_v23 = vld [vmem:[#allocation10 + $0x4b0] sm:$0xff] }
 0x35f   :  { %4057 = vpow2.f32 %v884_v24  ;;  %v1084_v24 = vld [vmem:[#allocation10 + $0x4f8] sm:$0xff] }
 0x360   :  { %v3369_v25 = vpack.c.bf16 %v1084_v24, %v1080_v23  ;;  %v1567_v24 = vld [vmem:[#allocation11 + $0x28] sm:$0xff] }
 0x365   :  { %v4056_v28 = vpop.eup %4055 }
 0x366   :  { %v886_v32 = vmul.f32 %v4056_v28, %v125_v1  ;;  %v3367_v1 = vpack.c.bf16 %v1075_v21, %v1071_v19  ;;  %v1083_v28 = vld [vmem:[#allocation10 + $0x4f0] sm:$0xff]  ;;  %v1139_v19 = vld [vmem:[#allocation10 + $0x8e0] sm:$0xff] }
 0x368   :  { %v888_v3 = vadd.f32 %v886_v32, %v870_v7  ;;  %v3359_v7 = vpack.c.bf16 %v1059_v62, %v1055_v6  ;;  %v3371_v32 = vpack.c.bf16 %v1083_v28, %v1079_v26  ;;  %v1127_v6 = vld [vmem:[#allocation10 + $0x808] sm:$0xff]  ;;  %v1131_v62 = vld [vmem:[#allocation10 + $0x850] sm:$0xff] }
 0x369   :  { %v4058_v39 = vpop.eup %4057  ;;  %v3395_v63 = vpack.c.bf16 %v1131_v62, %v1127_v6  ;;  %v1343_v26 = vld [vmem:[#allocation8 + $0x3b0] sm:$0xff]  ;;  %v1344_v28 = vld [vmem:[#allocation8 + $0x3e8] sm:$0xff] }
 0x36a   :  { %999 = vmatmul.mubr.f32.vlgmr.msra.gmra.mrb[12].mxu0 %v888_v3  ;;  %v887_v43 = vmul.f32 %v4058_v39, %v126_v34  ;;  %v3373_v34 = vpack.c.bf16 %v1092_v31, %v1088_v30  ;;  %v1091_v3 = vld [vmem:[#allocation10 + $0x580] sm:$0xff]  ;;  %v3465_v30 = vpack.c.bf16 %v1344_v28, %v1343_v26  ;;  %v922_v31 = vld [vmem:[#allocation13 + $0x16] sm:$0x3]  ;;  %v1599_v26 = vld [vmem:[#allocation11 + $0x2a8] sm:$0xff] }
 0x36b   :  { %1004 = vmatprep.mubr.f32.mxu0 %v4295_v0  ;;  %3340 = vmatpush1.bf16.msra.mxu0 %v3339_v35  ;;  %v1087_v35 = vld [vmem:[#allocation10 + $0x538] sm:$0xff] }
 0x36c   :  { %v889_v45 = vadd.f32 %v887_v43, %v876_v16  ;;  %3342 = vmatprep.subr.bf16.mxu0 %v3341_v36  ;;  %v3363_v16 = vpack.c.bf16 %v1067_v13, %v1063_v9  ;;  %v1096_v36 = vld [vmem:[#allocation10 + $0x5d0] sm:$0xff]  ;;  %v3375_v27 = vpack.c.bf16 %v1091_v3, %v1087_v35  ;;  %v1104_v43 = vld [vmem:[#allocation10 + $0x660] sm:$0xff]  ;;  %v1140_v13 = vld [vmem:[#allocation10 + $0x8e8] sm:$0xff] }
 0x36d   :  { %v3377_v39 = vpack.c.bf16 %v1100_v37, %v1096_v36  ;;  %v1136_v9 = vld [vmem:[#allocation10 + $0x8a0] sm:$0xff]  ;;  %v1570_v36 = vld [vmem:[#allocation11 + $0x70] sm:$0xff] }
 0x36e   :  { %1005 = vmatmul.mubr.f32.gmra.mrb[14].mxu0 %v889_v45  ;;  %v3379_v45 = vpack.c.bf16 %v1099_v41, %v1095_v40  ;;  %v3397_v15 = vpack.c.bf16 %v1140_v13, %v1136_v9  ;;  %v1566_v3 = vld [vmem:[#allocation11 + $0x20] sm:$0xff]  ;;  %v1327_v40 = vld [vmem:[#allocation8 + $0x30] sm:$0xff]  ;;  %v1328_v41 = vld [vmem:[#allocation8 + $0x68] sm:$0xff] }
 0x36f   :  { %3344 = vmatpush1.bf16.msra.mxu0 %v3343_v44  ;;  %v1108_v44 = vld [vmem:[#allocation10 + $0x6a8] sm:$0xff] }
 0x370   :  { %3346 = vmatprep.subr.bf16.mxu0 %v3345_v46  ;;  %v3381_v46 = vpack.c.bf16 %v1108_v44, %v1104_v43  ;;  %v1579_v44 = vld [vmem:[#allocation11 + $0x118] sm:$0xff]  ;;  %v1591_v9 = vld [vmem:[#allocation11 + $0x208] sm:$0xff] }
 0x373   :  { %3348 = vmatpush1.bf16.msra.mxu0 %v3347_v51  ;;  %v3383_v51 = vpack.c.bf16 %v1107_v48, %v1103_v33 }
 0x374   :  { %3350 = vmatprep.subr.bf16.mxu0 %v3349_v52  ;;  %v3385_v52 = vpack.c.bf16 %v1116_v50, %v1112_v49  ;;  %v3563_v49 = vpack.c.bf16 %v1570_v36, %v1566_v3  ;;  %v3467_v50 = vpack.c.bf16 %v1328_v41, %v1327_v40  ;;  %v1352_v3 = vld [vmem:[#allocation8 + $0x5a8] sm:$0xff] }
 0x375   :  { %v1607_v40 = vld [vmem:[#allocation11 + $0x348] sm:$0xff] }
 0x377   :  { %3352 = vmatpush1.bf16.msra.mxu0 %v3351_v57  ;;  %v3387_v57 = vpack.c.bf16 %v1115_v54, %v1111_v53 }
 0x378   :  { %3354 = vmatprep.subr.bf16.mxu0 %v3353_v58  ;;  %v3389_v58 = vpack.c.bf16 %v1124_v56, %v1120_v55  ;;  %v1574_v55 = vld [vmem:[#allocation11 + $0xc0] sm:$0xff]  ;;  %v1578_v56 = vld [vmem:[#allocation11 + $0x110] sm:$0xff] }
 0x379   :  { %v3567_v62 = vpack.c.bf16 %v1578_v56, %v1574_v55  ;;  %v1619_v55 = vld [vmem:[#allocation11 + $0x438] sm:$0xff] }
 0x37b   :  { %3356 = vmatpush1.bf16.msra.mxu0 %v3355_v12  ;;  %v3391_v12 = vpack.c.bf16 %v1123_v60, %v1119_v59  ;;  %v1587_v60 = vld [vmem:[#allocation11 + $0x1b8] sm:$0xff] }
 0x37c   :  { %3358 = vmatprep.subr.bf16.mxu0 %v3357_v47  ;;  %v3393_v47 = vpack.c.bf16 %v1132_v42, %v1128_v61  ;;  %v1329_v61 = vld [vmem:[#allocation8 + $0xa0] sm:$0xff]  ;;  %v1330_v42 = vld [vmem:[#allocation8 + $0xd8] sm:$0xff] }
 0x37d   :  { %v3471_v13 = vpack.c.bf16 %v1330_v42, %v1329_v61 }
 0x37f   :  { %3360 = vmatpush1.bf16.msra.mxu0 %v3359_v7  ;;  %v1142_v7 = vld [vmem:[#allocation10 + $0x8f8] sm:$0xff] }
 0x380   :  { %3362 = vmatprep.subr.bf16.mxu0 %v3361_v8  ;;  %v3461_v8 = vpack.c.bf16 %v1142_v7, %v1138_v5  ;;  %v1582_v7 = vld [vmem:[#allocation11 + $0x160] sm:$0xff] }
 0x382   :  { %3462 = vmatprep.subr.bf16.mxu1 %v3461_v8  ;;  %v1586_v8 = vld [vmem:[#allocation11 + $0x1b0] sm:$0xff] }
 0x383   :  { %3364 = vmatpush1.bf16.msra.mxu0 %v3363_v16  ;;  %v1141_v16 = vld [vmem:[#allocation10 + $0x8f0] sm:$0xff] }
 0x384   :  { %3366 = vmatprep.subr.bf16.mxu0 %v3365_v17  ;;  %v1135_v17 = vld [vmem:[#allocation10 + $0x898] sm:$0xff]  ;;  %v3463_v21 = vpack.c.bf16 %v1141_v16, %v1137_v14  ;;  %v1331_v16 = vld [vmem:[#allocation8 + $0x110] sm:$0xff] }
 0x385   :  { %v3399_v23 = vpack.c.bf16 %v1139_v19, %v1135_v17  ;;  %v1595_v14 = vld [vmem:[#allocation11 + $0x258] sm:$0xff]  ;;  %v1332_v17 = vld [vmem:[#allocation8 + $0x148] sm:$0xff]  ;;  %v1349_v19 = vld [vmem:[#allocation8 + $0x500] sm:$0xff] }
 0x386   :  { %3464 = vmatpush1.bf16.msra.mxu1 %v3463_v21  ;;  %v1350_v21 = vld [vmem:[#allocation8 + $0x538] sm:$0xff]  ;;  %v3475_v28 = vpack.c.bf16 %v1332_v17, %v1331_v16 }
 0x387   :  { %3368 = vmatpush1.bf16.msra.mxu0 %v3367_v1  ;;  %v1571_v1 = vld [vmem:[#allocation11 + $0x78] sm:$0xff] }
 0x388   :  { %3370 = vmatprep.subr.bf16.mxu0 %v3369_v25  ;;  %v3561_v25 = vpack.c.bf16 %v1571_v1, %v1567_v24  ;;  %v3573_v24 = vpack.c.bf16 %v1595_v14, %v1591_v9  ;;  %v1590_v1 = vld [vmem:[#allocation11 + $0x200] sm:$0xff] }
 0x389   :  { %v1622_v14 = vld [vmem:[#allocation11 + $0x480] sm:$0xff] }
 0x38a   :  { %3562 = vmatprep.subr.bf16.mxu1 %v3561_v25  ;;  %v1594_v25 = vld [vmem:[#allocation11 + $0x250] sm:$0xff] }
 0x38b   :  { %3372 = vmatpush1.bf16.msra.mxu0 %v3371_v32  ;;  %v927_v32 = vrot.slane %v922_v31, %v4467_v18  ;;  %v3575_v36 = vpack.c.bf16 %v1594_v25, %v1590_v1  ;;  %v1342_v1 = vld [vmem:[#allocation8 + $0x378] sm:$0xff] }
 0x38c   :  { %3374 = vmatprep.subr.bf16.mxu0 %v3373_v34  ;;  %v931_v34 = vrot.slane %v922_v31, %v4472_v22  ;;  %v3477_v31 = vpack.c.bf16 %v1350_v21, %v1349_v19  ;;  %v1357_v19 = vld [vmem:[#allocation8 + $0x6c0] sm:$0xff]  ;;  %v1358_v21 = vld [vmem:[#allocation8 + $0x6f8] sm:$0xff] }
 0x38f   :  { %3376 = vmatpush1.bf16.msra.mxu0 %v3375_v27 }
 0x390   :  { %3378 = vmatprep.subr.bf16.mxu0 %v3377_v39  ;;  %v1575_v39 = vld [vmem:[#allocation11 + $0xc8] sm:$0xff] }
 0x391   :  { %v3565_v54 = vpack.c.bf16 %v1579_v44, %v1575_v39  ;;  %v1602_v39 = vld [vmem:[#allocation11 + $0x2f0] sm:$0xff] }
 0x393   :  { %3380 = vmatpush1.bf16.msra.mxu0 %v3379_v45  ;;  %v1345_v45 = vld [vmem:[#allocation8 + $0x420] sm:$0xff] }
 0x394   :  { %3382 = vmatprep.subr.bf16.mxu0 %v3381_v46  ;;  %v1346_v46 = vld [vmem:[#allocation8 + $0x458] sm:$0xff] }
 0x397   :  { %3384 = vmatpush1.bf16.msra.mxu0 %v3383_v51 }
 0x398   :  { %3386 = vmatprep.subr.bf16.mxu0 %v3385_v52 }
 0x39b   :  { %3388 = vmatpush1.bf16.msra.mxu0 %v3387_v57  ;;  %v1583_v57 = vld [vmem:[#allocation11 + $0x168] sm:$0xff] }
 0x39c   :  { %3390 = vmatprep.subr.bf16.mxu0 %v3389_v58  ;;  %v3469_v58 = vpack.c.bf16 %v1346_v46, %v1345_v45  ;;  %v3569_v5 = vpack.c.bf16 %v1587_v60, %v1583_v57  ;;  %v1335_v45 = vld [vmem:[#allocation8 + $0x1f0] sm:$0xff]  ;;  %v1336_v46 = vld [vmem:[#allocation8 + $0x228] sm:$0xff]  ;;  %v1337_v57 = vld [vmem:[#allocation8 + $0x260] sm:$0xff] }
 0x39d   :  { %v1356_v60 = vld [vmem:[#allocation8 + $0x688] sm:$0xff] }
 0x39f   :  { %3392 = vmatpush1.bf16.msra.mxu0 %v3391_v12  ;;  %v1347_v12 = vld [vmem:[#allocation8 + $0x490] sm:$0xff] }
 0x3a0   :  { %3394 = vmatprep.subr.bf16.mxu0 %v3393_v47  ;;  %v1348_v47 = vld [vmem:[#allocation8 + $0x4c8] sm:$0xff] }
 0x3a3   :  { %3396 = vmatpush1.bf16.msra.mxu0 %v3395_v63 }
 0x3a4   :  { %3398 = vmatprep.subr.bf16.mxu0 %v3397_v15  ;;  %v3473_v15 = vpack.c.bf16 %v1348_v47, %v1347_v12  ;;  %v1614_v12 = vld [vmem:[#allocation11 + $0x3e0] sm:$0xff]  ;;  %v1618_v47 = vld [vmem:[#allocation11 + $0x430] sm:$0xff] }
 0x3a5   :  { %v3587_v9 = vpack.c.bf16 %v1618_v47, %v1614_v12 }
 0x3a7   :  { %3400 = vmatpush1.bf16.msra.mxu0 %v3399_v23  ;;  %v3571_v23 = vpack.c.bf16 %v1586_v8, %v1582_v7  ;;  %v1339_v7 = vld [vmem:[#allocation8 + $0x2d0] sm:$0xff]  ;;  %v1340_v8 = vld [vmem:[#allocation8 + $0x308] sm:$0xff] }
 0x3a8   :  { %3466 = vmatprep.subr.bf16.mxu0 %v3465_v30  ;;  %v1603_v30 = vld [vmem:[#allocation11 + $0x2f8] sm:$0xff]  ;;  %v3491_v16 = vpack.c.bf16 %v1340_v8, %v1339_v7 }
 0x3a9   :  { %v1382_v7 = vld [vmem:[#allocation8 + $0xc38] sm:$0xff] }
 0x43d   :  { %v1000_v35 = vpop.f32.mrb[12].mxu0 }
 0x43e   :  { %v1001_v37 = vadd.f32 %v1000_v35, %v927_v32  ;;  %v1002_v27 = vpop.f32.mrb[13].mxu0  ;;  %v1351_v35 = vld [vmem:[#allocation8 + $0x570] sm:$0xff] }
 0x43f   :  { %v1003_v43 = vadd.f32 %v1002_v27, %v931_v34  ;;  %v1598_v27 = vld [vmem:[#allocation11 + $0x2a0] sm:$0xff]  ;;  %v3481_v44 = vpack.c.bf16 %v1352_v3, %v1351_v35 }
 0x440   :  { %v1011_v51 = vmax.f32 %v1001_v37, 0.0  ;;  %v3577_v37 = vpack.c.bf16 %v1603_v30, %v1599_v26  ;;  %v1375_v26 = vld [vmem:[#allocation8 + $0xab0] sm:$0xff] }
 0x441   :  { %v1012_v33 = vmax.f32 %v1003_v43, 0.0  ;;  %v1006_v48 = vpop.f32.mrb[14].mxu0  ;;  %v1611_v43 = vld [vmem:[#allocation11 + $0x398] sm:$0xff] }
 0x442   :  { %v1007_v52 = vadd.f32 %v1006_v48, %v927_v32  ;;  %v1008_v53 = vpop.f32.mrb[15].mxu0  ;;  %v1333_v32 = vld [vmem:[#allocation8 + $0x180] sm:$0xff]  ;;  %v1354_v48 = vld [vmem:[#allocation8 + $0x618] sm:$0xff] }
 0x443   :  { %v1009_v59 = vadd.f32 %v1008_v53, %v931_v34  ;;  %1229 = vmatprep.mubr.f32.mxu0 %v1012_v33  ;;  %1306 = vmatprep.mubr.f32.mxu1 %v1012_v33  ;;  %v1334_v34 = vld [vmem:[#allocation8 + $0x1b8] sm:$0xff]  ;;  %v1353_v33 = vld [vmem:[#allocation8 + $0x5e0] sm:$0xff]  ;;  %v1615_v53 = vld [vmem:[#allocation11 + $0x3e8] sm:$0xff] }
 0x444   :  { %1230 = vmatmul.mubr.f32.vlgmr.msra.gmra.mrb[16].mxu0 %v1011_v51  ;;  %1307 = vmatmul.mubr.f32.vlgmr.msra.gmra.mrb[8].mxu1 %v1011_v51  ;;  %v1013_v63 = vmax.f32 %v1007_v52, 0.0  ;;  %v3479_v41 = vpack.c.bf16 %v1334_v34, %v1333_v32  ;;  %v1606_v51 = vld [vmem:[#allocation11 + $0x340] sm:$0xff]  ;;  %v1610_v52 = vld [vmem:[#allocation11 + $0x390] sm:$0xff]  ;;  %v3485_v56 = vpack.c.bf16 %v1354_v48, %v1353_v33  ;;  %v3585_v42 = vpack.c.bf16 %v1619_v55, %v1615_v53 }
 0x445   :  { %v1014_v6 = vmax.f32 %v1009_v59, 0.0  ;;  %3564 = vmatpush1.bf16.msra.mxu1 %v3563_v49  ;;  %3468 = vmatpush3.bf16.msra.mxu0 %v3467_v50  ;;  %v3579_v49 = vpack.c.bf16 %v1602_v39, %v1598_v27  ;;  %v3581_v50 = vpack.c.bf16 %v1611_v43, %v1607_v40  ;;  %v1355_v59 = vld [vmem:[#allocation8 + $0x650] sm:$0xff]  ;;  %v3583_v61 = vpack.c.bf16 %v1610_v52, %v1606_v51  ;;  %v1360_v40 = vld [vmem:[#allocation8 + $0x768] sm:$0xff]  ;;  %v1361_v55 = vld [vmem:[#allocation8 + $0x7a0] sm:$0xff] }
 0x446   :  { %3566 = vmatprep.subr.bf16.mxu1 %v3565_v54  ;;  %3470 = vmatprep.subr.bf16.mxu0 %v3469_v58  ;;  %v3483_v54 = vpack.c.bf16 %v1336_v46, %v1335_v45  ;;  %v1338_v58 = vld [vmem:[#allocation8 + $0x298] sm:$0xff]  ;;  %v1359_v39 = vld [vmem:[#allocation8 + $0x730] sm:$0xff] }
 0x447   :  { %1235 = vmatprep.mubr.f32.mxu0 %v1014_v6  ;;  %1312 = vmatprep.mubr.f32.mxu1 %v1014_v6  ;;  %v1623_v6 = vld [vmem:[#allocation11 + $0x488] sm:$0xff]  ;;  %v1378_v45 = vld [vmem:[#allocation8 + $0xb58] sm:$0xff] }
 0x448   :  { %1236 = vmatmul.mubr.f32.gmra.mrb[18].mxu0 %v1013_v63  ;;  %1313 = vmatmul.mubr.f32.gmra.mrb[10].mxu1 %v1013_v63  ;;  %v1627_v63 = vld [vmem:[#allocation11 + $0x4d8] sm:$0xff] }
 0x449   :  { %3568 = vmatpush1.bf16.msra.mxu1 %v3567_v62  ;;  %1791 = vmatprep.mubr.f32.mxu1 %v4295_v0  ;;  %v3487_v62 = vpack.c.bf16 %v1338_v58, %v1337_v57 }
 0x44a   :  { %3570 = vmatprep.subr.bf16.mxu1 %v3569_v5  ;;  %3472 = vmatpush3.bf16.msra.mxu0 %v3471_v13  ;;  %v3489_v5 = vpack.c.bf16 %v1356_v60, %v1355_v59  ;;  %v3589_v13 = vpack.c.bf16 %v1627_v63, %v1623_v6  ;;  %v1379_v59 = vld [vmem:[#allocation8 + $0xb90] sm:$0xff]  ;;  %v1380_v60 = vld [vmem:[#allocation8 + $0xbc8] sm:$0xff] }
 0x44b   :  { %3474 = vmatprep.subr.bf16.mxu0 %v3473_v15  ;;  %v1626_v15 = vld [vmem:[#allocation11 + $0x4d0] sm:$0xff]  ;;  %v3505_v47 = vpack.c.bf16 %v1380_v60, %v1379_v59  ;;  %v1573_v59 = vld [vmem:[#allocation11 + $0xb8] sm:$0xff]  ;;  %v1577_v60 = vld [vmem:[#allocation11 + $0x108] sm:$0xff] }
 0x44c   :  { %v3591_v17 = vpack.c.bf16 %v1626_v15, %v1622_v14  ;;  %v1363_v6 = vld [vmem:[#allocation8 + $0x810] sm:$0xff]  ;;  %v1366_v14 = vld [vmem:[#allocation8 + $0x8b8] sm:$0xff] }
 0x44d   :  { %3572 = vmatpush1.bf16.msra.mxu1 %v3571_v23  ;;  %v3493_v23 = vpack.c.bf16 %v1358_v21, %v1357_v19  ;;  %v1383_v15 = vld [vmem:[#allocation8 + $0xc70] sm:$0xff] }
 0x44e   :  { %3574 = vmatprep.subr.bf16.mxu1 %v3573_v24  ;;  %3476 = vmatpush3.bf16.msra.mxu0 %v3475_v28  ;;  %v1341_v24 = vld [vmem:[#allocation8 + $0x340] sm:$0xff]  ;;  %v1376_v28 = vld [vmem:[#allocation8 + $0xae8] sm:$0xff]  ;;  %v1367_v21 = vld [vmem:[#allocation8 + $0x8f0] sm:$0xff] }
 0x44f   :  { %3478 = vmatprep.subr.bf16.mxu0 %v3477_v31  ;;  %v3495_v25 = vpack.c.bf16 %v1342_v1, %v1341_v24  ;;  %v3497_v30 = vpack.c.bf16 %v1376_v28, %v1375_v26  ;;  %v4529_v31 = vld [vmem:[#allocation13 + $0x12] sm:$0xf]  ;;  %v1385_v24 = vld [vmem:[#allocation8 + $0xce0] sm:$0xff]  ;;  %v1386_v1 = vld [vmem:[#allocation8 + $0xd18] sm:$0xff] }
 0x450   :  { %v1148_v32 = vrot.slane %v4529_v31, %v4467_v18  ;;  %v1152_v34 = vrot.slane %v4529_v31, %v4472_v22  ;;  %v4539_v43 = vrot.slane %v4529_v31, %v4477_v29  ;;  %v3517_v26 = vpack.c.bf16 %v1386_v1, %v1385_v24  ;;  %v1369_v28 = vld [vmem:[#allocation8 + $0x960] sm:$0xff]  ;;  %v1601_v24 = vld [vmem:[#allocation11 + $0x2e8] sm:$0xff] }
 0x451   :  { %3576 = vmatpush1.bf16.msra.mxu1 %v3575_v36 }
 0x452   :  { %3578 = vmatprep.subr.bf16.mxu1 %v3577_v37  ;;  %3480 = vmatpush3.bf16.msra.mxu0 %v3479_v41 }
 0x453   :  { %3482 = vmatprep.subr.bf16.mxu0 %v3481_v44  ;;  %v1377_v44 = vld [vmem:[#allocation8 + $0xb20] sm:$0xff] }
 0x455   :  { %3580 = vmatpush1.bf16.msra.mxu1 %v3579_v49  ;;  %v3499_v49 = vpack.c.bf16 %v1360_v40, %v1359_v39  ;;  %v1389_v39 = vld [vmem:[#allocation8 + $0xdc0] sm:$0xff]  ;;  %v1390_v40 = vld [vmem:[#allocation8 + $0xdf8] sm:$0xff] }
 0x456   :  { %3582 = vmatprep.subr.bf16.mxu1 %v3581_v50  ;;  %3484 = vmatpush3.bf16.msra.mxu0 %v3483_v54  ;;  %v3501_v54 = vpack.c.bf16 %v1378_v45, %v1377_v44  ;;  %v1156_v44 = vrot.slane %v4529_v31, %v4493_v38  ;;  %v3525_v45 = vpack.c.bf16 %v1390_v40, %v1389_v39  ;;  %v1617_v39 = vld [vmem:[#allocation11 + $0x428] sm:$0xff] }
 0x457   :  { %3486 = vmatprep.subr.bf16.mxu0 %v3485_v56  ;;  %v1362_v56 = vld [vmem:[#allocation8 + $0x7d8] sm:$0xff] }
 0x459   :  { %3584 = vmatpush1.bf16.msra.mxu1 %v3583_v61 }
 0x45a   :  { %3586 = vmatprep.subr.bf16.mxu1 %v3585_v42  ;;  %3488 = vmatpush3.bf16.msra.mxu0 %v3487_v62  ;;  %v3503_v42 = vpack.c.bf16 %v1362_v56, %v1361_v55  ;;  %v1364_v62 = vld [vmem:[#allocation8 + $0x848] sm:$0xff] }
 0x45b   :  { %3490 = vmatprep.subr.bf16.mxu0 %v3489_v5  ;;  %v1381_v5 = vld [vmem:[#allocation8 + $0xc00] sm:$0xff]  ;;  %v3507_v8 = vpack.c.bf16 %v1364_v62, %v1363_v6  ;;  %v1572_v62 = vld [vmem:[#allocation11 + $0xb0] sm:$0xff] }
 0x45d   :  { %3588 = vmatpush1.bf16.msra.mxu1 %v3587_v9  ;;  %v3509_v9 = vpack.c.bf16 %v1382_v7, %v1381_v5  ;;  %v1581_v7 = vld [vmem:[#allocation11 + $0x158] sm:$0xff] }
 0x45e   :  { %3590 = vmatprep.subr.bf16.mxu1 %v3589_v13  ;;  %3492 = vmatpush3.bf16.msra.mxu0 %v3491_v16  ;;  %v1365_v13 = vld [vmem:[#allocation8 + $0x880] sm:$0xff]  ;;  %v1384_v16 = vld [vmem:[#allocation8 + $0xca8] sm:$0xff] }
 0x45f   :  { %3494 = vmatprep.subr.bf16.mxu0 %v3493_v23  ;;  %v3513_v19 = vpack.c.bf16 %v1384_v16, %v1383_v15  ;;  %v1368_v23 = vld [vmem:[#allocation8 + $0x928] sm:$0xff]  ;;  %v1589_v15 = vld [vmem:[#allocation11 + $0x1f8] sm:$0xff] }
 0x461   :  { %3592 = vmatpush1.bf16.msra.mxu1 %v3591_v17  ;;  %v3511_v17 = vpack.c.bf16 %v1366_v14, %v1365_v13  ;;  %v1580_v13 = vld [vmem:[#allocation11 + $0x150] sm:$0xff]  ;;  %v1584_v14 = vld [vmem:[#allocation11 + $0x1a0] sm:$0xff] }
 0x462   :  { %3496 = vmatpush3.bf16.msra.mxu0 %v3495_v25  ;;  %v3515_v25 = vpack.c.bf16 %v1368_v23, %v1367_v21  ;;  %v3539_v16 = vpack.c.bf16 %v1584_v14, %v1580_v13  ;;  %v1592_v21 = vld [vmem:[#allocation11 + $0x240] sm:$0xff]  ;;  %v1597_v23 = vld [vmem:[#allocation11 + $0x298] sm:$0xff] }
 0x463   :  { %3498 = vmatprep.subr.bf16.mxu0 %v3497_v30  ;;  %v1370_v30 = vld [vmem:[#allocation8 + $0x998] sm:$0xff] }
 0x464   :  { %1792 = vmatmul.mubr.f32.vlgmr.msra.gmra.mrb[12].mxu1 %v4517_v10 }
 0x465   :  { %1797 = vmatprep.mubr.f32.mxu1 %v4295_v0 }
 0x468   :  { %1798 = vmatmul.mubr.f32.gmra.mrb[14].mxu1 %v4520_v20 }
 0x517   :  { %v1231_v35 = vpop.f32.mrb[16].mxu0  ;;  %v4535_v3 = vpop.f32.mrb[8].mxu1 }
 0x518   :  { %v1232_v36 = vadd.f32 %v1231_v35, %v1148_v32  ;;  %v1233_v37 = vpop.f32.mrb[17].mxu0  ;;  %v1310_v27 = vpop.f32.mrb[9].mxu1  ;;  %v3519_v35 = vpack.c.bf16 %v1370_v30, %v1369_v28  ;;  %v1600_v28 = vld [vmem:[#allocation11 + $0x2e0] sm:$0xff]  ;;  %v1605_v30 = vld [vmem:[#allocation11 + $0x338] sm:$0xff] }
 0x519   :  { %v1234_v41 = vadd.f32 %v1233_v37, %v1152_v34  ;;  %v1311_v57 = vadd.f32 %v1310_v27, %v4539_v43  ;;  %v1371_v37 = vld [vmem:[#allocation8 + $0x9d0] sm:$0xff]  ;;  %v1372_v27 = vld [vmem:[#allocation8 + $0xa08] sm:$0xff] }
 0x51a   :  { %v1319_v50 = vmax.f32 %v1232_v36, 0.0 }
 0x51b   :  { %v1320_v46 = vmax.f32 %v1234_v41, 0.0  ;;  %v1237_v33 = vpop.f32.mrb[18].mxu0  ;;  %v4541_v48 = vpop.f32.mrb[10].mxu1  ;;  %v1322_v63 = vmax.f32 %v1311_v57, 0.0  ;;  %v3523_v41 = vpack.c.bf16 %v1372_v27, %v1371_v37  ;;  %v1564_v57 = vld [vmem:[#allocation11 + $0x10] sm:$0xff]  ;;  %v1608_v37 = vld [vmem:[#allocation11 + $0x380] sm:$0xff] }
 0x51c   :  { %v1238_v51 = vadd.f32 %v1237_v33, %v1148_v32  ;;  %v1239_v52 = vpop.f32.mrb[19].mxu0  ;;  %v4543_v53 = vpop.f32.mrb[11].mxu1  ;;  %v1387_v32 = vld [vmem:[#allocation8 + $0xd50] sm:$0xff]  ;;  %v1374_v33 = vld [vmem:[#allocation8 + $0xa78] sm:$0xff] }
 0x51d   :  { %v1240_v58 = vadd.f32 %v1239_v52, %v1152_v34  ;;  %1462 = vmatprep.mubr.f32.mxu0 %v1320_v46  ;;  %v1388_v34 = vld [vmem:[#allocation8 + $0xd88] sm:$0xff]  ;;  %v1373_v46 = vld [vmem:[#allocation8 + $0xa40] sm:$0xff]  ;;  %v1317_v31 = vadd.f32 %v4543_v53, %v4539_v43  ;;  %v1613_v27 = vld [vmem:[#allocation11 + $0x3d8] sm:$0xff] }
 0x51e   :  { %1463 = vmatmul.mubr.f32.vlgmr.msra.gmra.mrb[20].mxu0 %v1319_v50  ;;  %v1323_v12 = vmax.f32 %v1238_v51, 0.0  ;;  %v3521_v36 = vpack.c.bf16 %v1388_v34, %v1387_v32  ;;  %v1569_v50 = vld [vmem:[#allocation11 + $0x68] sm:$0xff]  ;;  %v3527_v52 = vpack.c.bf16 %v1374_v33, %v1373_v46  ;;  %v1621_v46 = vld [vmem:[#allocation11 + $0x478] sm:$0xff] }
 0x51f   :  { %v1324_v61 = vmax.f32 %v1240_v58, 0.0  ;;  %3500 = vmatpush3.bf16.msra.mxu0 %v3499_v49  ;;  %v1565_v49 = vld [vmem:[#allocation11 + $0x18] sm:$0xff]  ;;  %v1568_v58 = vld [vmem:[#allocation11 + $0x60] sm:$0xff]  ;;  %v1326_v5 = vmax.f32 %v1317_v31, 0.0  ;;  %v1609_v32 = vld [vmem:[#allocation11 + $0x388] sm:$0xff] }
 0x520   :  { %3502 = vmatprep.subr.bf16.mxu0 %v3501_v54  ;;  %v1309_v54 = vadd.f32 %v4535_v3, %v1156_v44  ;;  %v3529_v56 = vpack.c.bf16 %v1569_v50, %v1565_v49  ;;  %v3533_v3 = vpack.c.bf16 %v1577_v60, %v1573_v59  ;;  %v1625_v33 = vld [vmem:[#allocation11 + $0x4c8] sm:$0xff]  ;;  %v1812_v59 = vld [vmem:[#allocation8 + $0x10] sm:$0xff] }
 0x521   :  { %1467 = vmatprep.mubr.f32.mxu0 %v1324_v61  ;;  %v3557_v50 = vpack.c.bf16 %v1625_v33, %v1621_v46  ;;  %v1814_v60 = vld [vmem:[#allocation8 + $0x48] sm:$0xff]  ;;  %v1840_v46 = vld [vmem:[#allocation8 + $0x320] sm:$0xff]  ;;  %v1842_v33 = vld [vmem:[#allocation8 + $0x358] sm:$0xff] }
 0x522   :  { %1468 = vmatmul.mubr.f32.gmra.mrb[22].mxu0 %v1323_v12  ;;  %v1321_v12 = vmax.f32 %v1309_v54, 0.0  ;;  %v1624_v54 = vld [vmem:[#allocation11 + $0x4c0] sm:$0xff] }
 0x523   :  { %3504 = vmatpush3.bf16.msra.mxu0 %v3503_v42  ;;  %1537 = vmatprep.mubr.f32.mxu0 %v1322_v63  ;;  %v3531_v42 = vpack.c.bf16 %v1568_v58, %v1564_v57  ;;  %v1576_v63 = vld [vmem:[#allocation11 + $0x100] sm:$0xff]  ;;  %v1813_v57 = vld [vmem:[#allocation8 + $0x18] sm:$0xff]  ;;  %v1815_v58 = vld [vmem:[#allocation8 + $0x50] sm:$0xff] }
 0x524   :  { %3506 = vmatprep.subr.bf16.mxu0 %v3505_v47  ;;  %v1315_v47 = vadd.f32 %v4541_v48, %v1156_v44  ;;  %v3535_v43 = vpack.c.bf16 %v1576_v63, %v1572_v62  ;;  %v1593_v48 = vld [vmem:[#allocation11 + $0x248] sm:$0xff]  ;;  %v1612_v44 = vld [vmem:[#allocation11 + $0x3d0] sm:$0xff]  ;;  %v3593_v31 = vpack.c.bf16 %v1815_v58, %v1813_v57  ;;  %v1816_v62 = vld [vmem:[#allocation8 + $0x80] sm:$0xff] }
 0x525   :  { %v1818_v63 = vld [vmem:[#allocation8 + $0xb8] sm:$0xff]  ;;  %v1846_v57 = vld [vmem:[#allocation8 + $0x3c8] sm:$0xff] }
 0x526   :  { %v1325_v53 = vmax.f32 %v1315_v47, 0.0  ;;  %v1819_v47 = vld [vmem:[#allocation8 + $0xc0] sm:$0xff] }
 0x527   :  { %3508 = vmatpush3.bf16.msra.mxu0 %v3507_v8  ;;  %v1585_v8 = vld [vmem:[#allocation11 + $0x1a8] sm:$0xff] }
 0x528   :  { %3510 = vmatprep.subr.bf16.mxu0 %v3509_v9  ;;  %v3537_v9 = vpack.c.bf16 %v1585_v8, %v1581_v7  ;;  %v3599_v7 = vpack.c.bf16 %v1818_v63, %v1816_v62  ;;  %v1820_v8 = vld [vmem:[#allocation8 + $0xf0] sm:$0xff] }
 0x529   :  { %v1855_v62 = vld [vmem:[#allocation8 + $0x4b0] sm:$0xff] }
 0x52b   :  { %3512 = vmatpush3.bf16.msra.mxu0 %v3511_v17  ;;  %v3541_v17 = vpack.c.bf16 %v1593_v48, %v1589_v15  ;;  %v1824_v15 = vld [vmem:[#allocation8 + $0x160] sm:$0xff]  ;;  %v1826_v48 = vld [vmem:[#allocation8 + $0x198] sm:$0xff] }
 0x52c   :  { %3514 = vmatprep.subr.bf16.mxu0 %v3513_v19  ;;  %v1588_v19 = vld [vmem:[#allocation11 + $0x1f0] sm:$0xff] }
 0x52d   :  { %v3543_v1 = vpack.c.bf16 %v1592_v21, %v1588_v19  ;;  %v3607_v19 = vpack.c.bf16 %v1826_v48, %v1824_v15  ;;  %v1863_v15 = vld [vmem:[#allocation8 + $0x590] sm:$0xff] }
 0x52f   :  { %3516 = vmatpush3.bf16.msra.mxu0 %v3515_v25  ;;  %v3545_v25 = vpack.c.bf16 %v1601_v24, %v1597_v23  ;;  %v1828_v23 = vld [vmem:[#allocation8 + $0x1d0] sm:$0xff]  ;;  %v1830_v24 = vld [vmem:[#allocation8 + $0x208] sm:$0xff] }
 0x530   :  { %3518 = vmatprep.subr.bf16.mxu0 %v3517_v26  ;;  %v1596_v26 = vld [vmem:[#allocation11 + $0x290] sm:$0xff] }
 0x531   :  { %v3547_v34 = vpack.c.bf16 %v1600_v28, %v1596_v26  ;;  %v3611_v26 = vpack.c.bf16 %v1830_v24, %v1828_v23  ;;  %v1867_v23 = vld [vmem:[#allocation8 + $0x600] sm:$0xff] }
 0x533   :  { %3520 = vmatpush3.bf16.msra.mxu0 %v3519_v35  ;;  %v3549_v35 = vpack.c.bf16 %v1609_v32, %v1605_v30  ;;  %v1832_v30 = vld [vmem:[#allocation8 + $0x240] sm:$0xff]  ;;  %v1834_v32 = vld [vmem:[#allocation8 + $0x278] sm:$0xff] }
 0x534   :  { %3522 = vmatprep.subr.bf16.mxu0 %v3521_v36  ;;  %v1604_v36 = vld [vmem:[#allocation11 + $0x330] sm:$0xff] }
 0x535   :  { %v3551_v40 = vpack.c.bf16 %v1608_v37, %v1604_v36  ;;  %v3615_v36 = vpack.c.bf16 %v1834_v32, %v1832_v30  ;;  %v1871_v30 = vld [vmem:[#allocation8 + $0x670] sm:$0xff] }
 0x537   :  { %3524 = vmatpush3.bf16.msra.mxu0 %v3523_v41  ;;  %v4548_v51 = vpop.f32.mrb[12].mxu1  ;;  %v3553_v41 = vpack.c.bf16 %v1617_v39, %v1613_v27  ;;  %v1836_v27 = vld [vmem:[#allocation8 + $0x2b0] sm:$0xff]  ;;  %v1838_v39 = vld [vmem:[#allocation8 + $0x2e8] sm:$0xff] }
 0x538   :  { %v4551_v55 = vpop.f32.mrb[13].mxu1  ;;  %3526 = vmatprep.subr.bf16.mxu0 %v3525_v45  ;;  %v1616_v45 = vld [vmem:[#allocation11 + $0x420] sm:$0xff] }
 0x539   :  { %v3555_v49 = vpack.c.bf16 %v1616_v45, %v1612_v44  ;;  %v1843_v44 = vld [vmem:[#allocation8 + $0x360] sm:$0xff] }
 0x53b   :  { %3528 = vmatpush3.bf16.msra.mxu0 %v3527_v52  ;;  %v4555_v61 = vpop.f32.mrb[14].mxu1  ;;  %v1620_v52 = vld [vmem:[#allocation11 + $0x470] sm:$0xff] }
 0x53c   :  { %v4558_v6 = vpop.f32.mrb[15].mxu1  ;;  %3530 = vmatprep.subr.bf16.mxu0 %v3529_v56  ;;  %v3559_v56 = vpack.c.bf16 %v1624_v54, %v1620_v52  ;;  %v1847_v52 = vld [vmem:[#allocation8 + $0x3d0] sm:$0xff] }
 0x53e   :  { %1538 = vmatmul.mubr.f32.vlgmr.msra.gmra.mrb[24].mxu0 %v1321_v12  ;;  %v1817_v12 = vld [vmem:[#allocation8 + $0x88] sm:$0xff] }
 0x53f   :  { %1542 = vmatprep.mubr.f32.mxu0 %v1326_v5  ;;  %3532 = vmatpush1.bf16.msra.mxu0 %v3531_v42  ;;  %v3595_v42 = vpack.c.bf16 %v1814_v60, %v1812_v59  ;;  %v1821_v5 = vld [vmem:[#allocation8 + $0xf8] sm:$0xff]  ;;  %v1851_v59 = vld [vmem:[#allocation8 + $0x440] sm:$0xff] }
 0x540   :  { %3534 = vmatprep.subr.bf16.mxu0 %v3533_v3  ;;  %v3597_v3 = vpack.c.bf16 %v1819_v47, %v1817_v12  ;;  %v1850_v12 = vld [vmem:[#allocation8 + $0x438] sm:$0xff] }
 0x542   :  { %1543 = vmatmul.mubr.f32.gmra.mrb[26].mxu0 %v1325_v53  ;;  %v1825_v53 = vld [vmem:[#allocation8 + $0x168] sm:$0xff] }
 0x543   :  { %3536 = vmatpush1.bf16.msra.mxu0 %v3535_v43  ;;  %1714 = vmatprep.mubr.f32.mxu0 %v4295_v0  ;;  %v1822_v43 = vld [vmem:[#allocation8 + $0x128] sm:$0xff] }
 0x544   :  { %3538 = vmatprep.subr.bf16.mxu0 %v3537_v9  ;;  %v1827_v9 = vld [vmem:[#allocation8 + $0x1a0] sm:$0xff]  ;;  %v3603_v13 = vpack.c.bf16 %v1822_v43, %v1820_v8  ;;  %v1857_v8 = vld [vmem:[#allocation8 + $0x4e8] sm:$0xff] }
 0x545   :  { %v3605_v14 = vpack.c.bf16 %v1827_v9, %v1825_v53  ;;  %v1859_v43 = vld [vmem:[#allocation8 + $0x520] sm:$0xff]  ;;  %v1858_v9 = vld [vmem:[#allocation8 + $0x518] sm:$0xff] }
 0x546   :  { %v1856_v53 = vld [vmem:[#allocation8 + $0x4e0] sm:$0xff] }
 0x547   :  { %3540 = vmatpush1.bf16.msra.mxu0 %v3539_v16  ;;  %v1829_v16 = vld [vmem:[#allocation8 + $0x1d8] sm:$0xff] }
 0x548   :  { %3542 = vmatprep.subr.bf16.mxu0 %v3541_v17  ;;  %v1831_v17 = vld [vmem:[#allocation8 + $0x210] sm:$0xff] }
 0x549   :  { %v3609_v21 = vpack.c.bf16 %v1831_v17, %v1829_v16  ;;  %v1860_v16 = vld [vmem:[#allocation8 + $0x550] sm:$0xff]  ;;  %v1862_v17 = vld [vmem:[#allocation8 + $0x588] sm:$0xff] }
 0x54b   :  { %3544 = vmatpush1.bf16.msra.mxu0 %v3543_v1  ;;  %v1833_v1 = vld [vmem:[#allocation8 + $0x248] sm:$0xff] }
 0x54c   :  { %3546 = vmatprep.subr.bf16.mxu0 %v3545_v25  ;;  %v1835_v25 = vld [vmem:[#allocation8 + $0x280] sm:$0xff] }
 0x54d   :  { %v3613_v28 = vpack.c.bf16 %v1835_v25, %v1833_v1  ;;  %v1864_v1 = vld [vmem:[#allocation8 + $0x5c0] sm:$0xff]  ;;  %v1866_v25 = vld [vmem:[#allocation8 + $0x5f8] sm:$0xff] }
 0x54f   :  { %3548 = vmatpush1.bf16.msra.mxu0 %v3547_v34  ;;  %v1837_v34 = vld [vmem:[#allocation8 + $0x2b8] sm:$0xff] }
 0x550   :  { %3550 = vmatprep.subr.bf16.mxu0 %v3549_v35  ;;  %v1839_v35 = vld [vmem:[#allocation8 + $0x2f0] sm:$0xff] }
 0x551   :  { %v3617_v37 = vpack.c.bf16 %v1839_v35, %v1837_v34  ;;  %v1868_v34 = vld [vmem:[#allocation8 + $0x630] sm:$0xff]  ;;  %v1870_v35 = vld [vmem:[#allocation8 + $0x668] sm:$0xff] }
 0x553   :  { %3552 = vmatpush1.bf16.msra.mxu0 %v3551_v40  ;;  %v3619_v40 = vpack.c.bf16 %v1838_v39, %v1836_v27  ;;  %v1875_v27 = vld [vmem:[#allocation8 + $0x6e0] sm:$0xff] }
 0x554   :  { %3554 = vmatprep.subr.bf16.mxu0 %v3553_v41  ;;  %v1841_v41 = vld [vmem:[#allocation8 + $0x328] sm:$0xff] }
 0x555   :  { %v3621_v45 = vpack.c.bf16 %v1843_v44, %v1841_v41  ;;  %v1874_v41 = vld [vmem:[#allocation8 + $0x6d8] sm:$0xff] }
 0x557   :  { %3556 = vmatpush1.bf16.msra.mxu0 %v3555_v49  ;;  %v3623_v49 = vpack.c.bf16 %v1842_v33, %v1840_v46  ;;  %v1879_v46 = vld [vmem:[#allocation8 + $0x750] sm:$0xff] }
 0x558   :  { %3558 = vmatprep.subr.bf16.mxu0 %v3557_v50  ;;  %v1845_v50 = vld [vmem:[#allocation8 + $0x398] sm:$0xff] }
 0x559   :  { %v3625_v54 = vpack.c.bf16 %v1847_v52, %v1845_v50 }
 0x55b   :  { %3560 = vmatpush1.bf16.msra.mxu0 %v3559_v56  ;;  %v1844_v56 = vld [vmem:[#allocation8 + $0x390] sm:$0xff] }
 0x55c   :  { %3594 = vmatprep.subr.bf16.mxu0 %v3593_v31  ;;  %v3627_v58 = vpack.c.bf16 %v1846_v57, %v1844_v56  ;;  %v1849_v31 = vld [vmem:[#allocation8 + $0x408] sm:$0xff] }
 0x55d   :  { %v3629_v60 = vpack.c.bf16 %v1851_v59, %v1849_v31  ;;  %v2127_v31 = vld [vmem:[#allocation10 + $0x4d8] sm:$0xff]  ;;  %v2110_v59 = vld [vmem:[#allocation10 + $0x10] sm:$0xff] }
 0x55e   :  { %1715 = vmatmul.mubr.f32.vlgmr.msra.gmra.mrb[28].mxu0 %v4517_v10  ;;  %v1823_v10 = vld [vmem:[#allocation8 + $0x130] sm:$0xff] }
 0x55f   :  { %1720 = vmatprep.mubr.f32.mxu0 %v4295_v0  ;;  %3596 = vmatpush1.bf16.msra.mxu0 %v3595_v42  ;;  %v1848_v42 = vld [vmem:[#allocation8 + $0x400] sm:$0xff] }
 0x560   :  { %3598 = vmatprep.subr.bf16.mxu0 %v3597_v3  ;;  %v3631_v47 = vpack.c.bf16 %v1850_v12, %v1848_v42  ;;  %v1853_v3 = vld [vmem:[#allocation8 + $0x478] sm:$0xff]  ;;  %v2128_v12 = vld [vmem:[#allocation10 + $0x520] sm:$0xff] }
 0x561   :  { %v3633_v63 = vpack.c.bf16 %v1855_v62, %v1853_v3  ;;  %v2111_v42 = vld [vmem:[#allocation10 + $0x58] sm:$0xff] }
 0x562   :  { %1721 = vmatmul.mubr.f32.gmra.mrb[30].mxu0 %v4520_v20  ;;  %v3601_v20 = vpack.c.bf16 %v1823_v10, %v1821_v5  ;;  %v1852_v5 = vld [vmem:[#allocation8 + $0x470] sm:$0xff]  ;;  %v3723_v3 = vpack.c.bf16 %v2111_v42, %v2110_v59 }
 0x563   :  { %3600 = vmatpush1.bf16.msra.mxu0 %v3599_v7  ;;  %v1854_v7 = vld [vmem:[#allocation8 + $0x4a8] sm:$0xff] }
 0x564   :  { %3602 = vmatprep.subr.bf16.mxu0 %v3601_v20  ;;  %v3635_v10 = vpack.c.bf16 %v1854_v7, %v1852_v5  ;;  %v3637_v20 = vpack.c.bf16 %v1859_v43, %v1857_v8  ;;  %v2113_v5 = vld [vmem:[#allocation10 + $0xe8] sm:$0xff]  ;;  %v2130_v7 = vld [vmem:[#allocation10 + $0x5b0] sm:$0xff] }
 0x567   :  { %3604 = vmatpush1.bf16.msra.mxu0 %v3603_v13  ;;  %v3639_v13 = vpack.c.bf16 %v1858_v9, %v1856_v53  ;;  %v2115_v53 = vld [vmem:[#allocation10 + $0x178] sm:$0xff]  ;;  %v2132_v9 = vld [vmem:[#allocation10 + $0x640] sm:$0xff] }
 0x568   :  { %3606 = vmatprep.subr.bf16.mxu0 %v3605_v14  ;;  %v1861_v14 = vld [vmem:[#allocation8 + $0x558] sm:$0xff] }
 0x569   :  { %v3641_v48 = vpack.c.bf16 %v1863_v15, %v1861_v14 }
 0x56b   :  { %3608 = vmatpush1.bf16.msra.mxu0 %v3607_v19  ;;  %v3643_v19 = vpack.c.bf16 %v1862_v17, %v1860_v16  ;;  %v2117_v16 = vld [vmem:[#allocation10 + $0x208] sm:$0xff]  ;;  %v2134_v17 = vld [vmem:[#allocation10 + $0x6d0] sm:$0xff] }
 0x56c   :  { %3610 = vmatprep.subr.bf16.mxu0 %v3609_v21  ;;  %v1865_v21 = vld [vmem:[#allocation8 + $0x5c8] sm:$0xff] }
 0x56d   :  { %v3645_v24 = vpack.c.bf16 %v1867_v23, %v1865_v21 }
 0x56f   :  { %3612 = vmatpush1.bf16.msra.mxu0 %v3611_v26  ;;  %v3647_v26 = vpack.c.bf16 %v1866_v25, %v1864_v1  ;;  %v2119_v1 = vld [vmem:[#allocation10 + $0x298] sm:$0xff]  ;;  %v2136_v25 = vld [vmem:[#allocation10 + $0x760] sm:$0xff] }
 0x570   :  { %3614 = vmatprep.subr.bf16.mxu0 %v3613_v28  ;;  %v1869_v28 = vld [vmem:[#allocation8 + $0x638] sm:$0xff] }
 0x571   :  { %v3649_v32 = vpack.c.bf16 %v1871_v30, %v1869_v28 }
 0x573   :  { %3616 = vmatpush1.bf16.msra.mxu0 %v3615_v36  ;;  %v3651_v36 = vpack.c.bf16 %v1870_v35, %v1868_v34  ;;  %v2121_v34 = vld [vmem:[#allocation10 + $0x328] sm:$0xff]  ;;  %v2138_v35 = vld [vmem:[#allocation10 + $0x7f0] sm:$0xff] }
 0x574   :  { %3618 = vmatprep.subr.bf16.mxu0 %v3617_v37  ;;  %v1873_v37 = vld [vmem:[#allocation8 + $0x6a8] sm:$0xff] }
 0x575   :  { %v3653_v39 = vpack.c.bf16 %v1875_v27, %v1873_v37  ;;  %v2971_v37 = vld [vmem:[#allocation13 + $0xc] ss:$0 sm:$0xff] }
 0x577   :  { %3620 = vmatpush1.bf16.msra.mxu0 %v3619_v40  ;;  %v1872_v40 = vld [vmem:[#allocation8 + $0x6a0] sm:$0xff] }
 0x578   :  { %3622 = vmatprep.subr.bf16.mxu0 %v3621_v45  ;;  %v3655_v44 = vpack.c.bf16 %v1874_v41, %v1872_v40  ;;  %v1877_v45 = vld [vmem:[#allocation8 + $0x718] sm:$0xff] }
 0x579   :  { %v3657_v33 = vpack.c.bf16 %v1879_v46, %v1877_v45 }
 0x57b   :  { %3624 = vmatpush1.bf16.msra.mxu0 %v3623_v49 }
 0x57c   :  { %3626 = vmatprep.subr.bf16.mxu0 %v3625_v54 }
 0x57f   :  { %3628 = vmatpush1.bf16.msra.mxu0 %v3627_v58  ;;  %v2126_v58 = vld [vmem:[#allocation10 + $0x490] sm:$0xff] }
 0x580   :  { %3630 = vmatprep.subr.bf16.mxu0 %v3629_v60  ;;  %v3721_v60 = vpack.c.bf16 %v2127_v31, %v2126_v58 }
 0x582   :  { %3722 = vmatprep.subr.bf16.mxu1 %v3721_v60 }
 0x583   :  { %3632 = vmatpush1.bf16.msra.mxu0 %v3631_v47  ;;  %v2129_v47 = vld [vmem:[#allocation10 + $0x568] sm:$0xff]  ;;  %3724 = vmatpush3.bf16.msra.mxu1 %v3723_v3 }
 0x584   :  { %3634 = vmatprep.subr.bf16.mxu0 %v3633_v63  ;;  %v3725_v62 = vpack.c.bf16 %v2129_v47, %v2128_v12  ;;  %v2112_v63 = vld [vmem:[#allocation10 + $0xa0] sm:$0xff] }
 0x585   :  { %v3727_v8 = vpack.c.bf16 %v2113_v5, %v2112_v63 }
 0x586   :  { %3726 = vmatprep.subr.bf16.mxu1 %v3725_v62 }
 0x587   :  { %3636 = vmatpush1.bf16.msra.mxu0 %v3635_v10  ;;  %v2131_v10 = vld [vmem:[#allocation10 + $0x5f8] sm:$0xff]  ;;  %3728 = vmatpush3.bf16.msra.mxu1 %v3727_v8 }
 0x588   :  { %3638 = vmatprep.subr.bf16.mxu0 %v3637_v20  ;;  %v3729_v43 = vpack.c.bf16 %v2131_v10, %v2130_v7  ;;  %v2114_v20 = vld [vmem:[#allocation10 + $0x130] sm:$0xff]  ;;  %v1878_v10 = vld [vmem:[#allocation8 + $0x748] sm:$0xff] }
 0x589   :  { %v3731_v14 = vpack.c.bf16 %v2115_v53, %v2114_v20  ;;  %v1876_v7 = vld [vmem:[#allocation8 + $0x710] sm:$0xff]  ;;  %v1881_v20 = vld [vmem:[#allocation8 + $0x788] sm:$0xff]  ;;  %v1883_v53 = vld [vmem:[#allocation8 + $0x7c0] sm:$0xff] }
 0x58a   :  { %3730 = vmatprep.subr.bf16.mxu1 %v3729_v43 }
 0x58b   :  { %3640 = vmatpush1.bf16.msra.mxu0 %v3639_v13  ;;  %v2133_v13 = vld [vmem:[#allocation10 + $0x688] sm:$0xff]  ;;  %3732 = vmatpush3.bf16.msra.mxu1 %v3731_v14 }
 0x58c   :  { %3642 = vmatprep.subr.bf16.mxu0 %v3641_v48  ;;  %v3733_v15 = vpack.c.bf16 %v2133_v13, %v2132_v9  ;;  %v2116_v48 = vld [vmem:[#allocation10 + $0x1c0] sm:$0xff] }
 0x58d   :  { %v3735_v21 = vpack.c.bf16 %v2117_v16, %v2116_v48 }
 0x58e   :  { %3734 = vmatprep.subr.bf16.mxu1 %v3733_v15  ;;  %v3659_v15 = vpack.c.bf16 %v1878_v10, %v1876_v7  ;;  %v1907_v7 = vld [vmem:[#allocation8 + $0xa60] sm:$0xff] }
 0x58f   :  { %3644 = vmatpush1.bf16.msra.mxu0 %v3643_v19  ;;  %v2135_v19 = vld [vmem:[#allocation10 + $0x718] sm:$0xff]  ;;  %3736 = vmatpush3.bf16.msra.mxu1 %v3735_v21  ;;  %v1880_v21 = vld [vmem:[#allocation8 + $0x780] sm:$0xff] }
 0x590   :  { %3646 = vmatprep.subr.bf16.mxu0 %v3645_v24  ;;  %v3737_v23 = vpack.c.bf16 %v2135_v19, %v2134_v17  ;;  %v2118_v24 = vld [vmem:[#allocation10 + $0x250] sm:$0xff]  ;;  %v3661_v19 = vpack.c.bf16 %v1883_v53, %v1881_v20  ;;  %v1904_v20 = vld [vmem:[#allocation8 + $0xa20] sm:$0xff]  ;;  %v1906_v53 = vld [vmem:[#allocation8 + $0xa58] sm:$0xff] }
 0x591   :  { %v3739_v28 = vpack.c.bf16 %v2119_v1, %v2118_v24 }
 0x592   :  { %3738 = vmatprep.subr.bf16.mxu1 %v3737_v23  ;;  %v1882_v23 = vld [vmem:[#allocation8 + $0x7b8] sm:$0xff] }
 0x593   :  { %3648 = vmatpush1.bf16.msra.mxu0 %v3647_v26  ;;  %v2137_v26 = vld [vmem:[#allocation10 + $0x7a8] sm:$0xff]  ;;  %3740 = vmatpush3.bf16.msra.mxu1 %v3739_v28 }
 0x594   :  { %3650 = vmatprep.subr.bf16.mxu0 %v3649_v32  ;;  %v3741_v30 = vpack.c.bf16 %v2137_v26, %v2136_v25  ;;  %v2120_v32 = vld [vmem:[#allocation10 + $0x2e0] sm:$0xff]  ;;  %v1885_v25 = vld [vmem:[#allocation8 + $0x7f8] sm:$0xff]  ;;  %v1887_v26 = vld [vmem:[#allocation8 + $0x830] sm:$0xff] }
 0x595   :  { %v3743_v27 = vpack.c.bf16 %v2121_v34, %v2120_v32  ;;  %v3665_v34 = vpack.c.bf16 %v1887_v26, %v1885_v25  ;;  %v1917_v25 = vld [vmem:[#allocation8 + $0xb78] sm:$0xff]  ;;  %v1919_v26 = vld [vmem:[#allocation8 + $0xbb0] sm:$0xff] }
 0x596   :  { %3742 = vmatprep.subr.bf16.mxu1 %v3741_v30  ;;  %v3663_v30 = vpack.c.bf16 %v1882_v23, %v1880_v21 }
 0x597   :  { %3652 = vmatpush1.bf16.msra.mxu0 %v3651_v36  ;;  %v2139_v36 = vld [vmem:[#allocation10 + $0x838] sm:$0xff]  ;;  %3744 = vmatpush3.bf16.msra.mxu1 %v3743_v27  ;;  %v1889_v27 = vld [vmem:[#allocation8 + $0x868] sm:$0xff] }
 0x598   :  { %3654 = vmatprep.subr.bf16.mxu0 %v3653_v39  ;;  %v3745_v40 = vpack.c.bf16 %v2139_v36, %v2138_v35  ;;  %v1884_v35 = vld [vmem:[#allocation8 + $0x7f0] sm:$0xff]  ;;  %v1886_v36 = vld [vmem:[#allocation8 + $0x828] sm:$0xff] }
 0x59a   :  { %3746 = vmatprep.subr.bf16.mxu1 %v3745_v40 }
 0x59b   :  { %3656 = vmatpush1.bf16.msra.mxu0 %v3655_v44 }
 0x59c   :  { %3658 = vmatprep.subr.bf16.mxu0 %v3657_v33 }
 0x5f1   :  { %v3007_v49 = vpop.f32.mrb[20].mxu0 }
 0x5f2   :  { %v3008_v50 = vpop.f32.mrb[21].mxu0 }
 0x5f3   :  { %v3009_v52 = vadd.f32 %v3008_v50, %v3007_v49 }
 0x5f5   :  { %v3010_v54 = vpop.f32.mrb[22].mxu0  ;;  %v1465_v44 = vadd.f32 %v3009_v52, %v2971_v37  ;;  %v4564_v52 = vld [vmem:[#allocation13 + $0x18] sm:$0xf] }
 0x5f6   :  { %v3011_v56 = vpop.f32.mrb[23].mxu0  ;;  %v1633_v47 = vrot.slane %v4564_v52, %v4467_v18  ;;  %v4572_v8 = vrot.slane %v4564_v52, %v4477_v29 }
 0x5f7   :  { %v3012_v57 = vadd.f32 %v3011_v56, %v3010_v54 }
 0x5f8   :  { %v1796_v24 = vadd.f32 %v4551_v55, %v4572_v8  ;;  %v3667_v55 = vpack.c.bf16 %v1886_v36, %v1884_v35  ;;  %v1921_v35 = vld [vmem:[#allocation8 + $0xbe8] sm:$0xff]  ;;  %v1923_v36 = vld [vmem:[#allocation8 + $0xc20] sm:$0xff] }
 0x5f9   :  { %v1470_v50 = vadd.f32 %v3012_v57, %v2971_v37  ;;  %v1637_v57 = vrot.slane %v4564_v52, %v4472_v22 }
 0x5fa   :  { %v1807_v37 = vmax.f32 %v1796_v24, 0.0  ;;  %v1912_v24 = vld [vmem:[#allocation8 + $0xb00] sm:$0xff] }
 0x611   :  { %v3045_v39 = vpop.f32.mrb[24].mxu0 }
 0x612   :  { %v3046_v41 = vpop.f32.mrb[25].mxu0 }
 0x613   :  { %v3047_v45 = vadd.f32 %v3046_v41, %v3045_v39  ;;  %v1891_v39 = vld [vmem:[#allocation8 + $0x8a0] sm:$0xff] }
 0x614   :  { %v3669_v40 = vpack.c.bf16 %v1891_v39, %v1889_v27  ;;  %v1888_v41 = vld [vmem:[#allocation8 + $0x860] sm:$0xff]  ;;  %v3701_v27 = vpack.c.bf16 %v1923_v36, %v1921_v35  ;;  %v2226_v35 = vld [vmem:[#allocation11 + $0x30] sm:$0xff] }
 0x615   :  { %v1540_v46 = vadd.f32 %v3047_v45, %v1465_v44  ;;  %v3048_v33 = vpop.f32.mrb[26].mxu0  ;;  %v1890_v44 = vld [vmem:[#allocation8 + $0x898] sm:$0xff]  ;;  %v1920_v39 = vld [vmem:[#allocation8 + $0xbe0] sm:$0xff] }
 0x616   :  { %v3049_v49 = vpop.f32.mrb[27].mxu0  ;;  %v1893_v45 = vld [vmem:[#allocation8 + $0x8d8] sm:$0xff]  ;;  %v2230_v36 = vld [vmem:[#allocation11 + $0x80] sm:$0xff] }
 0x617   :  { %v2972_v54 = vmul.f32 -1.442695, %v1540_v46  ;;  %v3050_v56 = vadd.f32 %v3049_v49, %v3048_v33  ;;  %v1895_v46 = vld [vmem:[#allocation8 + $0x910] sm:$0xff]  ;;  %v3671_v33 = vpack.c.bf16 %v1890_v44, %v1888_v41 }
 0x618   :  { %v3673_v49 = vpack.c.bf16 %v1895_v46, %v1893_v45  ;;  %v1927_v41 = vld [vmem:[#allocation8 + $0xc90] sm:$0xff] }
 0x619   :  { %4059 = vpow2.f32 %v2972_v54  ;;  %v1545_v58 = vadd.f32 %v3050_v56, %v1470_v50  ;;  %v1892_v50 = vld [vmem:[#allocation8 + $0x8d0] sm:$0xff]  ;;  %v1894_v54 = vld [vmem:[#allocation8 + $0x908] sm:$0xff] }
 0x61a   :  { %v1897_v56 = vld [vmem:[#allocation8 + $0x948] sm:$0xff]  ;;  %v1924_v46 = vld [vmem:[#allocation8 + $0xc50] sm:$0xff] }
 0x61b   :  { %v2973_v31 = vmul.f32 -1.442695, %v1545_v58  ;;  %v1899_v58 = vld [vmem:[#allocation8 + $0x980] sm:$0xff] }
 0x61d   :  { %4061 = vpow2.f32 %v2973_v31  ;;  %v3675_v31 = vpack.c.bf16 %v1894_v54, %v1892_v50  ;;  %v1931_v50 = vld [vmem:[#allocation8 + $0xd00] sm:$0xff] }
 0x623   :  { %v4060_v59 = vpop.eup %4059 }
 0x624   :  { %v1554_v60 = vadd.f32 1.0, %v4060_v59  ;;  %v3677_v59 = vpack.c.bf16 %v1899_v58, %v1897_v56  ;;  %v1928_v58 = vld [vmem:[#allocation8 + $0xcc0] sm:$0xff] }
 0x626   :  { %4063 = vrcp.f32 %v1554_v60  ;;  %v1896_v60 = vld [vmem:[#allocation8 + $0x940] sm:$0xff] }
 0x627   :  { %v4062_v42 = vpop.eup %4061 }
 0x628   :  { %v1555_v12 = vadd.f32 1.0, %v4062_v42  ;;  %v1898_v42 = vld [vmem:[#allocation8 + $0x978] sm:$0xff] }
 0x62a   :  { %4065 = vrcp.f32 %v1555_v12  ;;  %v1901_v12 = vld [vmem:[#allocation8 + $0x9b8] sm:$0xff] }
 0x630   :  { %v4064_v3 = vpop.eup %4063 }
 0x631   :  { %1560 = vst [vmem:[#allocation14] sm:$0xff] %v4064_v3  ;;  %v1716_v62 = vpop.f32.mrb[28].mxu0 }
 0x632   :  { %v1717_v63 = vadd.f32 %v1716_v62, %v1633_v47  ;;  %v1718_v5 = vpop.f32.mrb[29].mxu0  ;;  %v1900_v62 = vld [vmem:[#allocation8 + $0x9b0] sm:$0xff] }
 0x633   :  { %v1719_v43 = vadd.f32 %v1718_v5, %v1637_v57  ;;  %v1905_v5 = vld [vmem:[#allocation8 + $0xa28] sm:$0xff] }
 0x634   :  { %v4066_v9 = vpop.eup %4065  ;;  %v1804_v48 = vmax.f32 %v1717_v63, 0.0  ;;  %v1902_v63 = vld [vmem:[#allocation8 + $0x9e8] sm:$0xff] }
 0x635   :  { %1561 = vst [vmem:[#allocation14 + $0x8] sm:$0xff] %v4066_v9  ;;  %v1805_v13 = vmax.f32 %v1719_v43, 0.0  ;;  %v1722_v14 = vpop.f32.mrb[30].mxu0  ;;  %v3683_v10 = vpack.c.bf16 %v1902_v63, %v1900_v62  ;;  %v3685_v43 = vpack.c.bf16 %v1907_v7, %v1905_v5  ;;  %v1909_v9 = vld [vmem:[#allocation8 + $0xa98] sm:$0xff]  ;;  %v1939_v62 = vld [vmem:[#allocation8 + $0xde0] sm:$0xff]  ;;  %v1641_v5 = vrot.slane %v4564_v52, %v4493_v38 }
 0x636   :  { %v1723_v16 = vadd.f32 %v1722_v14, %v1633_v47  ;;  %v1724_v17 = vpop.f32.mrb[31].mxu0  ;;  %v1903_v47 = vld [vmem:[#allocation8 + $0x9f0] sm:$0xff]  ;;  %v3687_v14 = vpack.c.bf16 %v1906_v53, %v1904_v20 }
 0x637   :  { %v1725_v1 = vadd.f32 %v1724_v17, %v1637_v57  ;;  %2016 = vmatprep.mubr.f32.mxu0 %v1805_v13  ;;  %v3679_v57 = vpack.c.bf16 %v1898_v42, %v1896_v60  ;;  %v3681_v3 = vpack.c.bf16 %v1903_v47, %v1901_v12  ;;  %v1911_v13 = vld [vmem:[#allocation8 + $0xad0] sm:$0xff]  ;;  %v1913_v17 = vld [vmem:[#allocation8 + $0xb08] sm:$0xff]  ;;  %v1794_v53 = vadd.f32 %v4548_v51, %v1641_v5 }
 0x638   :  { %2017 = vmatmul.mubr.f32.vlgmr.msra.gmra.mrb[32].mxu0 %v1804_v48  ;;  %v1808_v32 = vmax.f32 %v1723_v16, 0.0  ;;  %v1908_v48 = vld [vmem:[#allocation8 + $0xa90] sm:$0xff]  ;;  %v1910_v16 = vld [vmem:[#allocation8 + $0xac8] sm:$0xff] }
 0x639   :  { %v1809_v28 = vmax.f32 %v1725_v1, 0.0  ;;  %3660 = vmatpush1.bf16.msra.mxu0 %v3659_v15  ;;  %v3689_v15 = vpack.c.bf16 %v1911_v13, %v1909_v9  ;;  %v3691_v21 = vpack.c.bf16 %v1910_v16, %v1908_v48  ;;  %v1914_v1 = vld [vmem:[#allocation8 + $0xb38] sm:$0xff]  ;;  %v1935_v60 = vld [vmem:[#allocation8 + $0xd70] sm:$0xff]  ;;  %v1802_v9 = vadd.f32 %v4558_v6, %v4572_v8  ;;  %v2231_v8 = vld [vmem:[#allocation11 + $0x88] sm:$0xff] }
 0x63a   :  { %3662 = vmatprep.subr.bf16.mxu0 %v3661_v19  ;;  %v1915_v19 = vld [vmem:[#allocation8 + $0xb40] sm:$0xff]  ;;  %v1932_v47 = vld [vmem:[#allocation8 + $0xd30] sm:$0xff]  ;;  %v1806_v13 = vmax.f32 %v1794_v53, 0.0  ;;  %v2123_v16 = vld [vmem:[#allocation10 + $0x3b8] sm:$0xff] }
 0x63b   :  { %2022 = vmatprep.mubr.f32.mxu0 %v1809_v28  ;;  %v3693_v23 = vpack.c.bf16 %v1915_v19, %v1913_v17  ;;  %v3695_v28 = vpack.c.bf16 %v1914_v1, %v1912_v24  ;;  %v2122_v48 = vld [vmem:[#allocation10 + $0x370] sm:$0xff]  ;;  %v2140_v19 = vld [vmem:[#allocation10 + $0x880] sm:$0xff]  ;;  %v2125_v24 = vld [vmem:[#allocation10 + $0x448] sm:$0xff] }
 0x63c   :  { %2023 = vmatmul.mubr.f32.gmra.mrb[34].mxu0 %v1808_v32  ;;  %v1916_v32 = vld [vmem:[#allocation8 + $0xb70] sm:$0xff]  ;;  %v3747_v17 = vpack.c.bf16 %v2123_v16, %v2122_v48  ;;  %v2227_v6 = vld [vmem:[#allocation11 + $0x38] sm:$0xff] }
 0x63d   :  { %3664 = vmatpush1.bf16.msra.mxu0 %v3663_v30  ;;  %2093 = vmatprep.mubr.f32.mxu0 %v1807_v37  ;;  %v3697_v30 = vpack.c.bf16 %v1919_v26, %v1917_v25  ;;  %v1940_v25 = vld [vmem:[#allocation13 + $0x8] sm:$0x3]  ;;  %v2266_v16 = vld [vmem:[#allocation11 + $0x350] sm:$0xff] }
 0x63e   :  { %3666 = vmatprep.subr.bf16.mxu0 %v3665_v34  ;;  %v1918_v34 = vld [vmem:[#allocation8 + $0xba8] sm:$0xff]  ;;  %3748 = vmatpush3.bf16.msra.mxu1 %v3747_v17  ;;  %v1945_v26 = vrot.slane %v1940_v25, %v4467_v18  ;;  %v2270_v17 = vld [vmem:[#allocation11 + $0x3a0] sm:$0xff] }
 0x63f   :  { %v3699_v37 = vpack.c.bf16 %v1918_v34, %v1916_v32 }
 0x641   :  { %3668 = vmatpush1.bf16.msra.mxu0 %v3667_v55  ;;  %v1922_v55 = vld [vmem:[#allocation8 + $0xc18] sm:$0xff] }
 0x642   :  { %3670 = vmatprep.subr.bf16.mxu0 %v3669_v40  ;;  %v1925_v40 = vld [vmem:[#allocation8 + $0xc58] sm:$0xff]  ;;  %v3703_v44 = vpack.c.bf16 %v1922_v55, %v1920_v39  ;;  %v2239_v39 = vld [vmem:[#allocation11 + $0x128] sm:$0xff] }
 0x643   :  { %v3705_v45 = vpack.c.bf16 %v1927_v41, %v1925_v40  ;;  %v3755_v41 = vpack.c.bf16 %v2230_v36, %v2226_v35  ;;  %v175_v36 = vsub.s32 5, %v4464_v11 }
 0x645   :  { %3672 = vmatpush1.bf16.msra.mxu0 %v3671_v33  ;;  %v1926_v33 = vld [vmem:[#allocation8 + $0xc88] sm:$0xff] }
 0x646   :  { %3674 = vmatprep.subr.bf16.mxu0 %v3673_v49  ;;  %v1929_v49 = vld [vmem:[#allocation8 + $0xcc8] sm:$0xff]  ;;  %v3707_v54 = vpack.c.bf16 %v1926_v33, %v1924_v46 }
 0x647   :  { %v3709_v56 = vpack.c.bf16 %v1931_v50, %v1929_v49  ;;  %v2234_v49 = vld [vmem:[#allocation11 + $0xd0] sm:$0xff]  ;;  %v2238_v50 = vld [vmem:[#allocation11 + $0x120] sm:$0xff] }
 0x649   :  { %3676 = vmatpush1.bf16.msra.mxu0 %v3675_v31  ;;  %v1930_v31 = vld [vmem:[#allocation8 + $0xcf8] sm:$0xff] }
 0x64a   :  { %3678 = vmatprep.subr.bf16.mxu0 %v3677_v59  ;;  %v1933_v59 = vld [vmem:[#allocation8 + $0xd38] sm:$0xff]  ;;  %v3711_v42 = vpack.c.bf16 %v1930_v31, %v1928_v58  ;;  %v2247_v58 = vld [vmem:[#allocation11 + $0x1c8] sm:$0xff] }
 0x64b   :  { %v3713_v12 = vpack.c.bf16 %v1935_v60, %v1933_v59  ;;  %v3759_v59 = vpack.c.bf16 %v2238_v50, %v2234_v49 }
 0x64d   :  { %3680 = vmatpush1.bf16.msra.mxu0 %v3679_v57  ;;  %v1934_v57 = vld [vmem:[#allocation8 + $0xd68] sm:$0xff] }
 0x64e   :  { %3682 = vmatprep.subr.bf16.mxu0 %v3681_v3  ;;  %v1937_v3 = vld [vmem:[#allocation8 + $0xda8] sm:$0xff]  ;;  %v3715_v63 = vpack.c.bf16 %v1934_v57, %v1932_v47  ;;  %v2246_v47 = vld [vmem:[#allocation11 + $0x1c0] sm:$0xff]  ;;  %v2251_v57 = vld [vmem:[#allocation11 + $0x218] sm:$0xff] }
 0x64f   :  { %v3717_v7 = vpack.c.bf16 %v1939_v62, %v1937_v3  ;;  %v2255_v3 = vld [vmem:[#allocation11 + $0x268] sm:$0xff] }
 0x651   :  { %3684 = vmatpush1.bf16.msra.mxu0 %v3683_v10  ;;  %v1936_v10 = vld [vmem:[#allocation8 + $0xda0] sm:$0xff] }
 0x652   :  { %3686 = vmatprep.subr.bf16.mxu0 %v3685_v43  ;;  %v1938_v43 = vld [vmem:[#allocation8 + $0xdd8] sm:$0xff] }
 0x653   :  { %v3719_v20 = vpack.c.bf16 %v1938_v43, %v1936_v10  ;;  %v2259_v10 = vld [vmem:[#allocation11 + $0x2b8] sm:$0xff]  ;;  %v2263_v43 = vld [vmem:[#allocation11 + $0x308] sm:$0xff] }
 0x654   :  { %v3769_v53 = vpack.c.bf16 %v2263_v43, %v2259_v10  ;;  %v2253_v10 = vld [vmem:[#allocation11 + $0x228] sm:$0xff]  ;;  %v2257_v43 = vld [vmem:[#allocation11 + $0x278] sm:$0xff] }
 0x655   :  { %3688 = vmatpush1.bf16.msra.mxu0 %v3687_v14  ;;  %v1800_v14 = vadd.f32 %v4555_v61, %v1641_v5  ;;  %v3753_v61 = vpack.c.bf16 %v2231_v8, %v2227_v6  ;;  %v2250_v5 = vld [vmem:[#allocation11 + $0x210] sm:$0xff]  ;;  %v2283_v8 = vld [vmem:[#allocation11 + $0x498] sm:$0xff] }
 0x656   :  { %3690 = vmatprep.subr.bf16.mxu0 %v3689_v15  ;;  %v1811_v15 = vmax.f32 %v1802_v9, 0.0  ;;  %v2258_v9 = vld [vmem:[#allocation11 + $0x2b0] sm:$0xff] }
 0x657   :  { %v1810_v52 = vmax.f32 %v1800_v14, 0.0  ;;  %v2267_v14 = vld [vmem:[#allocation11 + $0x358] sm:$0xff] }
 0x659   :  { %3692 = vmatpush1.bf16.msra.mxu0 %v3691_v21  ;;  %v2141_v21 = vld [vmem:[#allocation10 + $0x8c8] sm:$0xff] }
 0x65a   :  { %3694 = vmatprep.subr.bf16.mxu0 %v3693_v23  ;;  %v3749_v51 = vpack.c.bf16 %v2141_v21, %v2140_v19  ;;  %v2124_v23 = vld [vmem:[#allocation10 + $0x400] sm:$0xff]  ;;  %v2275_v19 = vld [vmem:[#allocation11 + $0x3f8] sm:$0xff]  ;;  %v2279_v21 = vld [vmem:[#allocation11 + $0x448] sm:$0xff] }
 0x65b   :  { %v3751_v1 = vpack.c.bf16 %v2125_v24, %v2124_v23  ;;  %v3777_v23 = vpack.c.bf16 %v2279_v21, %v2275_v19  ;;  %v2274_v24 = vld [vmem:[#allocation11 + $0x3f0] sm:$0xff]  ;;  %v2273_v19 = vld [vmem:[#allocation11 + $0x3b8] sm:$0xff] }
 0x65c   :  { %3750 = vmatprep.subr.bf16.mxu1 %v3749_v51  ;;  %v3775_v51 = vpack.c.bf16 %v2270_v17, %v2266_v16  ;;  %v2264_v16 = vld [vmem:[#allocation11 + $0x310] sm:$0xff]  ;;  %v2269_v17 = vld [vmem:[#allocation11 + $0x368] sm:$0xff] }
 0x65d   :  { %3696 = vmatpush1.bf16.msra.mxu0 %v3695_v28  ;;  %3752 = vmatpush3.bf16.msra.mxu1 %v3751_v1  ;;  %v1949_v28 = vrot.slane %v1940_v25, %v4472_v22  ;;  %v2278_v1 = vld [vmem:[#allocation11 + $0x440] sm:$0xff] }
 0x65e   :  { %3698 = vmatprep.subr.bf16.mxu0 %v3697_v30  ;;  %3754 = vmatprep.subr.bf16.mxu1 %v3753_v61  ;;  %v3779_v6 = vpack.c.bf16 %v2278_v1, %v2274_v24  ;;  %v2287_v61 = vld [vmem:[#allocation11 + $0x4e8] sm:$0xff]  ;;  %v2272_v24 = vld [vmem:[#allocation11 + $0x3b0] sm:$0xff] }
 0x65f   :  { %v3781_v25 = vpack.c.bf16 %v2287_v61, %v2283_v8  ;;  %v2277_v1 = vld [vmem:[#allocation11 + $0x408] sm:$0xff] }
 0x661   :  { %3700 = vmatpush1.bf16.msra.mxu0 %v3699_v37 }
 0x662   :  { %3702 = vmatprep.subr.bf16.mxu0 %v3701_v27  ;;  %v2235_v27 = vld [vmem:[#allocation11 + $0xd8] sm:$0xff] }
 0x663   :  { %v3757_v33 = vpack.c.bf16 %v2239_v39, %v2235_v27 }
 0x665   :  { %3704 = vmatpush1.bf16.msra.mxu0 %v3703_v44 }
 0x666   :  { %3706 = vmatprep.subr.bf16.mxu0 %v3705_v45 }
 0x669   :  { %3708 = vmatpush1.bf16.msra.mxu0 %v3707_v54 }
 0x66a   :  { %3710 = vmatprep.subr.bf16.mxu0 %v3709_v56  ;;  %v2243_v56 = vld [vmem:[#allocation11 + $0x178] sm:$0xff] }
 0x66d   :  { %3712 = vmatpush1.bf16.msra.mxu0 %v3711_v42  ;;  %v3761_v42 = vpack.c.bf16 %v2247_v58, %v2243_v56 }
 0x66e   :  { %3714 = vmatprep.subr.bf16.mxu0 %v3713_v12  ;;  %v2242_v12 = vld [vmem:[#allocation11 + $0x170] sm:$0xff] }
 0x66f   :  { %v3763_v62 = vpack.c.bf16 %v2246_v47, %v2242_v12  ;;  %v2245_v12 = vld [vmem:[#allocation11 + $0x188] sm:$0xff]  ;;  %v2249_v47 = vld [vmem:[#allocation11 + $0x1d8] sm:$0xff] }
 0x671   :  { %3716 = vmatpush1.bf16.msra.mxu0 %v3715_v63  ;;  %v3765_v63 = vpack.c.bf16 %v2255_v3, %v2251_v57 }
 0x672   :  { %3718 = vmatprep.subr.bf16.mxu0 %v3717_v7  ;;  %v2254_v7 = vld [vmem:[#allocation11 + $0x260] sm:$0xff] }
 0x675   :  { %3720 = vmatpush1.bf16.msra.mxu0 %v3719_v20  ;;  %v3767_v20 = vpack.c.bf16 %v2254_v7, %v2250_v5  ;;  %v2244_v5 = vld [vmem:[#allocation11 + $0x180] sm:$0xff]  ;;  %v2248_v7 = vld [vmem:[#allocation11 + $0x1d0] sm:$0xff] }
 0x678   :  { %2094 = vmatmul.mubr.f32.vlgmr.msra.gmra.mrb[32].mxu0 %v1806_v13  ;;  %v2262_v13 = vld [vmem:[#allocation11 + $0x300] sm:$0xff] }
 0x679   :  { %2099 = vmatprep.mubr.f32.mxu0 %v1811_v15  ;;  %v2271_v15 = vld [vmem:[#allocation11 + $0x3a8] sm:$0xff] }
 0x67a   :  { %v3773_v48 = vpack.c.bf16 %v2271_v15, %v2267_v14  ;;  %v2265_v14 = vld [vmem:[#allocation11 + $0x318] sm:$0xff] }
 0x67c   :  { %2100 = vmatmul.mubr.f32.gmra.mrb[34].mxu0 %v1810_v52  ;;  %v3771_v52 = vpack.c.bf16 %v2262_v13, %v2258_v9  ;;  %v2256_v9 = vld [vmem:[#allocation11 + $0x270] sm:$0xff]  ;;  %v2261_v13 = vld [vmem:[#allocation11 + $0x2c8] sm:$0xff] }
 0x74b   :  { %v2095_v30 = vpop.f32.mrb[32].mxu0 }
 0x74c   :  { %v4013_v32 = vadd.f32 %v2095_v30, %v1945_v26  ;;  %v2097_v34 = vpop.f32.mrb[33].mxu0 }
 0x74d   :  { %v4014_v37 = vadd.f32 %v2097_v34, %v1949_v28  ;;  %v2233_v34 = vld [vmem:[#allocation11 + $0x98] sm:$0xff] }
 0x74e   :  { %v2106_v44 = vmax.f32 %v4013_v32, 0.0  ;;  %v2229_v32 = vld [vmem:[#allocation11 + $0x48] sm:$0xff] }
 0x74f   :  { %v2107_v55 = vmax.f32 %v4014_v37, 0.0  ;;  %v2101_v40 = vpop.f32.mrb[34].mxu0  ;;  %v3785_v35 = vpack.c.bf16 %v2233_v34, %v2229_v32  ;;  %v4067_v37 = vld [vmem:[#allocation13] sm:$0x3f] }
 0x750   :  { %v4015_v45 = vadd.f32 %v2101_v40, %v1945_v26  ;;  %v2103_v46 = vpop.f32.mrb[35].mxu0  ;;  %v2282_v26 = vld [vmem:[#allocation11 + $0x490] sm:$0xff]  ;;  %v176_v27 = vrot.slane %v4067_v37, %v175_v36  ;;  %v2475_v37 = vld [vmem:[#allocation8 + $0x28] sm:$0xff] }
 0x751   :  { %v4016_v54 = vadd.f32 %v2103_v46, %v1949_v28  ;;  %2213 = vmatprep.mubr.f32.mxu1 %v2107_v55  ;;  %v2286_v28 = vld [vmem:[#allocation11 + $0x4e0] sm:$0xff]  ;;  %v2974_v55 = vld [vmem:[#allocation13 + $0xf] ss:$0 sm:$0xff]  ;;  %v2288_v36 = vld [vmem:[#allocation11 + $0x4f0] sm:$0xff] }
 0x752   :  { %2214 = vmatmul.mubr.f32.vlgmr.msra.gmra.mrb[16].mxu1 %v2106_v44  ;;  %v2108_v60 = vmax.f32 %v4015_v45, 0.0  ;;  %v3783_v30 = vpack.c.bf16 %v2286_v28, %v2282_v26  ;;  %v2228_v44 = vld [vmem:[#allocation11 + $0x40] sm:$0xff]  ;;  %v2232_v45 = vld [vmem:[#allocation11 + $0x90] sm:$0xff]  ;;  %v2237_v46 = vld [vmem:[#allocation11 + $0xe8] sm:$0xff]  ;;  %v413_v49 = vadd.f32 %v4503_v2, %v176_v27  ;;  %v419_v57 = vadd.f32 %v4507_v4, %v176_v27 }
 0x753   :  { %v2109_v31 = vmax.f32 %v4016_v54, 0.0  ;;  %3756 = vmatpush1.bf16.msra.mxu1 %v3755_v41  ;;  %v3787_v58 = vpack.c.bf16 %v2232_v45, %v2228_v44  ;;  %v3797_v4 = vpack.c.bf16 %v2257_v43, %v2253_v10  ;;  %v2280_v26 = vld [vmem:[#allocation11 + $0x450] sm:$0xff]  ;;  %v2285_v28 = vld [vmem:[#allocation11 + $0x4a8] sm:$0xff]  ;;  %v2477_v27 = vld [vmem:[#allocation8 + $0x60] sm:$0xff] }
 0x754   :  { %3758 = vmatprep.subr.bf16.mxu1 %v3757_v33  ;;  %v2241_v33 = vld [vmem:[#allocation11 + $0x138] sm:$0xff]  ;;  %v2481_v45 = vld [vmem:[#allocation8 + $0xd0] sm:$0xff] }
 0x755   :  { %2218 = vmatprep.mubr.f32.mxu1 %v2109_v31  ;;  %v3789_v11 = vpack.c.bf16 %v2241_v33, %v2237_v46  ;;  %v2479_v44 = vld [vmem:[#allocation8 + $0x98] sm:$0xff] }
 0x756   :  { %2219 = vmatmul.mubr.f32.gmra.mrb[18].mxu1 %v2108_v60  ;;  %v2236_v60 = vld [vmem:[#allocation11 + $0xe0] sm:$0xff]  ;;  %v3821_v33 = vpack.c.bf16 %v2481_v45, %v2479_v44  ;;  %v2492_v10 = vld [vmem:[#allocation8 + $0x218] sm:$0xff]  ;;  %v2521_v45 = vld [vmem:[#allocation8 + $0x530] sm:$0xff] }
 0x757   :  { %3760 = vmatpush1.bf16.msra.mxu1 %v3759_v59  ;;  %2376 = vmatprep.mubr.f32.mxu1 %v4295_v0  ;;  %v2495_v43 = vld [vmem:[#allocation8 + $0x258] sm:$0xff] }
 0x758   :  { %3762 = vmatprep.subr.bf16.mxu1 %v3761_v42  ;;  %v2240_v42 = vld [vmem:[#allocation11 + $0x130] sm:$0xff]  ;;  %v2519_v44 = vld [vmem:[#allocation8 + $0x4f8] sm:$0xff] }
 0x759   :  { %v3791_v2 = vpack.c.bf16 %v2240_v42, %v2236_v60  ;;  %v2484_v60 = vld [vmem:[#allocation8 + $0x138] sm:$0xff] }
 0x75a   :  { %v2487_v42 = vld [vmem:[#allocation8 + $0x178] sm:$0xff] }
 0x75b   :  { %3764 = vmatpush1.bf16.msra.mxu1 %v3763_v62 }
 0x75c   :  { %3766 = vmatprep.subr.bf16.mxu1 %v3765_v63  ;;  %v3793_v63 = vpack.c.bf16 %v2249_v47, %v2245_v12  ;;  %v2489_v12 = vld [vmem:[#allocation8 + $0x1b0] sm:$0xff] }
 0x75f   :  { %3768 = vmatpush1.bf16.msra.mxu1 %v3767_v20  ;;  %v3795_v20 = vpack.c.bf16 %v2248_v7, %v2244_v5  ;;  %v2490_v7 = vld [vmem:[#allocation8 + $0x1e0] sm:$0xff] }
 0x760   :  { %3770 = vmatprep.subr.bf16.mxu1 %v3769_v53  ;;  %v2252_v53 = vld [vmem:[#allocation11 + $0x220] sm:$0xff] }
 0x761   :  { %v3799_v15 = vpack.c.bf16 %v2256_v9, %v2252_v53  ;;  %v2494_v53 = vld [vmem:[#allocation8 + $0x250] sm:$0xff]  ;;  %v2496_v9 = vld [vmem:[#allocation8 + $0x288] sm:$0xff] }
 0x763   :  { %3772 = vmatpush1.bf16.msra.mxu1 %v3771_v52  ;;  %v3801_v52 = vpack.c.bf16 %v2265_v14, %v2261_v13  ;;  %v2499_v13 = vld [vmem:[#allocation8 + $0x2c8] sm:$0xff]  ;;  %v2501_v14 = vld [vmem:[#allocation8 + $0x300] sm:$0xff] }
 0x764   :  { %3774 = vmatprep.subr.bf16.mxu1 %v3773_v48  ;;  %v2260_v48 = vld [vmem:[#allocation11 + $0x2c0] sm:$0xff] }
 0x765   :  { %v3803_v21 = vpack.c.bf16 %v2264_v16, %v2260_v48  ;;  %v2498_v48 = vld [vmem:[#allocation8 + $0x2c0] sm:$0xff]  ;;  %v2500_v16 = vld [vmem:[#allocation8 + $0x2f8] sm:$0xff] }
 0x767   :  { %3776 = vmatpush1.bf16.msra.mxu1 %v3775_v51  ;;  %v3805_v51 = vpack.c.bf16 %v2273_v19, %v2269_v17  ;;  %v2503_v17 = vld [vmem:[#allocation8 + $0x338] sm:$0xff]  ;;  %v2505_v19 = vld [vmem:[#allocation8 + $0x370] sm:$0xff] }
 0x768   :  { %3778 = vmatprep.subr.bf16.mxu1 %v3777_v23  ;;  %v2268_v23 = vld [vmem:[#allocation11 + $0x360] sm:$0xff] }
 0x769   :  { %v3807_v8 = vpack.c.bf16 %v2272_v24, %v2268_v23  ;;  %v2502_v23 = vld [vmem:[#allocation8 + $0x330] sm:$0xff]  ;;  %v2504_v24 = vld [vmem:[#allocation8 + $0x368] sm:$0xff] }
 0x76b   :  { %3780 = vmatpush1.bf16.msra.mxu1 %v3779_v6  ;;  %v2281_v6 = vld [vmem:[#allocation11 + $0x458] sm:$0xff] }
 0x76c   :  { %3782 = vmatprep.subr.bf16.mxu1 %v3781_v25  ;;  %v3809_v61 = vpack.c.bf16 %v2281_v6, %v2277_v1  ;;  %v2276_v25 = vld [vmem:[#allocation11 + $0x400] sm:$0xff]  ;;  %v2507_v1 = vld [vmem:[#allocation8 + $0x3a8] sm:$0xff] }
 0x76d   :  { %v3811_v32 = vpack.c.bf16 %v2280_v26, %v2276_v25  ;;  %v2509_v6 = vld [vmem:[#allocation8 + $0x3e0] sm:$0xff]  ;;  %v2508_v26 = vld [vmem:[#allocation8 + $0x3d8] sm:$0xff] }
 0x76e   :  { %v2506_v25 = vld [vmem:[#allocation8 + $0x3a0] sm:$0xff] }
 0x76f   :  { %3784 = vmatpush1.bf16.msra.mxu1 %v3783_v30  ;;  %v2289_v30 = vld [vmem:[#allocation11 + $0x4f8] sm:$0xff] }
 0x770   :  { %3786 = vmatprep.subr.bf16.mxu1 %v3785_v35  ;;  %v3813_v34 = vpack.c.bf16 %v2289_v30, %v2285_v28  ;;  %v2284_v35 = vld [vmem:[#allocation11 + $0x4a0] sm:$0xff]  ;;  %v2511_v28 = vld [vmem:[#allocation8 + $0x418] sm:$0xff]  ;;  %v2513_v30 = vld [vmem:[#allocation8 + $0x450] sm:$0xff] }
 0x825   :  { %v3083_v39 = vpop.f32.mrb[16].mxu1 }
 0x826   :  { %v3084_v40 = vpop.f32.mrb[17].mxu1 }
 0x827   :  { %v3085_v41 = vadd.f32 %v3084_v40, %v3083_v39  ;;  %v3815_v39 = vpack.c.bf16 %v2288_v36, %v2284_v35  ;;  %v2474_v40 = vld [vmem:[#allocation8 + $0x20] sm:$0xff]  ;;  %v2510_v35 = vld [vmem:[#allocation8 + $0x410] sm:$0xff]  ;;  %v2512_v36 = vld [vmem:[#allocation8 + $0x448] sm:$0xff] }
 0x829   :  { %v2216_v50 = vadd.f32 %v3085_v41, %v2974_v55  ;;  %v3086_v54 = vpop.f32.mrb[18].mxu1  ;;  %v2476_v41 = vld [vmem:[#allocation8 + $0x58] sm:$0xff] }
 0x82a   :  { %v3087_v56 = vpop.f32.mrb[19].mxu1  ;;  %v3819_v46 = vpack.c.bf16 %v2476_v41, %v2474_v40  ;;  %v2514_v40 = vld [vmem:[#allocation8 + $0x480] sm:$0xff]  ;;  %v2516_v41 = vld [vmem:[#allocation8 + $0x4b8] sm:$0xff] }
 0x82b   :  { %v4587_v31 = vsub.f32 %v413_v49, %v2216_v50  ;;  %v3088_v59 = vadd.f32 %v3087_v56, %v3086_v54  ;;  %v2478_v49 = vld [vmem:[#allocation8 + $0x90] sm:$0xff]  ;;  %v2480_v50 = vld [vmem:[#allocation8 + $0xc8] sm:$0xff]  ;;  %v2485_v56 = vld [vmem:[#allocation8 + $0x140] sm:$0xff] }
 0x82c   :  { %v2483_v54 = vld [vmem:[#allocation8 + $0x108] sm:$0xff] }
 0x82d   :  { %v2221_v3 = vadd.f32 %v3088_v59, %v2974_v55  ;;  %2377 = vmatmul.mubr.f32.vlgmr.msra.gmra.mrb[20].mxu1 %v4587_v31  ;;  %v3817_v55 = vpack.c.bf16 %v2477_v27, %v2475_v37  ;;  %v3825_v59 = vpack.c.bf16 %v2485_v56, %v2483_v54  ;;  %v2515_v37 = vld [vmem:[#allocation8 + $0x488] sm:$0xff]  ;;  %v2517_v27 = vld [vmem:[#allocation8 + $0x4c0] sm:$0xff] }
 0x82e   :  { %3788 = vmatpush1.bf16.msra.mxu1 %v3787_v58  ;;  %2382 = vmatprep.mubr.f32.mxu1 %v4295_v0  ;;  %v3823_v58 = vpack.c.bf16 %v2480_v50, %v2478_v49  ;;  %v2518_v49 = vld [vmem:[#allocation8 + $0x4f0] sm:$0xff]  ;;  %v2520_v50 = vld [vmem:[#allocation8 + $0x528] sm:$0xff]  ;;  %v2525_v56 = vld [vmem:[#allocation8 + $0x5a0] sm:$0xff] }
 0x82f   :  { %3790 = vmatprep.subr.bf16.mxu1 %v3789_v11  ;;  %v4592_v62 = vsub.f32 %v419_v57, %v2221_v3  ;;  %v2482_v11 = vld [vmem:[#allocation8 + $0x100] sm:$0xff]  ;;  %v3829_v57 = vpack.c.bf16 %v2489_v12, %v2487_v42  ;;  %v2486_v3 = vld [vmem:[#allocation8 + $0x170] sm:$0xff]  ;;  %v2523_v54 = vld [vmem:[#allocation8 + $0x568] sm:$0xff] }
 0x830   :  { %v3827_v47 = vpack.c.bf16 %v2484_v60, %v2482_v11  ;;  %v2522_v11 = vld [vmem:[#allocation8 + $0x560] sm:$0xff]  ;;  %v2524_v60 = vld [vmem:[#allocation8 + $0x598] sm:$0xff]  ;;  %v2529_v12 = vld [vmem:[#allocation8 + $0x610] sm:$0xff] }
 0x831   :  { %2383 = vmatmul.mubr.f32.gmra.mrb[22].mxu1 %v4592_v62  ;;  %v2527_v42 = vld [vmem:[#allocation8 + $0x5d8] sm:$0xff] }
 0x832   :  { %3792 = vmatpush1.bf16.msra.mxu1 %v3791_v2  ;;  %2453 = vmatprep.mubr.f32.mxu1 %v4295_v0  ;;  %v2488_v2 = vld [vmem:[#allocation8 + $0x1a8] sm:$0xff] }
 0x833   :  { %3794 = vmatprep.subr.bf16.mxu1 %v3793_v63  ;;  %v2491_v63 = vld [vmem:[#allocation8 + $0x1e8] sm:$0xff] }
 0x836   :  { %3796 = vmatpush1.bf16.msra.mxu1 %v3795_v20  ;;  %v2497_v20 = vld [vmem:[#allocation8 + $0x290] sm:$0xff] }
 0x837   :  { %3798 = vmatprep.subr.bf16.mxu1 %v3797_v4  ;;  %v3835_v4 = vpack.c.bf16 %v2492_v10, %v2490_v7  ;;  %v2530_v7 = vld [vmem:[#allocation8 + $0x640] sm:$0xff]  ;;  %v2532_v10 = vld [vmem:[#allocation8 + $0x678] sm:$0xff] }
 0x83a   :  { %3800 = vmatpush1.bf16.msra.mxu1 %v3799_v15  ;;  %v3839_v15 = vpack.c.bf16 %v2496_v9, %v2494_v53  ;;  %v2534_v53 = vld [vmem:[#allocation8 + $0x6b0] sm:$0xff]  ;;  %v2536_v9 = vld [vmem:[#allocation8 + $0x6e8] sm:$0xff] }
 0x83b   :  { %3802 = vmatprep.subr.bf16.mxu1 %v3801_v52  ;;  %v3841_v52 = vpack.c.bf16 %v2501_v14, %v2499_v13  ;;  %v2539_v13 = vld [vmem:[#allocation8 + $0x728] sm:$0xff]  ;;  %v2541_v14 = vld [vmem:[#allocation8 + $0x760] sm:$0xff] }
 0x83e   :  { %3804 = vmatpush1.bf16.msra.mxu1 %v3803_v21  ;;  %v3843_v21 = vpack.c.bf16 %v2500_v16, %v2498_v48  ;;  %v2773_v48 = vld [vmem:[#allocation10 + $0x20] sm:$0xff]  ;;  %v2775_v16 = vld [vmem:[#allocation10 + $0x68] sm:$0xff] }
 0x83f   :  { %3806 = vmatprep.subr.bf16.mxu1 %v3805_v51  ;;  %v3845_v51 = vpack.c.bf16 %v2505_v19, %v2503_v17  ;;  %v2772_v17 = vld [vmem:[#allocation10 + $0x18] sm:$0xff]  ;;  %v3945_v19 = vpack.c.bf16 %v2775_v16, %v2773_v48  ;;  %v2815_v48 = vld [vmem:[#allocation10 + $0x608] sm:$0xff] }
 0x841   :  { %3946 = vmatprep.subr.bf16.mxu0 %v3945_v19  ;;  %v2812_v19 = vld [vmem:[#allocation10 + $0x5b8] sm:$0xff] }
 0x842   :  { %3808 = vmatpush1.bf16.msra.mxu1 %v3807_v8  ;;  %v3847_v8 = vpack.c.bf16 %v2504_v24, %v2502_v23  ;;  %v2779_v23 = vld [vmem:[#allocation10 + $0xf8] sm:$0xff] }
 0x843   :  { %3810 = vmatprep.subr.bf16.mxu1 %v3809_v61  ;;  %v3849_v61 = vpack.c.bf16 %v2509_v6, %v2507_v1  ;;  %v2776_v6 = vld [vmem:[#allocation10 + $0xa8] sm:$0xff] }
 0x846   :  { %3812 = vmatpush1.bf16.msra.mxu1 %v3811_v32  ;;  %v3851_v32 = vpack.c.bf16 %v2508_v26, %v2506_v25  ;;  %v2783_v25 = vld [vmem:[#allocation10 + $0x188] sm:$0xff] }
 0x847   :  { %3814 = vmatprep.subr.bf16.mxu1 %v3813_v34  ;;  %v3853_v34 = vpack.c.bf16 %v2513_v30, %v2511_v28  ;;  %v2780_v30 = vld [vmem:[#allocation10 + $0x138] sm:$0xff] }
 0x84a   :  { %3816 = vmatpush1.bf16.msra.mxu1 %v3815_v39  ;;  %v3855_v39 = vpack.c.bf16 %v2512_v36, %v2510_v35  ;;  %v2787_v35 = vld [vmem:[#allocation10 + $0x218] sm:$0xff] }
 0x84b   :  { %3818 = vmatprep.subr.bf16.mxu1 %v3817_v55  ;;  %v3857_v55 = vpack.c.bf16 %v2517_v27, %v2515_v37  ;;  %v2784_v27 = vld [vmem:[#allocation10 + $0x1c8] sm:$0xff] }
 0x84d   :  { %2454 = vmatmul.mubr.f32.vlgmr.msra.gmra.mrb[24].mxu1 %v4587_v31  ;;  %v2493_v31 = vld [vmem:[#allocation8 + $0x220] sm:$0xff] }
 0x84e   :  { %2459 = vmatprep.mubr.f32.mxu1 %v4295_v0  ;;  %3820 = vmatpush1.bf16.msra.mxu1 %v3819_v46  ;;  %v3831_v0 = vpack.c.bf16 %v2488_v2, %v2486_v3  ;;  %v3833_v5 = vpack.c.bf16 %v2493_v31, %v2491_v63  ;;  %v3859_v46 = vpack.c.bf16 %v2516_v41, %v2514_v40  ;;  %v2526_v3 = vld [vmem:[#allocation8 + $0x5d0] sm:$0xff]  ;;  %v2528_v2 = vld [vmem:[#allocation8 + $0x608] sm:$0xff]  ;;  %v2533_v31 = vld [vmem:[#allocation8 + $0x680] sm:$0xff] }
 0x84f   :  { %3822 = vmatprep.subr.bf16.mxu1 %v3821_v33  ;;  %v3861_v33 = vpack.c.bf16 %v2521_v45, %v2519_v44  ;;  %v2531_v63 = vld [vmem:[#allocation8 + $0x648] sm:$0xff]  ;;  %v2788_v45 = vld [vmem:[#allocation10 + $0x258] sm:$0xff] }
 0x850   :  { %v2791_v40 = vld [vmem:[#allocation10 + $0x2a8] sm:$0xff] }
 0x851   :  { %2460 = vmatmul.mubr.f32.gmra.mrb[26].mxu1 %v4592_v62  ;;  %v3837_v62 = vpack.c.bf16 %v2497_v20, %v2495_v43  ;;  %v2535_v43 = vld [vmem:[#allocation8 + $0x6b8] sm:$0xff]  ;;  %v2537_v20 = vld [vmem:[#allocation8 + $0x6f0] sm:$0xff] }
 0x852   :  { %3824 = vmatpush1.bf16.msra.mxu1 %v3823_v58  ;;  %v3863_v58 = vpack.c.bf16 %v2520_v50, %v2518_v49  ;;  %v2795_v49 = vld [vmem:[#allocation10 + $0x338] sm:$0xff] }
 0x853   :  { %3826 = vmatprep.subr.bf16.mxu1 %v3825_v59  ;;  %v3865_v59 = vpack.c.bf16 %v2525_v56, %v2523_v54  ;;  %v2792_v56 = vld [vmem:[#allocation10 + $0x2e8] sm:$0xff] }
 0x856   :  { %3828 = vmatpush1.bf16.msra.mxu1 %v3827_v47  ;;  %v3867_v47 = vpack.c.bf16 %v2524_v60, %v2522_v11  ;;  %v2799_v11 = vld [vmem:[#allocation10 + $0x3c8] sm:$0xff] }
 0x857   :  { %3830 = vmatprep.subr.bf16.mxu1 %v3829_v57  ;;  %v3869_v57 = vpack.c.bf16 %v2529_v12, %v2527_v42  ;;  %v2796_v12 = vld [vmem:[#allocation10 + $0x378] sm:$0xff] }
 0x85a   :  { %3832 = vmatpush1.bf16.msra.mxu1 %v3831_v0  ;;  %v3871_v0 = vpack.c.bf16 %v2528_v2, %v2526_v3  ;;  %v2803_v3 = vld [vmem:[#allocation10 + $0x458] sm:$0xff] }
 0x85b   :  { %3834 = vmatprep.subr.bf16.mxu1 %v3833_v5  ;;  %v3873_v5 = vpack.c.bf16 %v2533_v31, %v2531_v63  ;;  %v2800_v31 = vld [vmem:[#allocation10 + $0x408] sm:$0xff] }
 0x85e   :  { %3836 = vmatpush1.bf16.msra.mxu1 %v3835_v4  ;;  %v3875_v4 = vpack.c.bf16 %v2532_v10, %v2530_v7  ;;  %v2807_v7 = vld [vmem:[#allocation10 + $0x4e8] sm:$0xff] }
 0x85f   :  { %3838 = vmatprep.subr.bf16.mxu1 %v3837_v62  ;;  %v3877_v62 = vpack.c.bf16 %v2537_v20, %v2535_v43  ;;  %v2804_v20 = vld [vmem:[#allocation10 + $0x498] sm:$0xff] }
 0x862   :  { %3840 = vmatpush1.bf16.msra.mxu1 %v3839_v15  ;;  %v3879_v15 = vpack.c.bf16 %v2536_v9, %v2534_v53  ;;  %v2811_v53 = vld [vmem:[#allocation10 + $0x578] sm:$0xff] }
 0x863   :  { %3842 = vmatprep.subr.bf16.mxu1 %v3841_v52  ;;  %v3881_v52 = vpack.c.bf16 %v2541_v14, %v2539_v13  ;;  %v2808_v14 = vld [vmem:[#allocation10 + $0x528] sm:$0xff] }
 0x866   :  { %3844 = vmatpush1.bf16.msra.mxu1 %v3843_v21  ;;  %v2774_v21 = vld [vmem:[#allocation10 + $0x60] sm:$0xff] }
 0x867   :  { %3846 = vmatprep.subr.bf16.mxu1 %v3845_v51  ;;  %v2777_v51 = vld [vmem:[#allocation10 + $0xb0] sm:$0xff]  ;;  %v3947_v24 = vpack.c.bf16 %v2774_v21, %v2772_v17  ;;  %v2814_v21 = vld [vmem:[#allocation10 + $0x600] sm:$0xff] }
 0x868   :  { %v3949_v1 = vpack.c.bf16 %v2779_v23, %v2777_v51  ;;  %v2817_v51 = vld [vmem:[#allocation10 + $0x650] sm:$0xff]  ;;  %v2819_v23 = vld [vmem:[#allocation10 + $0x698] sm:$0xff] }
 0x869   :  { %3948 = vmatpush1.bf16.msra.mxu0 %v3947_v24  ;;  %v3987_v24 = vpack.c.bf16 %v2814_v21, %v2812_v19  ;;  %v2557_v19 = vld [vmem:[#allocation8 + $0x920] sm:$0xff] }
 0x86a   :  { %3848 = vmatpush1.bf16.msra.mxu1 %v3847_v8  ;;  %v2778_v8 = vld [vmem:[#allocation10 + $0xf0] sm:$0xff]  ;;  %3950 = vmatprep.subr.bf16.mxu0 %v3949_v1  ;;  %v3989_v1 = vpack.c.bf16 %v2819_v23, %v2817_v51  ;;  %v2554_v23 = vld [vmem:[#allocation8 + $0x8e0] sm:$0xff] }
 0x86b   :  { %3850 = vmatprep.subr.bf16.mxu1 %v3849_v61  ;;  %v2781_v61 = vld [vmem:[#allocation10 + $0x140] sm:$0xff]  ;;  %v3951_v26 = vpack.c.bf16 %v2778_v8, %v2776_v6  ;;  %v2816_v6 = vld [vmem:[#allocation10 + $0x648] sm:$0xff]  ;;  %v2818_v8 = vld [vmem:[#allocation10 + $0x690] sm:$0xff] }
 0x86c   :  { %v3953_v28 = vpack.c.bf16 %v2783_v25, %v2781_v61  ;;  %v2821_v61 = vld [vmem:[#allocation10 + $0x6e0] sm:$0xff]  ;;  %v2823_v25 = vld [vmem:[#allocation10 + $0x728] sm:$0xff] }
 0x86d   :  { %3952 = vmatpush1.bf16.msra.mxu0 %v3951_v26  ;;  %v3991_v26 = vpack.c.bf16 %v2818_v8, %v2816_v6  ;;  %v2561_v6 = vld [vmem:[#allocation8 + $0x990] sm:$0xff] }
 0x86e   :  { %3852 = vmatpush1.bf16.msra.mxu1 %v3851_v32  ;;  %v2782_v32 = vld [vmem:[#allocation10 + $0x180] sm:$0xff]  ;;  %3954 = vmatprep.subr.bf16.mxu0 %v3953_v28  ;;  %v3993_v28 = vpack.c.bf16 %v2823_v25, %v2821_v61  ;;  %v2558_v25 = vld [vmem:[#allocation8 + $0x950] sm:$0xff] }
 0x86f   :  { %3854 = vmatprep.subr.bf16.mxu1 %v3853_v34  ;;  %v2785_v34 = vld [vmem:[#allocation10 + $0x1d0] sm:$0xff]  ;;  %v3955_v36 = vpack.c.bf16 %v2782_v32, %v2780_v30  ;;  %v2820_v30 = vld [vmem:[#allocation10 + $0x6d8] sm:$0xff]  ;;  %v2822_v32 = vld [vmem:[#allocation10 + $0x720] sm:$0xff] }
 0x870   :  { %v3957_v37 = vpack.c.bf16 %v2787_v35, %v2785_v34  ;;  %v2825_v34 = vld [vmem:[#allocation10 + $0x770] sm:$0xff]  ;;  %v2827_v35 = vld [vmem:[#allocation10 + $0x7b8] sm:$0xff] }
 0x871   :  { %3956 = vmatpush1.bf16.msra.mxu0 %v3955_v36  ;;  %v4599_v36 = vld [vmem:[#allocation13 + $0x1c] sm:$0xf] }
 0x872   :  { %3856 = vmatpush1.bf16.msra.mxu1 %v3855_v39  ;;  %v2786_v39 = vld [vmem:[#allocation10 + $0x210] sm:$0xff]  ;;  %3958 = vmatprep.subr.bf16.mxu0 %v3957_v37  ;;  %v3995_v37 = vpack.c.bf16 %v2822_v32, %v2820_v30  ;;  %v2565_v30 = vld [vmem:[#allocation8 + $0xa00] sm:$0xff] }
 0x873   :  { %3858 = vmatprep.subr.bf16.mxu1 %v3857_v55  ;;  %v2789_v55 = vld [vmem:[#allocation10 + $0x260] sm:$0xff]  ;;  %v3959_v41 = vpack.c.bf16 %v2786_v39, %v2784_v27  ;;  %v3997_v27 = vpack.c.bf16 %v2827_v35, %v2825_v34  ;;  %v2824_v39 = vld [vmem:[#allocation10 + $0x768] sm:$0xff] }
 0x874   :  { %v3961_v44 = vpack.c.bf16 %v2791_v40, %v2789_v55  ;;  %v2826_v55 = vld [vmem:[#allocation10 + $0x7b0] sm:$0xff]  ;;  %v2295_v40 = vrot.slane %v4599_v36, %v4467_v18  ;;  %v2562_v35 = vld [vmem:[#allocation8 + $0x9c0] sm:$0xff] }
 0x875   :  { %3960 = vmatpush1.bf16.msra.mxu0 %v3959_v41  ;;  %v2829_v41 = vld [vmem:[#allocation10 + $0x800] sm:$0xff] }
 0x876   :  { %3860 = vmatpush1.bf16.msra.mxu1 %v3859_v46  ;;  %v2790_v46 = vld [vmem:[#allocation10 + $0x2a0] sm:$0xff]  ;;  %3962 = vmatprep.subr.bf16.mxu0 %v3961_v44  ;;  %v2831_v44 = vld [vmem:[#allocation10 + $0x848] sm:$0xff] }
 0x877   :  { %3862 = vmatprep.subr.bf16.mxu1 %v3861_v33  ;;  %v2793_v33 = vld [vmem:[#allocation10 + $0x2f0] sm:$0xff]  ;;  %v3963_v50 = vpack.c.bf16 %v2790_v46, %v2788_v45  ;;  %v2299_v45 = vrot.slane %v4599_v36, %v4472_v22  ;;  %v3999_v46 = vpack.c.bf16 %v2826_v55, %v2824_v39 }
 0x878   :  { %v3965_v54 = vpack.c.bf16 %v2795_v49, %v2793_v33  ;;  %v4001_v49 = vpack.c.bf16 %v2831_v44, %v2829_v41  ;;  %v2569_v39 = vld [vmem:[#allocation8 + $0xa70] sm:$0xff]  ;;  %v2568_v44 = vld [vmem:[#allocation8 + $0xa68] sm:$0xff] }
 0x879   :  { %3964 = vmatpush1.bf16.msra.mxu0 %v3963_v50  ;;  %v2566_v41 = vld [vmem:[#allocation8 + $0xa30] sm:$0xff] }
 0x87a   :  { %3864 = vmatpush1.bf16.msra.mxu1 %v3863_v58  ;;  %v2794_v58 = vld [vmem:[#allocation10 + $0x330] sm:$0xff]  ;;  %3966 = vmatprep.subr.bf16.mxu0 %v3965_v54 }
 0x87b   :  { %3866 = vmatprep.subr.bf16.mxu1 %v3865_v59  ;;  %v2797_v59 = vld [vmem:[#allocation10 + $0x380] sm:$0xff]  ;;  %v3967_v60 = vpack.c.bf16 %v2794_v58, %v2792_v56  ;;  %v2540_v58 = vld [vmem:[#allocation8 + $0x758] sm:$0xff] }
 0x87c   :  { %v3969_v42 = vpack.c.bf16 %v2799_v11, %v2797_v59  ;;  %v2538_v56 = vld [vmem:[#allocation8 + $0x720] sm:$0xff]  ;;  %v2543_v11 = vld [vmem:[#allocation8 + $0x798] sm:$0xff] }
 0x87d   :  { %3968 = vmatpush1.bf16.msra.mxu0 %v3967_v60  ;;  %v2545_v60 = vld [vmem:[#allocation8 + $0x7d0] sm:$0xff] }
 0x87e   :  { %3868 = vmatpush1.bf16.msra.mxu1 %v3867_v47  ;;  %v2798_v47 = vld [vmem:[#allocation10 + $0x3c0] sm:$0xff]  ;;  %3970 = vmatprep.subr.bf16.mxu0 %v3969_v42 }
 0x87f   :  { %3870 = vmatprep.subr.bf16.mxu1 %v3869_v57  ;;  %v2801_v57 = vld [vmem:[#allocation10 + $0x410] sm:$0xff]  ;;  %v3971_v2 = vpack.c.bf16 %v2798_v47, %v2796_v12  ;;  %v3883_v47 = vpack.c.bf16 %v2540_v58, %v2538_v56  ;;  %v2570_v58 = vld [vmem:[#allocation8 + $0xaa0] sm:$0xff] }
 0x880   :  { %v3973_v63 = vpack.c.bf16 %v2803_v3, %v2801_v57 }
 0x881   :  { %3972 = vmatpush1.bf16.msra.mxu0 %v3971_v2 }
 0x882   :  { %3872 = vmatpush1.bf16.msra.mxu1 %v3871_v0  ;;  %v2802_v0 = vld [vmem:[#allocation10 + $0x450] sm:$0xff]  ;;  %3974 = vmatprep.subr.bf16.mxu0 %v3973_v63  ;;  %v3885_v63 = vpack.c.bf16 %v2545_v60, %v2543_v11  ;;  %v2575_v60 = vld [vmem:[#allocation8 + $0xb18] sm:$0xff] }
 0x883   :  { %3874 = vmatprep.subr.bf16.mxu1 %v3873_v5  ;;  %v2805_v5 = vld [vmem:[#allocation10 + $0x4a0] sm:$0xff]  ;;  %v3975_v10 = vpack.c.bf16 %v2802_v0, %v2800_v31  ;;  %v2542_v31 = vld [vmem:[#allocation8 + $0x790] sm:$0xff]  ;;  %v2544_v0 = vld [vmem:[#allocation8 + $0x7c8] sm:$0xff] }
 0x884   :  { %v3977_v43 = vpack.c.bf16 %v2807_v7, %v2805_v5  ;;  %v2547_v7 = vld [vmem:[#allocation8 + $0x808] sm:$0xff] }
 0x885   :  { %3976 = vmatpush1.bf16.msra.mxu0 %v3975_v10  ;;  %v2549_v10 = vld [vmem:[#allocation8 + $0x840] sm:$0xff] }
 0x886   :  { %3876 = vmatpush1.bf16.msra.mxu1 %v3875_v4  ;;  %v2806_v4 = vld [vmem:[#allocation10 + $0x4e0] sm:$0xff]  ;;  %3978 = vmatprep.subr.bf16.mxu0 %v3977_v43 }
 0x887   :  { %3878 = vmatprep.subr.bf16.mxu1 %v3877_v62  ;;  %v2809_v62 = vld [vmem:[#allocation10 + $0x530] sm:$0xff]  ;;  %v3979_v9 = vpack.c.bf16 %v2806_v4, %v2804_v20  ;;  %v3887_v20 = vpack.c.bf16 %v2544_v0, %v2542_v31  ;;  %v2579_v31 = vld [vmem:[#allocation8 + $0xb88] sm:$0xff]  ;;  %v2581_v0 = vld [vmem:[#allocation8 + $0xbc0] sm:$0xff] }
 0x888   :  { %v3981_v13 = vpack.c.bf16 %v2811_v53, %v2809_v62  ;;  %v3889_v62 = vpack.c.bf16 %v2549_v10, %v2547_v7  ;;  %v2546_v53 = vld [vmem:[#allocation8 + $0x800] sm:$0xff]  ;;  %v3921_v7 = vpack.c.bf16 %v2581_v0, %v2579_v31 }
 0x889   :  { %3980 = vmatpush1.bf16.msra.mxu0 %v3979_v9  ;;  %v2548_v9 = vld [vmem:[#allocation8 + $0x838] sm:$0xff]  ;;  %v2578_v10 = vld [vmem:[#allocation8 + $0xb80] sm:$0xff] }
 0x88a   :  { %3880 = vmatpush1.bf16.msra.mxu1 %v3879_v15  ;;  %v2810_v15 = vld [vmem:[#allocation10 + $0x570] sm:$0xff]  ;;  %3982 = vmatprep.subr.bf16.mxu0 %v3981_v13  ;;  %v2551_v13 = vld [vmem:[#allocation8 + $0x878] sm:$0xff] }
 0x88b   :  { %3882 = vmatprep.subr.bf16.mxu1 %v3881_v52  ;;  %v2813_v52 = vld [vmem:[#allocation10 + $0x5c0] sm:$0xff]  ;;  %v3983_v16 = vpack.c.bf16 %v2810_v15, %v2808_v14  ;;  %v2553_v14 = vld [vmem:[#allocation8 + $0x8b0] sm:$0xff]  ;;  %v3891_v15 = vpack.c.bf16 %v2548_v9, %v2546_v53 }
 0x88c   :  { %v3985_v17 = vpack.c.bf16 %v2815_v48, %v2813_v52  ;;  %v3893_v52 = vpack.c.bf16 %v2553_v14, %v2551_v13  ;;  %v2550_v48 = vld [vmem:[#allocation8 + $0x870] sm:$0xff]  ;;  %v2584_v13 = vld [vmem:[#allocation8 + $0xc28] sm:$0xff] }
 0x88d   :  { %3984 = vmatpush1.bf16.msra.mxu0 %v3983_v16  ;;  %v2552_v16 = vld [vmem:[#allocation8 + $0x8a8] sm:$0xff]  ;;  %v2582_v9 = vld [vmem:[#allocation8 + $0xbf0] sm:$0xff] }
 0x88e   :  { %3986 = vmatprep.subr.bf16.mxu0 %v3985_v17  ;;  %v2555_v17 = vld [vmem:[#allocation8 + $0x8e8] sm:$0xff]  ;;  %v3895_v21 = vpack.c.bf16 %v2552_v16, %v2550_v48  ;;  %v2586_v16 = vld [vmem:[#allocation8 + $0xc60] sm:$0xff] }
 0x88f   :  { %v3897_v51 = vpack.c.bf16 %v2557_v19, %v2555_v17  ;;  %v2587_v14 = vld [vmem:[#allocation8 + $0xc68] sm:$0xff]  ;;  %v2588_v17 = vld [vmem:[#allocation8 + $0xc98] sm:$0xff] }
 0x890   :  { %v2591_v19 = vld [vmem:[#allocation8 + $0xcd8] sm:$0xff] }
 0x891   :  { %3988 = vmatpush1.bf16.msra.mxu0 %v3987_v24  ;;  %v2556_v24 = vld [vmem:[#allocation8 + $0x918] sm:$0xff] }
 0x892   :  { %3990 = vmatprep.subr.bf16.mxu0 %v3989_v1  ;;  %v2559_v1 = vld [vmem:[#allocation8 + $0x958] sm:$0xff]  ;;  %v3899_v8 = vpack.c.bf16 %v2556_v24, %v2554_v23  ;;  %v2590_v24 = vld [vmem:[#allocation8 + $0xcd0] sm:$0xff] }
 0x893   :  { %v3901_v61 = vpack.c.bf16 %v2561_v6, %v2559_v1  ;;  %v2592_v1 = vld [vmem:[#allocation8 + $0xd08] sm:$0xff] }
 0x894   :  { %v2595_v6 = vld [vmem:[#allocation8 + $0xd48] sm:$0xff] }
 0x895   :  { %3992 = vmatpush1.bf16.msra.mxu0 %v3991_v26  ;;  %v2560_v26 = vld [vmem:[#allocation8 + $0x988] sm:$0xff] }
 0x896   :  { %3994 = vmatprep.subr.bf16.mxu0 %v3993_v28  ;;  %v2563_v28 = vld [vmem:[#allocation8 + $0x9c8] sm:$0xff]  ;;  %v3903_v32 = vpack.c.bf16 %v2560_v26, %v2558_v25  ;;  %v2594_v26 = vld [vmem:[#allocation8 + $0xd40] sm:$0xff] }
 0x897   :  { %v3905_v34 = vpack.c.bf16 %v2565_v30, %v2563_v28  ;;  %v2596_v28 = vld [vmem:[#allocation8 + $0xd78] sm:$0xff] }
 0x898   :  { %v2599_v30 = vld [vmem:[#allocation8 + $0xdb8] sm:$0xff] }
 0x899   :  { %3996 = vmatpush1.bf16.msra.mxu0 %v3995_v37  ;;  %v2564_v37 = vld [vmem:[#allocation8 + $0x9f8] sm:$0xff] }
 0x89a   :  { %3998 = vmatprep.subr.bf16.mxu0 %v3997_v27  ;;  %v2567_v27 = vld [vmem:[#allocation8 + $0xa38] sm:$0xff]  ;;  %v3907_v55 = vpack.c.bf16 %v2564_v37, %v2562_v35  ;;  %v2303_v35 = vrot.slane %v4599_v36, %v4493_v38 }
 0x89b   :  { %v2828_v38 = vld [vmem:[#allocation10 + $0x7f8] sm:$0xff] }
 0x89d   :  { %4000 = vmatpush1.bf16.msra.mxu0 %v3999_v46  ;;  %v2571_v46 = vld [vmem:[#allocation8 + $0xaa8] sm:$0xff] }
 0x89e   :  { %4002 = vmatprep.subr.bf16.mxu0 %v4001_v49 }
 0x900   :  { %v2378_v33 = vpop.f32.mrb[20].mxu1 }
 0x901   :  { %v2379_v50 = vadd.f32 %v2378_v33, %v2295_v40  ;;  %v2380_v54 = vpop.f32.mrb[21].mxu1  ;;  %v2573_v33 = vld [vmem:[#allocation8 + $0xae0] sm:$0xff] }
 0x902   :  { %v2381_v59 = vadd.f32 %v2380_v54, %v2299_v45  ;;  %v3913_v56 = vpack.c.bf16 %v2573_v33, %v2571_v46 }
 0x903   :  { %v2466_v57 = vmax.f32 %v2379_v50, 0.0  ;;  %v3911_v50 = vpack.c.bf16 %v2568_v44, %v2566_v41 }
 0x904   :  { %v2467_v42 = vmax.f32 %v2381_v59, 0.0  ;;  %v2384_v12 = vpop.f32.mrb[22].mxu1  ;;  %v2572_v59 = vld [vmem:[#allocation8 + $0xad8] sm:$0xff] }
 0x905   :  { %v2385_v3 = vadd.f32 %v2384_v12, %v2295_v40  ;;  %v2386_v2 = vpop.f32.mrb[23].mxu1  ;;  %v3909_v40 = vpack.c.bf16 %v2569_v39, %v2567_v27  ;;  %v2598_v27 = vld [vmem:[#allocation8 + $0xdb0] sm:$0xff]  ;;  %v2600_v39 = vld [vmem:[#allocation8 + $0xde8] sm:$0xff] }
 0x906   :  { %v2387_v5 = vadd.f32 %v2386_v2, %v2299_v45  ;;  %2678 = vmatprep.mubr.f32.mxu1 %v2467_v42  ;;  %v4607_v45 = vrot.slane %v4599_v36, %v4477_v29  ;;  %v2577_v42 = vld [vmem:[#allocation8 + $0xb50] sm:$0xff]  ;;  %v3915_v29 = vpack.c.bf16 %v2572_v59, %v2570_v58  ;;  %v2830_v36 = vld [vmem:[#allocation10 + $0x840] sm:$0xff]  ;;  %v2835_v58 = vld [vmem:[#allocation10 + $0x8d8] sm:$0xff] }
 0x907   :  { %2679 = vmatmul.mubr.f32.vlgmr.msra.gmra.mrb[28].mxu1 %v2466_v57  ;;  %v2470_v4 = vmax.f32 %v2385_v3, 0.0  ;;  %v3917_v3 = vpack.c.bf16 %v2577_v42, %v2575_v60  ;;  %v2574_v2 = vld [vmem:[#allocation8 + $0xb10] sm:$0xff] }
 0x908   :  { %v2471_v43 = vmax.f32 %v2387_v5, 0.0  ;;  %3884 = vmatpush1.bf16.msra.mxu1 %v3883_v47 }
 0x909   :  { %3886 = vmatprep.subr.bf16.mxu1 %v3885_v63  ;;  %v2576_v63 = vld [vmem:[#allocation8 + $0xb48] sm:$0xff] }
 0x90a   :  { %2684 = vmatprep.mubr.f32.mxu1 %v2471_v43  ;;  %v3919_v5 = vpack.c.bf16 %v2576_v63, %v2574_v2  ;;  %v2580_v43 = vld [vmem:[#allocation8 + $0xbb8] sm:$0xff] }
 0x90b   :  { %2685 = vmatmul.mubr.f32.gmra.mrb[30].mxu1 %v2470_v4  ;;  %v2585_v4 = vld [vmem:[#allocation8 + $0xc30] sm:$0xff] }
 0x90c   :  { %3888 = vmatpush1.bf16.msra.mxu1 %v3887_v20  ;;  %v2583_v20 = vld [vmem:[#allocation8 + $0xbf8] sm:$0xff] }
 0x90d   :  { %3890 = vmatprep.subr.bf16.mxu1 %v3889_v62  ;;  %v3923_v62 = vpack.c.bf16 %v2580_v43, %v2578_v10  ;;  %v3925_v53 = vpack.c.bf16 %v2585_v4, %v2583_v20 }
 0x910   :  { %3892 = vmatpush1.bf16.msra.mxu1 %v3891_v15  ;;  %v2589_v15 = vld [vmem:[#allocation8 + $0xca0] sm:$0xff] }
 0x911   :  { %3894 = vmatprep.subr.bf16.mxu1 %v3893_v52  ;;  %v3927_v52 = vpack.c.bf16 %v2584_v13, %v2582_v9  ;;  %v3929_v48 = vpack.c.bf16 %v2589_v15, %v2587_v14 }
 0x914   :  { %3896 = vmatpush1.bf16.msra.mxu1 %v3895_v21  ;;  %v2593_v21 = vld [vmem:[#allocation8 + $0xd10] sm:$0xff] }
 0x915   :  { %3898 = vmatprep.subr.bf16.mxu1 %v3897_v51  ;;  %v3931_v51 = vpack.c.bf16 %v2588_v17, %v2586_v16  ;;  %v3933_v23 = vpack.c.bf16 %v2593_v21, %v2591_v19 }
 0x918   :  { %3900 = vmatpush1.bf16.msra.mxu1 %v3899_v8  ;;  %v2597_v8 = vld [vmem:[#allocation8 + $0xd80] sm:$0xff] }
 0x919   :  { %3902 = vmatprep.subr.bf16.mxu1 %v3901_v61  ;;  %v3935_v61 = vpack.c.bf16 %v2592_v1, %v2590_v24  ;;  %v3937_v25 = vpack.c.bf16 %v2597_v8, %v2595_v6 }
 0x91c   :  { %3904 = vmatpush1.bf16.msra.mxu1 %v3903_v32  ;;  %v2601_v32 = vld [vmem:[#allocation8 + $0xdf0] sm:$0xff] }
 0x91d   :  { %3906 = vmatprep.subr.bf16.mxu1 %v3905_v34  ;;  %v3939_v34 = vpack.c.bf16 %v2596_v28, %v2594_v26  ;;  %v3941_v37 = vpack.c.bf16 %v2601_v32, %v2599_v30 }
 0x920   :  { %v4609_v49 = vpop.f32.mrb[24].mxu1  ;;  %3908 = vmatpush1.bf16.msra.mxu1 %v3907_v55  ;;  %v3943_v55 = vpack.c.bf16 %v2600_v39, %v2598_v27 }
 0x921   :  { %v2457_v54 = vpop.f32.mrb[25].mxu1  ;;  %3910 = vmatprep.subr.bf16.mxu1 %v3909_v40  ;;  %v2456_v40 = vadd.f32 %v4609_v49, %v2303_v35  ;;  %v2832_v49 = vld [vmem:[#allocation10 + $0x888] sm:$0xff] }
 0x922   :  { %v2458_v11 = vadd.f32 %v2457_v54, %v4607_v45  ;;  %v4003_v54 = vpack.c.bf16 %v2830_v36, %v2828_v38 }
 0x923   :  { %v2468_v44 = vmax.f32 %v2456_v40, 0.0 }
 0x924   :  { %v2469_v12 = vmax.f32 %v2458_v11, 0.0  ;;  %v4612_v47 = vpop.f32.mrb[26].mxu1  ;;  %3912 = vmatpush1.bf16.msra.mxu1 %v3911_v50  ;;  %4004 = vmatpush1.bf16.msra.mxu0 %v4003_v54  ;;  %v2834_v11 = vld [vmem:[#allocation10 + $0x8d0] sm:$0xff] }
 0x925   :  { %v2463_v57 = vpop.f32.mrb[27].mxu1  ;;  %3914 = vmatprep.subr.bf16.mxu1 %v3913_v56  ;;  %v2462_v46 = vadd.f32 %v4612_v47, %v2303_v35  ;;  %v2833_v56 = vld [vmem:[#allocation10 + $0x890] sm:$0xff]  ;;  %v4007_v60 = vpack.c.bf16 %v2834_v11, %v2832_v49 }
 0x926   :  { %2755 = vmatprep.mubr.f32.mxu1 %v2469_v12  ;;  %v2464_v41 = vadd.f32 %v2463_v57, %v4607_v45  ;;  %v4005_v59 = vpack.c.bf16 %v2835_v58, %v2833_v56  ;;  %v2602_v45 = vld [vmem:[#allocation13 + $0xa] sm:$0x3] }
 0x927   :  { %v2472_v50 = vmax.f32 %v2462_v46, 0.0  ;;  %v2607_v42 = vrot.slane %v2602_v45, %v4467_v18  ;;  %v2611_v12 = vrot.slane %v2602_v45, %v4472_v22 }
 0x928   :  { %3916 = vmatpush1.bf16.msra.mxu1 %v3915_v29  ;;  %v2473_v33 = vmax.f32 %v2464_v41, 0.0  ;;  %4006 = vmatprep.subr.bf16.mxu0 %v4005_v59 }
 0x929   :  { %3918 = vmatprep.subr.bf16.mxu1 %v3917_v3  ;;  %4008 = vmatpush1.bf16.msra.mxu0 %v4007_v60 }
 0x92c   :  { %3920 = vmatpush1.bf16.msra.mxu1 %v3919_v5 }
 0x92d   :  { %3922 = vmatprep.subr.bf16.mxu1 %v3921_v7 }
 0x930   :  { %3924 = vmatpush1.bf16.msra.mxu1 %v3923_v62 }
 0x931   :  { %3926 = vmatprep.subr.bf16.mxu1 %v3925_v53 }
 0x934   :  { %3928 = vmatpush1.bf16.msra.mxu1 %v3927_v52 }
 0x935   :  { %3930 = vmatprep.subr.bf16.mxu1 %v3929_v48 }
 0x938   :  { %3932 = vmatpush1.bf16.msra.mxu1 %v3931_v51 }
 0x939   :  { %3934 = vmatprep.subr.bf16.mxu1 %v3933_v23 }
 0x93c   :  { %3936 = vmatpush1.bf16.msra.mxu1 %v3935_v61 }
 0x93d   :  { %3938 = vmatprep.subr.bf16.mxu1 %v3937_v25 }
 0x940   :  { %3940 = vmatpush1.bf16.msra.mxu1 %v3939_v34 }
 0x941   :  { %3942 = vmatprep.subr.bf16.mxu1 %v3941_v37 }
 0x944   :  { %3944 = vmatpush1.bf16.msra.mxu1 %v3943_v55 }
 0x947   :  { %2756 = vmatmul.mubr.f32.vlgmr.msra.gmra.mrb[28].mxu1 %v2468_v44 }
 0x948   :  { %2761 = vmatprep.mubr.f32.mxu1 %v2473_v33 }
 0x94b   :  { %2762 = vmatmul.mubr.f32.gmra.mrb[30].mxu1 %v2472_v50 }
 0xa1a   :  { %v2757_v47 = vpop.f32.mrb[28].mxu1 }
 0xa1b   :  { %v4017_v29 = vadd.f32 %v2757_v47, %v2607_v42  ;;  %v2759_v57 = vpop.f32.mrb[29].mxu1 }
 0xa1c   :  { %v4018_v3 = vadd.f32 %v2759_v57, %v2611_v12 }
 0xa1d   :  { %v2768_v31 = vmax.f32 %v4017_v29, 0.0 }
 0xa1e   :  { %v2769_v2 = vmax.f32 %v4018_v3, 0.0  ;;  %v2763_v63 = vpop.f32.mrb[30].mxu1 }
 0xa1f   :  { %v4019_v0 = vadd.f32 %v2763_v63, %v2607_v42  ;;  %v2765_v5 = vpop.f32.mrb[31].mxu1 }
 0xa20   :  { %v4020_v7 = vadd.f32 %v2765_v5, %v2611_v12  ;;  %2912 = vmatprep.mubr.f32.mxu0 %v2769_v2 }
 0xa21   :  { %2913 = vmatmul.mubr.f32.vlgmr.msra.gmra.mrb[36].mxu0 %v2768_v31  ;;  %v2770_v43 = vmax.f32 %v4019_v0, 0.0 }
 0xa22   :  { %v2771_v10 = vmax.f32 %v4020_v7, 0.0 }
 0xa24   :  { %2918 = vmatprep.mubr.f32.mxu0 %v2771_v10 }
 0xa25   :  { %2919 = vmatmul.mubr.f32.gmra.mrb[38].mxu0 %v2770_v43 }
 0xa26   :  { %4233 = shalt.err (!%p4230_p4)
}
 0xa27   :  { %s4234_s10 = scalar_lea.hbm %s4657_s7, 256 }
 0xa28   :  { %p4235_p5 = scmp.ne.s32.totalorder %s4657_s7, %s4234_s10  ;;  %p4238_p6 = scmp.lt.u32.totalorder %s4234_s10, %s4657_s7 }
 0xa2a   :  { %p4240_p7 = pnand %p4238_p6, %p4235_p5 }
 0xa2c   :  { %4243 = shalt.err (!%p4240_p7)
}
 0xa2d   :  { %2940 = dma.vmem_to_hbm [thread:$0]  %s2935_s27, 256, %s4657_s7, [#allocation4], %s4280_s17, %s4280_s17, %s4281_s18   ;;  %v2836_v20 = vld [vmem:[#allocation13 + $0x10] sm:$0x3] }
 0xa2e   :  { %v2841_v4 = vrot.slane %v2836_v20, %v4467_v18  ;;  %v2845_v62 = vrot.slane %v2836_v20, %v4472_v22  ;;  %s4297_s29 = smov [#allocation15]  }
 0xa2f   :  { %s2946_s15 = sshll.u32 %s4297_s29, 4  ;;  %s2947_s15 = int_to_ptr.vmem [resolvable:$true] %s2946_s15 }
 0xa30   :  { %s4244_s7 = scalar_lea.vmem %s2947_s15, 512  ;;  %p4249_p9 = scmp.lt.s32.totalorder %s2947_s15, %s2947_s15 }
 0xa31   :  { %p4245_p8 = scmp.ne.s32.totalorder %s2947_s15, %s4244_s7  ;;  %p4250_p10 = scmp.lt.s32.totalorder %s4244_s7, %s4244_s7 }
 0xa33   :  { %p4251_p11 = por %p4250_p10, %p4249_p9 }
 0xa35   :  { %p4252_p12 = pnand %p4251_p11, %p4245_p8 }
 0xaf4   :  { %v2914_v53 = vpop.f32.mrb[36].mxu0 }
 0xaf5   :  { %v2915_v9 = vadd.f32 %v2914_v53, %v2841_v4  ;;  %v2916_v13 = vpop.f32.mrb[37].mxu0 }
 0xaf6   :  { %v2917_v14 = vadd.f32 %v2916_v13, %v2845_v62 }
 0xaf7   :  { %2925 = vst [vmem:[#allocation15] sm:$0xff] %v2915_v9 }
 0xaf8   :  { %2926 = vst [vmem:[#allocation15 + $0x8] sm:$0xff] %v2917_v14  ;;  %v2920_v15 = vpop.f32.mrb[38].mxu0 }
 0xaf9   :  { %v2921_v52 = vadd.f32 %v2920_v15, %v2841_v4  ;;  %v2922_v48 = vpop.f32.mrb[39].mxu0 }
 0xafa   :  { %v2923_v16 = vadd.f32 %v2922_v48, %v2845_v62 }
 0xafb   :  { %2927 = vst [vmem:[#allocation15 + $0x10] sm:$0xff] %v2921_v52 }
 0xafc   :  { %2928 = vst [vmem:[#allocation15 + $0x18] sm:$0xff] %v2923_v16 }
 0xafd   :  { %4255 = shalt.err (!%p4252_p12)
}
 0xafe   :  { %s4256_s16 = scalar_lea.hbm %s4658_s8, 512 }
 0xaff   :  { %p4257_p13 = scmp.ne.s32.totalorder %s4658_s8, %s4256_s16  ;;  %p4260_p0 = scmp.lt.u32.totalorder %s4256_s16, %s4658_s8 }
 0xb01   :  { %p4262_p1 = pnand %p4260_p0, %p4257_p13 }
 0xb03   :  { %4265 = shalt.err (!%p4262_p1)
}
 0xb04   :  { %s4298_s3 = smov 256   ;;  %s4299_s30 = smov 16  }
 0xb05   :  { %2952 = dma.vmem_to_hbm [thread:$0]  %s2947_s15, 512, %s4658_s8, [#allocation16], %s4298_s3, %s4298_s3, %s4299_s30  }
 0xb06   :  { %4274 = dma.done.wait [#allocation4], 256  }
 0xb07   :  { %4275 = vsyncadd [#allocation4], 4294967040 }
 0xb08   :  { %4276 = dma.done.wait [#allocation16], 512  }
 0xb09   :  { %4277 = vsyncadd [#allocation16], 4294966784 }
 0xb0a   :  { %2959 = vsyncpa [#allocation3], 1 }
 0xb0b   :  { %2960 = vsyncpa [#allocation6], 1 }
 0xb0c   :  { %2961 = vsyncpa [#allocation9], 1 }
 0xb0d   :  { %2962 = vsyncpa [#allocation12], 1 }
 0xb0e   :  { %2963 = vsyncpa [#allocation4], 1 }
 0xb0f   :  { %2964 = vsyncpa [#allocation16], 1 }

</bundles_post_ra>
